<compile_context>
chip_gen: v7x
topology: tpu7x:2x2x1
jax: 0.10.0
libtpu: 0.0.40
codegen_flags: <defaults>
</compile_context>

<pallas_src>
import functools

import jax
import jax.numpy as jnp
from jax.experimental import pallas as pl
from jax.experimental.pallas import tpu as pltpu

LANE = 128   # TPU lane width: channel dims are zero-padded to 128 lanes.
SLOT = 16    # lanes per packed 3x3 tap slot (real channel counts are <= 16).

# 8 off-center taps (slot j = position in this list) + the center tap handled
# separately (lanes [128, 128+c) of the K=256 operand / weight slab).
OFF_TAPS = [(oh, ow) for oh in (-1, 0, 1) for ow in (-1, 0, 1) if (oh, ow) != (0, 0)]


# ----------------------------------------------------------------------------
# Fused forward kernel.  Grid = (batch // b_tile,): b_tile images per step.
# ----------------------------------------------------------------------------
def _fused_forward_kernel(x_ref, w_stem_ref, w2_ref, w_1x1_ref, bias_ref,
                          sel_ref, logits_ref, *, height, width, b_tile, feat_dim):
    hw = height * width
    rows = b_tile * hw
    cp = LANE

    if b_tile == 1:
        x = x_ref[0]                                  # (hw, 128) f32
    else:
        x = x_ref[...].reshape(rows, cp)              # images stacked on sublanes

    # ---- geometry masks: built ONCE, shared by both 3x3 convs --------------
    # pos/col are positions *within an image*; hw and width are powers of two,
    # so mod is a bitwise AND (also makes batch stacking + roll wrap safe).
    row_i = jax.lax.broadcasted_iota(jnp.int32, (rows, cp), 0)
    pos = row_i & (hw - 1)
    col = pos & (width - 1)
    lane = jax.lax.broadcasted_iota(jnp.int32, (rows, cp), 1)

    # One multiplicative mask packed per 16-lane slot: lane slot j carries the
    # SAME-padding validity mask of off-center tap j.  One multiply per conv
    # replaces per-tap compare/AND/select passes.
    mask = jnp.ones((rows, cp), jnp.float32)
    for j, (oh, ow) in enumerate(OFF_TAPS):
        conds = []
        if oh < 0:
            conds.append(pos >= (-oh) * width)
        if oh > 0:
            conds.append(pos < (height - oh) * width)
        if ow < 0:
            conds.append(col >= (-ow))
        if ow > 0:
            conds.append(col < width - ow)
        valid = conds[0]
        for c in conds[1:]:
            valid = valid & c
        in_slot = (lane >= j * SLOT) & (lane < (j + 1) * SLOT)
        mask = jnp.where(in_slot & jnp.logical_not(valid), 0.0, mask)

    def bias_row(i):
        return bias_ref[i:i + 1, :]                   # (1, 128) f32

    def conv3x3(inp, w_ref, bias, relu):
        # Build the K-packed operand: off-center taps at 16-lane slots of the
        # first 128 lanes (spatial roll + lane roll; padded lanes are exactly
        # zero so the sum has no collisions), center tap concatenated as lanes
        # [128, 256).  ONE K=256 MXU dot replaces 9 K=128 dots + 9 f32 adds.
        a_off = None
        for j, (oh, ow) in enumerate(OFF_TAPS):
            shift = (-(oh * width + ow)) % rows
            v = pltpu.roll(inp, shift=shift, axis=0)          # spatial shift (f32)
            if j:
                v = pltpu.roll(v, shift=j * SLOT, axis=1)     # move to lane slot j
            a_off = v if a_off is None else a_off + v
        a_off = (a_off * mask).astype(jnp.bfloat16)           # one mask mul + one cast
        a = jnp.concatenate([a_off, inp.astype(jnp.bfloat16)], axis=1)  # (rows, 256)
        out = jnp.dot(a, w_ref[...], preferred_element_type=jnp.float32) + bias
        return jnp.maximum(out, 0.0) if relu else out

    def conv1x1(inp_b, w, bias, relu):
        out = jnp.dot(inp_b, w, preferred_element_type=jnp.float32) + bias
        return jnp.maximum(out, 0.0) if relu else out

    # Stem conv (stands in for conv1/layer1..3 of resnet101).
    hidden = conv3x3(x, w_stem_ref, bias_row(0), relu=True)
    hidden_b = hidden.astype(jnp.bfloat16)            # cast once; reused by 2 consumers

    # "layer4": bottleneck-style residual block (1x1 -> 3x3 -> 1x1) + 1x1 skip.
    y = conv1x1(hidden_b, w_1x1_ref[0], bias_row(1), relu=True)
    y = conv3x3(y, w2_ref, bias_row(2), relu=True)
    y = conv1x1(y.astype(jnp.bfloat16), w_1x1_ref[1], bias_row(3), relu=False)
    skip = conv1x1(hidden_b, w_1x1_ref[2], bias_row(4), relu=False)
    layer4 = jnp.maximum(y + skip, 0.0)               # (rows, 128) f32; lanes>=feat_dim are 0

    # Forward-hook capture, written lane-dense as (feat_dim, H*W) per image.
    if b_tile == 1:
        sel_ref[0] = jnp.transpose(layer4, (1, 0))[:feat_dim, :]
    else:
        l4 = layer4.reshape(b_tile, hw, cp)
        sel_ref[...] = jnp.transpose(l4, (0, 2, 1))[:, :feat_dim, :]

    # AdaptiveAvgPool2d((1,1)) + flatten + fc, fused in the same kernel.
    if b_tile == 1:
        pooled = jnp.mean(layer4, axis=0, keepdims=True)                  # (1, 128)
        logits_ref[0] = jnp.dot(pooled.astype(jnp.bfloat16), w_1x1_ref[3],
                                preferred_element_type=jnp.float32) + bias_row(5)
    else:
        pooled = jnp.mean(layer4.reshape(b_tile, hw, cp), axis=1)         # (b_tile, 128)
        logits = jnp.dot(pooled.astype(jnp.bfloat16), w_1x1_ref[3],
                         preferred_element_type=jnp.float32) + bias_row(5)
        logits_ref[...] = logits.reshape(b_tile, 1, cp)


# ----------------------------------------------------------------------------
# Wrapper
# ----------------------------------------------------------------------------
def _pick_b_tile(n, max_tile=8):
    # Largest per-step batch tile that keeps >= 2 grid steps (v7x has 2 TCs).
    best = 1
    for t in range(1, min(max_tile, n) + 1):
        if n % t == 0 and n // t >= 2:
            best = t
    return best


def grad_cam_forward(params, x_nchw, *, feat_dim, n_classes,
                     channels=(3, 16, 8), b_tile=None):
    """Returns (logits, selected_out) like GradCamModel.forward.

    x_nchw: (N, C, H, W) f32.  selected_out: (N, feat_dim, H, W) NCHW (the
    'layer4' activations captured by the forward hook)."""
    n, c_in, height, width = x_nchw.shape
    hw = height * width
    if width & (width - 1) or hw & (hw - 1) or hw < 8:
        raise ValueError("height*width and width must be powers of two")
    if c_in > SLOT or feat_dim > LANE or n_classes > LANE:
        raise ValueError("unsupported shape for the fused kernel")
    if b_tile is None:
        b_tile = _pick_b_tile(n)
    if n % b_tile:
        raise ValueError("batch must be divisible by b_tile")

    # NCHW -> channels-last, flattened spatial, channels zero-padded to 128 lanes.
    x_flat = jnp.transpose(x_nchw, (0, 2, 3, 1)).reshape(n, hw, c_in)
    x_pad = jnp.pad(x_flat, ((0, 0), (0, 0), (0, LANE - c_in)))

    kernel = functools.partial(_fused_forward_kernel, height=height, width=width,
                               b_tile=b_tile, feat_dim=feat_dim)

    # Cost estimate from REAL channel dims (not the 128-lane padded contractions).
    c_in_r, c_stem, c_mid = channels
    flops = 2 * n * hw * (9 * c_in_r * c_stem + c_stem * c_mid + 9 * c_mid * c_mid
                          + c_mid * feat_dim + c_stem * feat_dim) \
            + 2 * n * feat_dim * n_classes
    bytes_accessed = (x_pad.size * 4
                      + params["w_stem_k"].size * 2 + params["w2_k"].size * 2
                      + params["w_1x1"].size * 2 + params["biases"].size * 4
                      + n * feat_dim * hw * 4 + n * LANE * 4)

    sel_flat, logits_pad = pl.pallas_call(
        kernel,
        out_shape=(
            jax.ShapeDtypeStruct((n, feat_dim, hw), jnp.float32),   # layer4 (N, C, H*W)
            jax.ShapeDtypeStruct((n, 1, LANE), jnp.float32),        # lane-padded logits
        ),
        grid=(n // b_tile,),
        in_specs=[
            pl.BlockSpec((b_tile, hw, LANE), lambda b: (b, 0, 0)),   # images
            pl.BlockSpec((2 * LANE, LANE), lambda b: (0, 0)),        # stem K-packed taps (bf16)
            pl.BlockSpec((2 * LANE, LANE), lambda b: (0, 0)),        # block K-packed taps (bf16)
            pl.BlockSpec((4, LANE, LANE), lambda b: (0, 0, 0)),      # w1/w3/skip/fc (bf16)
            pl.BlockSpec((8, LANE), lambda b: (0, 0)),               # packed biases (f32)
        ],
        out_specs=(
            pl.BlockSpec((b_tile, feat_dim, hw), lambda b: (b, 0, 0)),
            pl.BlockSpec((b_tile, 1, LANE), lambda b: (b, 0, 0)),
        ),
        compiler_params=pltpu.CompilerParams(
            dimension_semantics=("parallel",),       # >=2 steps -> both v7x TensorCores
            vmem_limit_bytes=32 * 1024 * 1024,
        ),
        cost_estimate=pl.CostEstimate(flops=flops, transcendentals=0,
                                      bytes_accessed=bytes_accessed),
    )(x_pad, params["w_stem_k"], params["w2_k"], params["w_1x1"], params["biases"])

    selected_out = sel_flat.reshape(n, feat_dim, height, width)     # free reshape to NCHW
    logits = logits_pad.reshape(n, LANE)[:, :n_classes]
    return logits, selected_out


# ----------------------------------------------------------------------------
# Parameters: raw PyTorch-layout weights + K-packed / lane-padded kernel
# weights (all packing hoisted to init time).
# ----------------------------------------------------------------------------
def _pad_to_lane_2d(m):
    r, c = m.shape
    return jnp.pad(m, ((0, LANE - r), (0, LANE - c)))


def _pack_conv3x3_k(w_oihw):
    """Pack a (c_out, c_in, 3, 3) conv weight into one (256, 128) bf16 slab:
    off-center tap j occupies K rows [j*16, j*16+c_in); the center tap occupies
    K rows [128, 128+c_in)."""
    c_out, c_in, kh, kw = w_oihw.shape
    assert (kh, kw) == (3, 3) and c_in <= SLOT and c_out <= LANE
    w = jnp.transpose(w_oihw, (2, 3, 1, 0))        # (3, 3, c_in, c_out)
    slab = jnp.zeros((2 * LANE, LANE), jnp.float32)
    for j, (oh, ow) in enumerate(OFF_TAPS):
        slab = slab.at[j * SLOT:j * SLOT + c_in, :c_out].set(w[oh + 1, ow + 1])
    slab = slab.at[LANE:LANE + c_in, :c_out].set(w[1, 1])     # center tap
    return slab.astype(jnp.bfloat16)


def _pad_bias(v):
    return jnp.pad(v, (0, LANE - v.shape[0]))


def pack_params(raw):
    """Lane-pad to 128, reorder to (K, N) matmul layout, K-pack the 3x3 taps,
    cast MXU operands to bf16 (accumulation stays f32 in-kernel)."""
    w1 = jnp.transpose(raw["w1"][:, :, 0, 0])            # (c_stem, c_mid)
    w3 = jnp.transpose(raw["w3"][:, :, 0, 0])            # (c_mid, feat_dim)
    w_skip = jnp.transpose(raw["w_skip"][:, :, 0, 0])    # (c_stem, feat_dim)
    w_fc = jnp.transpose(raw["w_fc"])                    # (feat_dim, n_classes)
    return {
        "w_stem_k": _pack_conv3x3_k(raw["w_stem"]),
        "w2_k": _pack_conv3x3_k(raw["w2"]),
        "w_1x1": jnp.stack([_pad_to_lane_2d(w1), _pad_to_lane_2d(w3),
                            _pad_to_lane_2d(w_skip), _pad_to_lane_2d(w_fc)]
                           ).astype(jnp.bfloat16),
        "biases": jnp.stack([_pad_bias(raw["b_stem"]), _pad_bias(raw["b1"]),
                             _pad_bias(raw["b2"]), _pad_bias(raw["b3"]),
                             _pad_bias(raw["b_skip"]), _pad_bias(raw["b_fc"]),
                             jnp.zeros((LANE,), jnp.float32),
                             jnp.zeros((LANE,), jnp.float32)]).astype(jnp.float32),
    }


def init_params(key, *, c_in=3, c_stem=16, c_mid=8, feat_dim=32, n_classes=10):
    ks = jax.random.split(key, 6)

    def kaiming(k, shape, fan_in):
        return (jax.random.normal(k, shape, jnp.float32)
                * jnp.sqrt(2.0 / fan_in)).astype(jnp.float32)

    raw = {
        "w_stem": kaiming(ks[0], (c_stem, c_in, 3, 3), c_in * 9),
        "b_stem": jnp.zeros((c_stem,), jnp.float32),
        "w1": kaiming(ks[1], (c_mid, c_stem, 1, 1), c_stem),
        "b1": jnp.zeros((c_mid,), jnp.float32),
        "w2": kaiming(ks[2], (c_mid, c_mid, 3, 3), c_mid * 9),
        "b2": jnp.zeros((c_mid,), jnp.float32),
        "w3": kaiming(ks[3], (feat_dim, c_mid, 1, 1), c_mid),
        "b3": jnp.zeros((feat_dim,), jnp.float32),
        "w_skip": kaiming(ks[4], (feat_dim, c_stem, 1, 1), c_stem),
        "b_skip": jnp.zeros((feat_dim,), jnp.float32),
        "w_fc": kaiming(ks[5], (n_classes, feat_dim), feat_dim),   # Linear (out, in)
        "b_fc": jnp.zeros((n_classes,), jnp.float32),
    }
    return raw, pack_params(raw)


# ----------------------------------------------------------------------------
# Pure-JAX reference (XLA convs).  MXU operands are cast to bf16 exactly like
# the kernel (f32 accumulation), so the comparison tolerance can be tight.
# ----------------------------------------------------------------------------
def reference_forward(raw, x_nchw):
    def conv(x, w_oihw, bias, relu):
        w = jnp.transpose(w_oihw, (2, 3, 1, 0)).astype(jnp.bfloat16)   # HWIO
        y = jax.lax.conv_general_dilated(
            x.astype(jnp.bfloat16), w, (1, 1), "SAME",
            dimension_numbers=("NHWC", "HWIO", "NHWC"),
            preferred_element_type=jnp.float32) + bias
        return jnp.maximum(y, 0.0) if relu else y

    x = jnp.transpose(x_nchw, (0, 2, 3, 1))          # NHWC
    h = conv(x, raw["w_stem"], raw["b_stem"], True)
    y = conv(h, raw["w1"], raw["b1"], True)
    y = conv(y, raw["w2"], raw["b2"], True)
    y = conv(y, raw["w3"], raw["b3"], False)
    s = conv(h, raw["w_skip"], raw["b_skip"], False)
    layer4 = jnp.maximum(y + s, 0.0)
    selected = jnp.transpose(layer4, (0, 3, 1, 2))   # NCHW hook output
    pooled = jnp.mean(layer4, axis=(1, 2))
    logits = jnp.dot(pooled.astype(jnp.bfloat16),
                     jnp.transpose(raw["w_fc"]).astype(jnp.bfloat16),
                     preferred_element_type=jnp.float32) + raw["b_fc"]
    return logits, selected


if __name__ == "__main__":
    key = jax.random.PRNGKey(0)
    k_param, k_x = jax.random.split(key)

    N, C, H, W = 2, 3, 16, 16
    feat_dim, n_classes = 32, 10

    raw, packed = init_params(k_param, c_in=C, feat_dim=feat_dim, n_classes=n_classes)
    x = jax.random.normal(k_x, (N, C, H, W), jnp.float32)

    fwd = jax.jit(functools.partial(grad_cam_forward, feat_dim=feat_dim,
                                    n_classes=n_classes, channels=(C, 16, 8)))
    logits, selected_out = fwd(packed, x)
    jax.block_until_ready((logits, selected_out))

    assert logits.shape == (N, n_classes)
    assert selected_out.shape == (N, feat_dim, H, W)

    # Correctness check against the pure-JAX reference (same bf16 operand
    # rounding, f32 accumulation -> only accumulation-order noise remains).
    ref_logits, ref_sel = jax.jit(reference_forward)(raw, x)
    jax.block_until_ready((ref_logits, ref_sel))
    assert jnp.allclose(logits, ref_logits, rtol=1e-2, atol=1e-2), \
        float(jnp.max(jnp.abs(logits - ref_logits)))
    assert jnp.allclose(selected_out, ref_sel, rtol=1e-2, atol=1e-2), \
        float(jnp.max(jnp.abs(selected_out - ref_sel)))

    print("KERNEL_OK")
</pallas_src>

<mosaic_0001>
module attributes {stable_mosaic.version = 11 : i64} {
  func.func @_fused_forward_kernel(%arg0: i32, %arg1: memref<1x256x128xf32, #tpu.memory_space<vmem>>, %arg2: memref<256x128xbf16, #tpu.memory_space<vmem>>, %arg3: memref<256x128xbf16, #tpu.memory_space<vmem>>, %arg4: memref<4x128x128xbf16, #tpu.memory_space<vmem>>, %arg5: memref<8x128xf32, #tpu.memory_space<vmem>>, %arg6: memref<1x32x256xf32, #tpu.memory_space<vmem>>, %arg7: memref<1x1x128xf32, #tpu.memory_space<vmem>>) attributes {dimension_semantics = [#tpu.dimension_semantics<parallel>], iteration_bounds = array<i64: 2>, scalar_prefetch = 0 : i64, scratch_operands = 0 : i64, tpu.core_type = #tpu.core_type<tc>, window_params = [{transform_indices = @transform_0, window_bounds = array<i64: 1, 256, 128>}, {pipeline_mode = #tpu.pipeline_mode<synchronous>, transform_indices = @transform_1, window_bounds = array<i64: 256, 128>}, {pipeline_mode = #tpu.pipeline_mode<synchronous>, transform_indices = @transform_2, window_bounds = array<i64: 256, 128>}, {pipeline_mode = #tpu.pipeline_mode<synchronous>, transform_indices = @transform_3, window_bounds = array<i64: 4, 128, 128>}, {pipeline_mode = #tpu.pipeline_mode<synchronous>, transform_indices = @transform_4, window_bounds = array<i64: 8, 128>}, {transform_indices = @transform_5, window_bounds = array<i64: 1, 32, 256>}, {transform_indices = @transform_6, window_bounds = array<i64: 1, 1, 128>}]} {
    %c0 = arith.constant 0 : index
    %c0_0 = arith.constant 0 : index
    %c0_1 = arith.constant 0 : index
    %0 = vector.load %arg1[%c0, %c0_0, %c0_1] : memref<1x256x128xf32, #tpu.memory_space<vmem>>, vector<1x256x128xf32>
    %1 = vector.shape_cast %0 : vector<1x256x128xf32> to vector<256x128xf32>
    %2 = tpu.iota {dimensions = array<i32: 0>} : vector<256x128xi32>
    %c255_i32 = arith.constant 255 : i32
    %3 = vector.broadcast %c255_i32 : i32 to vector<256x128xi32>
    %4 = arith.andi %2, %3 : vector<256x128xi32>
    %c15_i32 = arith.constant 15 : i32
    %5 = vector.broadcast %c15_i32 : i32 to vector<256x128xi32>
    %6 = arith.andi %4, %5 : vector<256x128xi32>
    %7 = tpu.iota {dimensions = array<i32: 1>} : vector<256x128xi32>
    %cst = arith.constant 1.000000e+00 : f32
    %8 = vector.broadcast %cst : f32 to vector<256x128xf32>
    %c16_i32 = arith.constant 16 : i32
    %9 = vector.broadcast %c16_i32 : i32 to vector<256x128xi32>
    %10 = arith.cmpi sge, %4, %9 : vector<256x128xi32>
    %c1_i32 = arith.constant 1 : i32
    %11 = vector.broadcast %c1_i32 : i32 to vector<256x128xi32>
    %12 = arith.cmpi sge, %6, %11 : vector<256x128xi32>
    %13 = arith.andi %10, %12 : vector<256x128xi1>
    %c0_i32 = arith.constant 0 : i32
    %14 = vector.broadcast %c0_i32 : i32 to vector<256x128xi32>
    %15 = arith.cmpi sge, %7, %14 : vector<256x128xi32>
    %c16_i32_2 = arith.constant 16 : i32
    %16 = vector.broadcast %c16_i32_2 : i32 to vector<256x128xi32>
    %17 = arith.cmpi slt, %7, %16 : vector<256x128xi32>
    %18 = arith.andi %15, %17 : vector<256x128xi1>
    %cst_3 = arith.constant dense<true> : vector<256x128xi1>
    %19 = arith.xori %13, %cst_3 : vector<256x128xi1>
    %20 = arith.andi %18, %19 : vector<256x128xi1>
    %cst_4 = arith.constant 0.000000e+00 : f32
    %21 = vector.broadcast %cst_4 : f32 to vector<256x128xf32>
    %22 = arith.select %20, %21, %8 : vector<256x128xi1>, vector<256x128xf32>
    %c16_i32_5 = arith.constant 16 : i32
    %23 = vector.broadcast %c16_i32_5 : i32 to vector<256x128xi32>
    %24 = arith.cmpi sge, %4, %23 : vector<256x128xi32>
    %c16_i32_6 = arith.constant 16 : i32
    %25 = vector.broadcast %c16_i32_6 : i32 to vector<256x128xi32>
    %26 = arith.cmpi sge, %7, %25 : vector<256x128xi32>
    %c32_i32 = arith.constant 32 : i32
    %27 = vector.broadcast %c32_i32 : i32 to vector<256x128xi32>
    %28 = arith.cmpi slt, %7, %27 : vector<256x128xi32>
    %29 = arith.andi %26, %28 : vector<256x128xi1>
    %cst_7 = arith.constant dense<true> : vector<256x128xi1>
    %30 = arith.xori %24, %cst_7 : vector<256x128xi1>
    %31 = arith.andi %29, %30 : vector<256x128xi1>
    %cst_8 = arith.constant 0.000000e+00 : f32
    %32 = vector.broadcast %cst_8 : f32 to vector<256x128xf32>
    %33 = arith.select %31, %32, %22 : vector<256x128xi1>, vector<256x128xf32>
    %c16_i32_9 = arith.constant 16 : i32
    %34 = vector.broadcast %c16_i32_9 : i32 to vector<256x128xi32>
    %35 = arith.cmpi sge, %4, %34 : vector<256x128xi32>
    %c15_i32_10 = arith.constant 15 : i32
    %36 = vector.broadcast %c15_i32_10 : i32 to vector<256x128xi32>
    %37 = arith.cmpi slt, %6, %36 : vector<256x128xi32>
    %38 = arith.andi %35, %37 : vector<256x128xi1>
    %c32_i32_11 = arith.constant 32 : i32
    %39 = vector.broadcast %c32_i32_11 : i32 to vector<256x128xi32>
    %40 = arith.cmpi sge, %7, %39 : vector<256x128xi32>
    %c48_i32 = arith.constant 48 : i32
    %41 = vector.broadcast %c48_i32 : i32 to vector<256x128xi32>
    %42 = arith.cmpi slt, %7, %41 : vector<256x128xi32>
    %43 = arith.andi %40, %42 : vector<256x128xi1>
    %cst_12 = arith.constant dense<true> : vector<256x128xi1>
    %44 = arith.xori %38, %cst_12 : vector<256x128xi1>
    %45 = arith.andi %43, %44 : vector<256x128xi1>
    %cst_13 = arith.constant 0.000000e+00 : f32
    %46 = vector.broadcast %cst_13 : f32 to vector<256x128xf32>
    %47 = arith.select %45, %46, %33 : vector<256x128xi1>, vector<256x128xf32>
    %c1_i32_14 = arith.constant 1 : i32
    %48 = vector.broadcast %c1_i32_14 : i32 to vector<256x128xi32>
    %49 = arith.cmpi sge, %6, %48 : vector<256x128xi32>
    %c48_i32_15 = arith.constant 48 : i32
    %50 = vector.broadcast %c48_i32_15 : i32 to vector<256x128xi32>
    %51 = arith.cmpi sge, %7, %50 : vector<256x128xi32>
    %c64_i32 = arith.constant 64 : i32
    %52 = vector.broadcast %c64_i32 : i32 to vector<256x128xi32>
    %53 = arith.cmpi slt, %7, %52 : vector<256x128xi32>
    %54 = arith.andi %51, %53 : vector<256x128xi1>
    %cst_16 = arith.constant dense<true> : vector<256x128xi1>
    %55 = arith.xori %49, %cst_16 : vector<256x128xi1>
    %56 = arith.andi %54, %55 : vector<256x128xi1>
    %cst_17 = arith.constant 0.000000e+00 : f32
    %57 = vector.broadcast %cst_17 : f32 to vector<256x128xf32>
    %58 = arith.select %56, %57, %47 : vector<256x128xi1>, vector<256x128xf32>
    %c15_i32_18 = arith.constant 15 : i32
    %59 = vector.broadcast %c15_i32_18 : i32 to vector<256x128xi32>
    %60 = arith.cmpi slt, %6, %59 : vector<256x128xi32>
    %c64_i32_19 = arith.constant 64 : i32
    %61 = vector.broadcast %c64_i32_19 : i32 to vector<256x128xi32>
    %62 = arith.cmpi sge, %7, %61 : vector<256x128xi32>
    %c80_i32 = arith.constant 80 : i32
    %63 = vector.broadcast %c80_i32 : i32 to vector<256x128xi32>
    %64 = arith.cmpi slt, %7, %63 : vector<256x128xi32>
    %65 = arith.andi %62, %64 : vector<256x128xi1>
    %cst_20 = arith.constant dense<true> : vector<256x128xi1>
    %66 = arith.xori %60, %cst_20 : vector<256x128xi1>
    %67 = arith.andi %65, %66 : vector<256x128xi1>
    %cst_21 = arith.constant 0.000000e+00 : f32
    %68 = vector.broadcast %cst_21 : f32 to vector<256x128xf32>
    %69 = arith.select %67, %68, %58 : vector<256x128xi1>, vector<256x128xf32>
    %c240_i32 = arith.constant 240 : i32
    %70 = vector.broadcast %c240_i32 : i32 to vector<256x128xi32>
    %71 = arith.cmpi slt, %4, %70 : vector<256x128xi32>
    %c1_i32_22 = arith.constant 1 : i32
    %72 = vector.broadcast %c1_i32_22 : i32 to vector<256x128xi32>
    %73 = arith.cmpi sge, %6, %72 : vector<256x128xi32>
    %74 = arith.andi %71, %73 : vector<256x128xi1>
    %c80_i32_23 = arith.constant 80 : i32
    %75 = vector.broadcast %c80_i32_23 : i32 to vector<256x128xi32>
    %76 = arith.cmpi sge, %7, %75 : vector<256x128xi32>
    %c96_i32 = arith.constant 96 : i32
    %77 = vector.broadcast %c96_i32 : i32 to vector<256x128xi32>
    %78 = arith.cmpi slt, %7, %77 : vector<256x128xi32>
    %79 = arith.andi %76, %78 : vector<256x128xi1>
    %cst_24 = arith.constant dense<true> : vector<256x128xi1>
    %80 = arith.xori %74, %cst_24 : vector<256x128xi1>
    %81 = arith.andi %79, %80 : vector<256x128xi1>
    %cst_25 = arith.constant 0.000000e+00 : f32
    %82 = vector.broadcast %cst_25 : f32 to vector<256x128xf32>
    %83 = arith.select %81, %82, %69 : vector<256x128xi1>, vector<256x128xf32>
    %c240_i32_26 = arith.constant 240 : i32
    %84 = vector.broadcast %c240_i32_26 : i32 to vector<256x128xi32>
    %85 = arith.cmpi slt, %4, %84 : vector<256x128xi32>
    %c96_i32_27 = arith.constant 96 : i32
    %86 = vector.broadcast %c96_i32_27 : i32 to vector<256x128xi32>
    %87 = arith.cmpi sge, %7, %86 : vector<256x128xi32>
    %c112_i32 = arith.constant 112 : i32
    %88 = vector.broadcast %c112_i32 : i32 to vector<256x128xi32>
    %89 = arith.cmpi slt, %7, %88 : vector<256x128xi32>
    %90 = arith.andi %87, %89 : vector<256x128xi1>
    %cst_28 = arith.constant dense<true> : vector<256x128xi1>
    %91 = arith.xori %85, %cst_28 : vector<256x128xi1>
    %92 = arith.andi %90, %91 : vector<256x128xi1>
    %cst_29 = arith.constant 0.000000e+00 : f32
    %93 = vector.broadcast %cst_29 : f32 to vector<256x128xf32>
    %94 = arith.select %92, %93, %83 : vector<256x128xi1>, vector<256x128xf32>
    %c240_i32_30 = arith.constant 240 : i32
    %95 = vector.broadcast %c240_i32_30 : i32 to vector<256x128xi32>
    %96 = arith.cmpi slt, %4, %95 : vector<256x128xi32>
    %c15_i32_31 = arith.constant 15 : i32
    %97 = vector.broadcast %c15_i32_31 : i32 to vector<256x128xi32>
    %98 = arith.cmpi slt, %6, %97 : vector<256x128xi32>
    %99 = arith.andi %96, %98 : vector<256x128xi1>
    %c112_i32_32 = arith.constant 112 : i32
    %100 = vector.broadcast %c112_i32_32 : i32 to vector<256x128xi32>
    %101 = arith.cmpi sge, %7, %100 : vector<256x128xi32>
    %c128_i32 = arith.constant 128 : i32
    %102 = vector.broadcast %c128_i32 : i32 to vector<256x128xi32>
    %103 = arith.cmpi slt, %7, %102 : vector<256x128xi32>
    %104 = arith.andi %101, %103 : vector<256x128xi1>
    %cst_33 = arith.constant dense<true> : vector<256x128xi1>
    %105 = arith.xori %99, %cst_33 : vector<256x128xi1>
    %106 = arith.andi %104, %105 : vector<256x128xi1>
    %cst_34 = arith.constant 0.000000e+00 : f32
    %107 = vector.broadcast %cst_34 : f32 to vector<256x128xf32>
    %108 = arith.select %106, %107, %94 : vector<256x128xi1>, vector<256x128xf32>
    %c0_35 = arith.constant 0 : index
    %c0_36 = arith.constant 0 : index
    %109 = vector.load %arg5[%c0_35, %c0_36] : memref<8x128xf32, #tpu.memory_space<vmem>>, vector<1x128xf32>
    %c17_i32 = arith.constant 17 : i32
    %110 = tpu.dynamic_rotate %1 by %c17_i32 dim 0 : vector<256x128xf32>, i32 -> vector<256x128xf32>
    %c16_i32_37 = arith.constant 16 : i32
    %111 = tpu.dynamic_rotate %1 by %c16_i32_37 dim 0 : vector<256x128xf32>, i32 -> vector<256x128xf32>
    %c16_i32_38 = arith.constant 16 : i32
    %112 = tpu.dynamic_rotate %111 by %c16_i32_38 dim 1 : vector<256x128xf32>, i32 -> vector<256x128xf32>
    %113 = arith.addf %110, %112 : vector<256x128xf32>
    %c15_i32_39 = arith.constant 15 : i32
    %114 = tpu.dynamic_rotate %1 by %c15_i32_39 dim 0 : vector<256x128xf32>, i32 -> vector<256x128xf32>
    %c32_i32_40 = arith.constant 32 : i32
    %115 = tpu.dynamic_rotate %114 by %c32_i32_40 dim 1 : vector<256x128xf32>, i32 -> vector<256x128xf32>
    %116 = arith.addf %113, %115 : vector<256x128xf32>
    %c1_i32_41 = arith.constant 1 : i32
    %117 = tpu.dynamic_rotate %1 by %c1_i32_41 dim 0 : vector<256x128xf32>, i32 -> vector<256x128xf32>
    %c48_i32_42 = arith.constant 48 : i32
    %118 = tpu.dynamic_rotate %117 by %c48_i32_42 dim 1 : vector<256x128xf32>, i32 -> vector<256x128xf32>
    %119 = arith.addf %116, %118 : vector<256x128xf32>
    %c255_i32_43 = arith.constant 255 : i32
    %120 = tpu.dynamic_rotate %1 by %c255_i32_43 dim 0 : vector<256x128xf32>, i32 -> vector<256x128xf32>
    %c64_i32_44 = arith.constant 64 : i32
    %121 = tpu.dynamic_rotate %120 by %c64_i32_44 dim 1 : vector<256x128xf32>, i32 -> vector<256x128xf32>
    %122 = arith.addf %119, %121 : vector<256x128xf32>
    %c241_i32 = arith.constant 241 : i32
    %123 = tpu.dynamic_rotate %1 by %c241_i32 dim 0 : vector<256x128xf32>, i32 -> vector<256x128xf32>
    %c80_i32_45 = arith.constant 80 : i32
    %124 = tpu.dynamic_rotate %123 by %c80_i32_45 dim 1 : vector<256x128xf32>, i32 -> vector<256x128xf32>
    %125 = arith.addf %122, %124 : vector<256x128xf32>
    %c240_i32_46 = arith.constant 240 : i32
    %126 = tpu.dynamic_rotate %1 by %c240_i32_46 dim 0 : vector<256x128xf32>, i32 -> vector<256x128xf32>
    %c96_i32_47 = arith.constant 96 : i32
    %127 = tpu.dynamic_rotate %126 by %c96_i32_47 dim 1 : vector<256x128xf32>, i32 -> vector<256x128xf32>
    %128 = arith.addf %125, %127 : vector<256x128xf32>
    %c239_i32 = arith.constant 239 : i32
    %129 = tpu.dynamic_rotate %1 by %c239_i32 dim 0 : vector<256x128xf32>, i32 -> vector<256x128xf32>
    %c112_i32_48 = arith.constant 112 : i32
    %130 = tpu.dynamic_rotate %129 by %c112_i32_48 dim 1 : vector<256x128xf32>, i32 -> vector<256x128xf32>
    %131 = arith.addf %128, %130 : vector<256x128xf32>
    %132 = arith.mulf %131, %108 : vector<256x128xf32>
    %133 = arith.truncf %132 : vector<256x128xf32> to vector<256x128xbf16>
    %134 = arith.truncf %1 : vector<256x128xf32> to vector<256x128xbf16>
    %135 = tpu.concatenate %133, %134 in 1 : vector<256x128xbf16>, vector<256x128xbf16> -> vector<256x256xbf16>
    %c0_49 = arith.constant 0 : index
    %c0_50 = arith.constant 0 : index
    %136 = vector.load %arg2[%c0_49, %c0_50] : memref<256x128xbf16, #tpu.memory_space<vmem>>, vector<256x128xbf16>
    %cst_51 = arith.constant dense<0.000000e+00> : vector<256x128xf32>
    %137 = tpu.matmul %135, %136, %cst_51 {dimension_numbers = #tpu.dot_dimension_numbers<[1], [0], [0], [1], [0, 0, 1, 1], [], []>} : vector<256x256xbf16>, vector<256x128xbf16>, vector<256x128xf32> -> vector<256x128xf32>
    %138 = vector.broadcast %109 : vector<1x128xf32> to vector<256x128xf32>
    %139 = arith.addf %137, %138 : vector<256x128xf32>
    %cst_52 = arith.constant 0.000000e+00 : f32
    %140 = vector.broadcast %cst_52 : f32 to vector<256x128xf32>
    %141 = arith.maximumf %139, %140 : vector<256x128xf32>
    %142 = arith.truncf %141 : vector<256x128xf32> to vector<256x128xbf16>
    %c0_53 = arith.constant 0 : index
    %c0_54 = arith.constant 0 : index
    %c0_55 = arith.constant 0 : index
    %143 = vector.load %arg4[%c0_53, %c0_54, %c0_55] : memref<4x128x128xbf16, #tpu.memory_space<vmem>>, vector<1x128x128xbf16>
    %144 = vector.shape_cast %143 : vector<1x128x128xbf16> to vector<128x128xbf16>
    %c1 = arith.constant 1 : index
    %c0_56 = arith.constant 0 : index
    %145 = vector.load %arg5[%c1, %c0_56] : memref<8x128xf32, #tpu.memory_space<vmem>>, vector<1x128xf32>
    %cst_57 = arith.constant dense<0.000000e+00> : vector<256x128xf32>
    %146 = tpu.matmul %142, %144, %cst_57 {dimension_numbers = #tpu.dot_dimension_numbers<[1], [0], [0], [1], [0, 0, 1, 1], [], []>} : vector<256x128xbf16>, vector<128x128xbf16>, vector<256x128xf32> -> vector<256x128xf32>
    %147 = vector.broadcast %145 : vector<1x128xf32> to vector<256x128xf32>
    %148 = arith.addf %146, %147 : vector<256x128xf32>
    %cst_58 = arith.constant 0.000000e+00 : f32
    %149 = vector.broadcast %cst_58 : f32 to vector<256x128xf32>
    %150 = arith.maximumf %148, %149 : vector<256x128xf32>
    %c2 = arith.constant 2 : index
    %c0_59 = arith.constant 0 : index
    %151 = vector.load %arg5[%c2, %c0_59] : memref<8x128xf32, #tpu.memory_space<vmem>>, vector<1x128xf32>
    %c17_i32_60 = arith.constant 17 : i32
    %152 = tpu.dynamic_rotate %150 by %c17_i32_60 dim 0 : vector<256x128xf32>, i32 -> vector<256x128xf32>
    %c16_i32_61 = arith.constant 16 : i32
    %153 = tpu.dynamic_rotate %150 by %c16_i32_61 dim 0 : vector<256x128xf32>, i32 -> vector<256x128xf32>
    %c16_i32_62 = arith.constant 16 : i32
    %154 = tpu.dynamic_rotate %153 by %c16_i32_62 dim 1 : vector<256x128xf32>, i32 -> vector<256x128xf32>
    %155 = arith.addf %152, %154 : vector<256x128xf32>
    %c15_i32_63 = arith.constant 15 : i32
    %156 = tpu.dynamic_rotate %150 by %c15_i32_63 dim 0 : vector<256x128xf32>, i32 -> vector<256x128xf32>
    %c32_i32_64 = arith.constant 32 : i32
    %157 = tpu.dynamic_rotate %156 by %c32_i32_64 dim 1 : vector<256x128xf32>, i32 -> vector<256x128xf32>
    %158 = arith.addf %155, %157 : vector<256x128xf32>
    %c1_i32_65 = arith.constant 1 : i32
    %159 = tpu.dynamic_rotate %150 by %c1_i32_65 dim 0 : vector<256x128xf32>, i32 -> vector<256x128xf32>
    %c48_i32_66 = arith.constant 48 : i32
    %160 = tpu.dynamic_rotate %159 by %c48_i32_66 dim 1 : vector<256x128xf32>, i32 -> vector<256x128xf32>
    %161 = arith.addf %158, %160 : vector<256x128xf32>
    %c255_i32_67 = arith.constant 255 : i32
    %162 = tpu.dynamic_rotate %150 by %c255_i32_67 dim 0 : vector<256x128xf32>, i32 -> vector<256x128xf32>
    %c64_i32_68 = arith.constant 64 : i32
    %163 = tpu.dynamic_rotate %162 by %c64_i32_68 dim 1 : vector<256x128xf32>, i32 -> vector<256x128xf32>
    %164 = arith.addf %161, %163 : vector<256x128xf32>
    %c241_i32_69 = arith.constant 241 : i32
    %165 = tpu.dynamic_rotate %150 by %c241_i32_69 dim 0 : vector<256x128xf32>, i32 -> vector<256x128xf32>
    %c80_i32_70 = arith.constant 80 : i32
    %166 = tpu.dynamic_rotate %165 by %c80_i32_70 dim 1 : vector<256x128xf32>, i32 -> vector<256x128xf32>
    %167 = arith.addf %164, %166 : vector<256x128xf32>
    %c240_i32_71 = arith.constant 240 : i32
    %168 = tpu.dynamic_rotate %150 by %c240_i32_71 dim 0 : vector<256x128xf32>, i32 -> vector<256x128xf32>
    %c96_i32_72 = arith.constant 96 : i32
    %169 = tpu.dynamic_rotate %168 by %c96_i32_72 dim 1 : vector<256x128xf32>, i32 -> vector<256x128xf32>
    %170 = arith.addf %167, %169 : vector<256x128xf32>
    %c239_i32_73 = arith.constant 239 : i32
    %171 = tpu.dynamic_rotate %150 by %c239_i32_73 dim 0 : vector<256x128xf32>, i32 -> vector<256x128xf32>
    %c112_i32_74 = arith.constant 112 : i32
    %172 = tpu.dynamic_rotate %171 by %c112_i32_74 dim 1 : vector<256x128xf32>, i32 -> vector<256x128xf32>
    %173 = arith.addf %170, %172 : vector<256x128xf32>
    %174 = arith.mulf %173, %108 : vector<256x128xf32>
    %175 = arith.truncf %174 : vector<256x128xf32> to vector<256x128xbf16>
    %176 = arith.truncf %150 : vector<256x128xf32> to vector<256x128xbf16>
    %177 = tpu.concatenate %175, %176 in 1 : vector<256x128xbf16>, vector<256x128xbf16> -> vector<256x256xbf16>
    %c0_75 = arith.constant 0 : index
    %c0_76 = arith.constant 0 : index
    %178 = vector.load %arg3[%c0_75, %c0_76] : memref<256x128xbf16, #tpu.memory_space<vmem>>, vector<256x128xbf16>
    %cst_77 = arith.constant dense<0.000000e+00> : vector<256x128xf32>
    %179 = tpu.matmul %177, %178, %cst_77 {dimension_numbers = #tpu.dot_dimension_numbers<[1], [0], [0], [1], [0, 0, 1, 1], [], []>} : vector<256x256xbf16>, vector<256x128xbf16>, vector<256x128xf32> -> vector<256x128xf32>
    %180 = vector.broadcast %151 : vector<1x128xf32> to vector<256x128xf32>
    %181 = arith.addf %179, %180 : vector<256x128xf32>
    %cst_78 = arith.constant 0.000000e+00 : f32
    %182 = vector.broadcast %cst_78 : f32 to vector<256x128xf32>
    %183 = arith.maximumf %181, %182 : vector<256x128xf32>
    %184 = arith.truncf %183 : vector<256x128xf32> to vector<256x128xbf16>
    %c1_79 = arith.constant 1 : index
    %c0_80 = arith.constant 0 : index
    %c0_81 = arith.constant 0 : index
    %185 = vector.load %arg4[%c1_79, %c0_80, %c0_81] : memref<4x128x128xbf16, #tpu.memory_space<vmem>>, vector<1x128x128xbf16>
    %186 = vector.shape_cast %185 : vector<1x128x128xbf16> to vector<128x128xbf16>
    %c3 = arith.constant 3 : index
    %c0_82 = arith.constant 0 : index
    %187 = vector.load %arg5[%c3, %c0_82] : memref<8x128xf32, #tpu.memory_space<vmem>>, vector<1x128xf32>
    %cst_83 = arith.constant dense<0.000000e+00> : vector<256x128xf32>
    %188 = tpu.matmul %184, %186, %cst_83 {dimension_numbers = #tpu.dot_dimension_numbers<[1], [0], [0], [1], [0, 0, 1, 1], [], []>} : vector<256x128xbf16>, vector<128x128xbf16>, vector<256x128xf32> -> vector<256x128xf32>
    %189 = vector.broadcast %187 : vector<1x128xf32> to vector<256x128xf32>
    %190 = arith.addf %188, %189 : vector<256x128xf32>
    %c2_84 = arith.constant 2 : index
    %c0_85 = arith.constant 0 : index
    %c0_86 = arith.constant 0 : index
    %191 = vector.load %arg4[%c2_84, %c0_85, %c0_86] : memref<4x128x128xbf16, #tpu.memory_space<vmem>>, vector<1x128x128xbf16>
    %192 = vector.shape_cast %191 : vector<1x128x128xbf16> to vector<128x128xbf16>
    %c4 = arith.constant 4 : index
    %c0_87 = arith.constant 0 : index
    %193 = vector.load %arg5[%c4, %c0_87] : memref<8x128xf32, #tpu.memory_space<vmem>>, vector<1x128xf32>
    %cst_88 = arith.constant dense<0.000000e+00> : vector<256x128xf32>
    %194 = tpu.matmul %142, %192, %cst_88 {dimension_numbers = #tpu.dot_dimension_numbers<[1], [0], [0], [1], [0, 0, 1, 1], [], []>} : vector<256x128xbf16>, vector<128x128xbf16>, vector<256x128xf32> -> vector<256x128xf32>
    %195 = vector.broadcast %193 : vector<1x128xf32> to vector<256x128xf32>
    %196 = arith.addf %194, %195 : vector<256x128xf32>
    %197 = arith.addf %190, %196 : vector<256x128xf32>
    %cst_89 = arith.constant 0.000000e+00 : f32
    %198 = vector.broadcast %cst_89 : f32 to vector<256x128xf32>
    %199 = arith.maximumf %197, %198 : vector<256x128xf32>
    %200 = tpu.transpose %199, [1, 0] : vector<256x128xf32> -> vector<128x256xf32>
    %201 = vector.extract_strided_slice %200 {offsets = [0, 0], sizes = [32, 256], strides = [1, 1]} : vector<128x256xf32> to vector<32x256xf32>
    %c0_90 = arith.constant 0 : index
    %c0_91 = arith.constant 0 : index
    %c0_92 = arith.constant 0 : index
    %202 = vector.load %arg6[%c0_90, %c0_91, %c0_92] : memref<1x32x256xf32, #tpu.memory_space<vmem>>, vector<1x32x256xf32>
    %203 = vector.shape_cast %202 : vector<1x32x256xf32> to vector<32x256xf32>
    %204 = vector.shape_cast %201 : vector<32x256xf32> to vector<1x32x256xf32>
    tpu.vector_store %arg6[%c0_90, %c0_91, %c0_92], %204 {strides = array<i32>} : memref<1x32x256xf32, #tpu.memory_space<vmem>>, vector<1x32x256xf32>,
    %cst_93 = arith.constant dense<0.000000e+00> : vector<128xf32>
    %205 = vector.multi_reduction <add>, %199, %cst_93 [0] : vector<256x128xf32> to vector<128xf32>
    %206 = vector.shape_cast %205 : vector<128xf32> to vector<1x128xf32>
    %cst_94 = arith.constant 2.560000e+02 : f32
    %207 = vector.broadcast %cst_94 : f32 to vector<1x128xf32>
    %208 = arith.divf %206, %207 : vector<1x128xf32>
    %209 = arith.truncf %208 : vector<1x128xf32> to vector<1x128xbf16>
    %c3_95 = arith.constant 3 : index
    %c0_96 = arith.constant 0 : index
    %c0_97 = arith.constant 0 : index
    %210 = vector.load %arg4[%c3_95, %c0_96, %c0_97] : memref<4x128x128xbf16, #tpu.memory_space<vmem>>, vector<1x128x128xbf16>
    %211 = vector.shape_cast %210 : vector<1x128x128xbf16> to vector<128x128xbf16>
    %cst_98 = arith.constant dense<0.000000e+00> : vector<1x128xf32>
    %212 = tpu.matmul %209, %211, %cst_98 {dimension_numbers = #tpu.dot_dimension_numbers<[1], [0], [0], [1], [0, 0, 1, 1], [], []>} : vector<1x128xbf16>, vector<128x128xbf16>, vector<1x128xf32> -> vector<1x128xf32>
    %c5 = arith.constant 5 : index
    %c0_99 = arith.constant 0 : index
    %213 = vector.load %arg5[%c5, %c0_99] : memref<8x128xf32, #tpu.memory_space<vmem>>, vector<1x128xf32>
    %214 = arith.addf %212, %213 : vector<1x128xf32>
    %c0_100 = arith.constant 0 : index
    %c0_101 = arith.constant 0 : index
    %c0_102 = arith.constant 0 : index
    %215 = vector.load %arg7[%c0_100, %c0_101, %c0_102] : memref<1x1x128xf32, #tpu.memory_space<vmem>>, vector<1x1x128xf32>
    %216 = vector.shape_cast %215 : vector<1x1x128xf32> to vector<1x128xf32>
    %217 = vector.shape_cast %214 : vector<1x128xf32> to vector<1x1x128xf32>
    tpu.vector_store %arg7[%c0_100, %c0_101, %c0_102], %217 {strides = array<i32>} : memref<1x1x128xf32, #tpu.memory_space<vmem>>, vector<1x1x128xf32>,
    return
  }
  func.func @transform_0(%arg0: i32) -> (i32, i32, i32) {
    %c0_i32 = arith.constant 0 : i32
    %c0_i32_0 = arith.constant 0 : i32
    %c0_i32_1 = arith.constant 0 : i32
    return %arg0, %c0_i32, %c0_i32_0 : i32, i32, i32
  }
  func.func @transform_1(%arg0: i32) -> (i32, i32) {
    %c0_i32 = arith.constant 0 : i32
    %c0_i32_0 = arith.constant 0 : i32
    %c0_i32_1 = arith.constant 0 : i32
    return %c0_i32, %c0_i32_0 : i32, i32
  }
  func.func @transform_2(%arg0: i32) -> (i32, i32) {
    %c0_i32 = arith.constant 0 : i32
    %c0_i32_0 = arith.constant 0 : i32
    %c0_i32_1 = arith.constant 0 : i32
    return %c0_i32, %c0_i32_0 : i32, i32
  }
  func.func @transform_3(%arg0: i32) -> (i32, i32, i32) {
    %c0_i32 = arith.constant 0 : i32
    %c0_i32_0 = arith.constant 0 : i32
    %c0_i32_1 = arith.constant 0 : i32
    %c0_i32_2 = arith.constant 0 : i32
    return %c0_i32, %c0_i32_0, %c0_i32_1 : i32, i32, i32
  }
  func.func @transform_4(%arg0: i32) -> (i32, i32) {
    %c0_i32 = arith.constant 0 : i32
    %c0_i32_0 = arith.constant 0 : i32
    %c0_i32_1 = arith.constant 0 : i32
    return %c0_i32, %c0_i32_0 : i32, i32
  }
  func.func @transform_5(%arg0: i32) -> (i32, i32, i32) {
    %c0_i32 = arith.constant 0 : i32
    %c0_i32_0 = arith.constant 0 : i32
    %c0_i32_1 = arith.constant 0 : i32
    return %arg0, %c0_i32, %c0_i32_0 : i32, i32, i32
  }
  func.func @transform_6(%arg0: i32) -> (i32, i32, i32) {
    %c0_i32 = arith.constant 0 : i32
    %c0_i32_0 = arith.constant 0 : i32
    %c0_i32_1 = arith.constant 0 : i32
    return %arg0, %c0_i32, %c0_i32_0 : i32, i32, i32
  }
}

</mosaic_0001>

<bundles_post_ra>
// kernel: grad_cam_forward.1
= control target key start
LH: loop header
LB: loop body
LE: loop exit
PB: predicated region body
PF: predicated region fallthrough
CT: control target
= control target key end

     0   :  { %12 = vsyncpa [#allocation3], 0  ;;  %s9916_s0 = inlined_call_operand.vmem [shape: f32[2,256,128], index: 0, kind: input, shape index: {}]   ;;  %s9917_s1 = inlined_call_operand.vmem [shape: bf16[256,128], index: 1, kind: input, shape index: {}]   ;;  %s9918_s2 = inlined_call_operand.vmem [shape: bf16[256,128], index: 2, kind: input, shape index: {}]   ;;  %s9919_s3 = inlined_call_operand.vmem [shape: bf16[4,128,128], index: 3, kind: input, shape index: {}]   ;;  %s9920_s4 = inlined_call_operand.vmem [shape: f32[8,128], index: 4, kind: input, shape index: {}]   ;;  %s9921_s5 = inlined_call_operand.vmem [shape: f32[2,32,256], index: 5, kind: output, shape index: {0}]   ;;  %s9922_s6 = inlined_call_operand.hbm [shape: f32[2,1,128], index: 6, kind: output, shape index: {1}]  }
   0x1   :  { %14 = vsyncpa [#allocation3 + $0x1], 0  ;;  %s5907_s21 = smov 0   ;;  %s5909_s22 = smov 0  }
   0x2   :  { %s5911_s23 = smov 0   ;;  %s5913_s24 = smov 0  }
   0x3 LB: > { %s5928_s25 = sadd.s32 4294967295, %s5858_s24   ;;  %s4964_s26 = sadd.s32 4294967294, %s5858_s24   ;;  %s5858_s24 = sphi %s5913_s24, %s10636_s24   ;;  %s5854_s23 = sphi %s5911_s23, %s10635_s23   ;;  %s5850_s22 = sphi %s5909_s22, %s10634_s22   ;;  %s5846_s21 = sphi %s5907_s21, %s10633_s21  }
   0x4   : > { %s5932_s27 = sadd.s32 1, %s5858_s24   ;;  %s163_s28 = sadd.s32 1, %s5854_s23 }
   0x5   : > { %s160_s29 = ssub.s32 %s5858_s24, %s5932_s27  ;;  %p173_p0 = scmp.ne.s32.totalorder %s5854_s23, %s5850_s22 }
   0x6   : > { %p161_p1 = scmp.eq.s32.totalorder %s160_s29, 0  ;;  %p174_p2 = scmp.eq.s32.totalorder %s5928_s25, 1 }
   0x7   : > { %p179_p3 = scmp.ne.s32.totalorder %s5850_s22, %s5846_s21  ;;  %p180_p4 = scmp.eq.s32.totalorder %s4964_s26, 1 }
   0x8   : > { %s5943_s30 = scalar_select %p161_p1, %s5854_s23, %s163_s28  }
   0x9   : > { %p5945_p5 = por %p174_p2, %p173_p0  ;;  %p5949_p6 = por %p180_p4, %p179_p3 }
   0xa   : > { %p4967_p7 = scmp.ge.s32.totalorder %s5858_s24, 1  ;;  %p218_p8 = scmp.lt.s32.totalorder %s5858_s24, 3 }
   0xc   : > { %p219_p9 = pnand %p4967_p7, %p218_p8 }
   0xe   : > { %222 = sbr.rel (%p219_p9) target bundleno = 2049 (0x801), region = 40 }
  0x15   : > { %p252_p10 = scmp.lt.s32.totalorder %s5928_s25, 1  ;;  %v295_v0 = vlaneseq  ;;  %v5725_v2 = vld [vmem:[%s9917_s1 + $0x40] sm:$0xff]   ;;  %s5860_s16 = smov 16   ;;  %v5727_v16 = vld [vmem:[%s9917_s1 + $0x48] sm:$0xff]   ;;  %v5729_v23 = vld [vmem:[%s9917_s1 + $0x50] sm:$0xff]  }
  0x16   : > { %5094 = vmatprep.subr.bf16.mxu0 %v5725_v2  ;;  %s5861_s17 = smov 32   ;;  %v5726_v15 = vld [vmem:[%s9917_s1] sm:$0xff]   ;;  %v5728_v20 = vld [vmem:[%s9917_s1 + $0x8] sm:$0xff]   ;;  %v5730_v25 = vld [vmem:[%s9917_s1 + $0x10] sm:$0xff]   ;;  %s5863_s20 = smov 64  }
  0x17   : > { %s5957_s9 = scalar_select %p252_p10, %s5928_s25, 1  ;;  %v5960_v1 = vshrl.u32 %v295_v0, 7  ;;  %5095 = vmatpush3.bf16.msra.mxu0 %v5726_v15  ;;  %v5731_v26 = vld [vmem:[%s9917_s1 + $0x58] sm:$0xff]   ;;  %v5733_v31 = vld [vmem:[%s9917_s1 + $0x60] sm:$0xff]   ;;  %v5735_v35 = vld [vmem:[%s9917_s1 + $0x68] sm:$0xff]  }
  0x18   : > { %5096 = vmatprep.subr.bf16.mxu0 %v5727_v16  ;;  %v5732_v30 = vld [vmem:[%s9917_s1 + $0x18] sm:$0xff]   ;;  %v5734_v34 = vld [vmem:[%s9917_s1 + $0x20] sm:$0xff]   ;;  %s5864_s19 = smov 80   ;;  %v5736_v37 = vld [vmem:[%s9917_s1 + $0x28] sm:$0xff]   ;;  %s10033_s26 = smov 96  }
  0x19   : > { %s5092_s10 = sshll.u32 %s5957_s9, 8  ;;  %vm9964_vm0 = vcmp.lt.s32.totalorder %v5960_v1, 7  ;;  %vm9963_vm1 = vcmp.lt.s32.totalorder %v5960_v1, 1  ;;  %v5737_v38 = vld [vmem:[%s9917_s1 + $0x70] sm:$0xff]   ;;  %v5739_v40 = vld [vmem:[%s9917_s1 + $0x78] sm:$0xff]   ;;  %s5866_s11 = smov 112  }
  0x1a   : > { %s5966_s13 = scalar_lea.vmem %s9916_s0, %s5092_s10  ;;  %s5862_s10 = smov 48   ;;  %v5738_v39 = vld [vmem:[%s9917_s1 + $0x30] sm:$0xff]   ;;  %v5740_v44 = vld [vmem:[%s9917_s1 + $0x38] sm:$0xff]  }
  0x1b   : > { %v5972_v3 = vld [vmem:[%s5966_s13 + $0xf0] sm:$0xff]  ;;  %v5975_v4 = vld [vmem:[%s5966_s13 + $0xf8] sm:$0xff]  ;;  %v5979_v5 = vld [vmem:[%s5966_s13] sm:$0xff]  ;;  %5097 = vmatpush3.bf16.msra.mxu0 %v5728_v20  ;;  %s10390_s29 = smov 96   ;;  %s5093_s28 = sshll.u32 %s5957_s9, 6 }
  0x1c   : > { %1508 = vrot.lane.b32.xlu0 %v5972_v3, %s5860_s16  ;;  %v9923_v6 = vrot.slane %v5972_v3, 1  ;;  %v1635_v7 = vrot.slane %v5975_v4, 1  ;;  %v1604_v8 = vrot.slane %v5979_v5, 1  ;;  %v1443_v9 = vrot.slane %v5979_v5, 7  ;;  %v5989_v11 = vld [vmem:[%s5966_s13 + $0x8] sm:$0xff]  ;;  %v6021_v19 = vld [vmem:[%s5966_s13 + $0x10] sm:$0xff]  ;;  %5098 = vmatprep.subr.bf16.mxu0 %v5729_v23 }
  0x1d   : > { %v1474_v10 = vrot.slane %v5975_v4, 7  ;;  %v1444_v14 = vrot.slane %v5989_v11, 7  ;;  %v1605_v18 = vrot.slane %v5989_v11, 1  ;;  %v1606_v22 = vrot.slane %v6021_v19, 1  ;;  %v6058_v29 = vld [vmem:[%s5966_s13 + $0x18] sm:$0xff]  ;;  %v6111_v42 = vld [vmem:[%s5966_s13 + $0x20] sm:$0xff] }
  0x1e   : > { %v5995_v12 = vsel %vm9964_vm0, %v9923_v6, %v1635_v7  ;;  %v6004_v13 = vsel %vm9964_vm0, %v1635_v7, %v1604_v8  ;;  %v1445_v28 = vrot.slane %v6021_v19, 7  ;;  %v1446_v32 = vrot.slane %v6058_v29, 7  ;;  %v6134_v49 = vld [vmem:[%s5966_s13 + $0x28] sm:$0xff]  ;;  %v6160_v54 = vld [vmem:[%s5966_s13 + $0x30] sm:$0xff]  ;;  %v6180_v60 = vld [vmem:[%s5966_s13 + $0x38] sm:$0xff]  ;;  %s250_s9 = sand.u32 1, %s5850_s22  }
  0x1f   : > { %1669 = vrot.lane.b32.xlu1 %v5995_v12, %s5861_s17  ;;  %v6017_v17 = vsel %vm9963_vm1, %v1474_v10, %v1443_v9  ;;  %v6032_v21 = vsel %vm9963_vm1, %v1443_v9, %v1444_v14  ;;  %v6040_v24 = vsel %vm9964_vm0, %v1604_v8, %v1605_v18  ;;  %v6054_v27 = vsel %vm9964_vm0, %v1605_v18, %v1606_v22  ;;  %s4869_s15 = scalar_lea.sflag [#allocation3], %s250_s9  ;;  %s5871_s18 = smov [#allocation2]  }
  0x20   : > { %1510 = vrot.lane.b32.xlu0 %v5975_v4, %s5860_s16  ;;  %10063 = vst [vmem:[#allocation5_spill] sm:$0xff] %v6040_v24  ;;  %10064 = vst [vmem:[#allocation6_spill] sm:$0xff] %v6054_v27  ;;  %5099 = vmatpush3.bf16.msra.mxu0 %v5730_v25  ;;  %v6073_v33 = vsel %vm9963_vm1, %v1444_v14, %v1445_v28  ;;  %v6087_v36 = vsel %vm9963_vm1, %v1445_v28, %v1446_v32  ;;  %v1607_v41 = vrot.slane %v6058_v29, 1  ;;  %v6224_v14 = vld [vmem:[%s5966_s13 + $0x48] sm:$0xff] }
  0x21   : > { %5100 = vmatprep.subr.bf16.mxu0 %v5731_v26  ;;  %v2293_v43 = vpack.c.bf16 %v5989_v11, %v5979_v5  ;;  %v1608_v45 = vrot.slane %v6111_v42, 1  ;;  %v1447_v48 = vrot.slane %v6111_v42, 7  ;;  %v1448_v50 = vrot.slane %v6134_v49, 7 }
  0x22   : > { %v1665_v46 = vsel %vm9964_vm0, %v1606_v22, %v1607_v41  ;;  %v1609_v53 = vrot.slane %v6134_v49, 1  ;;  %v1610_v56 = vrot.slane %v6160_v54, 1  ;;  %v1449_v59 = vrot.slane %v6160_v54, 7  ;;  %v6250_v22 = vld [vmem:[%s5966_s13 + $0x50] sm:$0xff] }
  0x23   : > { %1671 = vrot.lane.b32.xlu1 %v6004_v13, %s5861_s17  ;;  %2473 = vmatprep.mubr.bf16.mxu0 %v2293_v43  ;;  %v1664_v47 = vsel %vm9964_vm0, %v1607_v41, %v1608_v45  ;;  %v6142_v51 = vsel %vm9963_vm1, %v1446_v32, %v1447_v48  ;;  %v6150_v52 = vsel %vm9963_vm1, %v1447_v48, %v1448_v50  ;;  %v1450_v61 = vrot.slane %v6180_v60, 7 }
  0x24   : > { %1765 = vrot.lane.b32.xlu0 %v6017_v17, %s5862_s10  ;;  %5101 = vmatpush3.bf16.msra.mxu0 %v5732_v30  ;;  %v1663_v57 = vsel %vm9964_vm0, %v1608_v45, %v1609_v53  ;;  %v1662_v58 = vsel %vm9964_vm0, %v1609_v53, %v1610_v56  ;;  %v6188_v62 = vsel %vm9963_vm1, %v1448_v50, %v1449_v59  ;;  %v1611_v2 = vrot.slane %v6180_v60, 1 }
  0x25   : > { %5102 = vmatprep.subr.bf16.mxu0 %v5733_v31  ;;  %v6196_v63 = vsel %vm9963_vm1, %v1449_v59, %v1450_v61  ;;  %v1452_v15 = vrot.slane %v6224_v14, 7  ;;  %v1613_v20 = vrot.slane %v6224_v14, 1  ;;  %v1614_v25 = vrot.slane %v6250_v22, 1 }
  0x26   : > { %v1661_v8 = vsel %vm9964_vm0, %v1610_v56, %v1611_v2  ;;  %v297_v45 = vadd.s32 8, %v5960_v1  ;;  %v1473_v48 = vrot.slane %v5972_v3, 7  ;;  %v328_v50 = vand.u32 255, %v5960_v1 }
  0x27   : > { %1767 = vrot.lane.b32.xlu1 %v6032_v21, %s5862_s10  ;;  %v1658_v31 = vsel %vm9964_vm0, %v1613_v20, %v1614_v25  ;;  %v6312_v56 = vand.u32 127, %v295_v0  ;;  %v298_v6 = vadd.s32 16, %v5960_v1 }
  0x28   : > { %1861 = vrot.lane.b32.xlu0 %v6040_v24, %s5863_s20  ;;  %5103 = vmatpush3.bf16.msra.mxu0 %v5734_v34  ;;  %v6328_v0 = vsel %vm9963_vm1, %v1473_v48, %v1474_v10 }
  0x29   : > { %5104 = vmatprep.subr.bf16.mxu0 %v5735_v35  ;;  %vm589_vm2 = vcmp.ge.s32.totalorder %v6312_v56, 16  ;;  %vm590_vm3 = vcmp.lt.s32.totalorder %v6312_v56, 32  ;;  %vm491_vm4 = vcmp.lt.s32.totalorder %v6312_v56, 16  ;;  %vm752_vm5 = vcmp.ge.s32.totalorder %v6312_v56, 32 }
  0x2a   : > { %vm753_vm6 = vcmp.lt.s32.totalorder %v6312_v56, 48  ;;  %vm851_vm7 = vcmp.ge.s32.totalorder %v6312_v56, 48  ;;  %vm852_vm8 = vcmp.lt.s32.totalorder %v6312_v56, 64  ;;  %vm6342_vm10 = vmand %vm589_vm2, %vm590_vm3  ;;  %vm950_vm12 = vcmp.ge.s32.totalorder %v6312_v56, 64 }
  0x2b   : > { %1863 = vrot.lane.b32.xlu1 %v6054_v27, %s5863_s20  ;;  %vm6349_vm11 = vmand %vm752_vm5, %vm753_vm6  ;;  %vm951_vm13 = vcmp.lt.s32.totalorder %v6312_v56, 80  ;;  %vm5868_vm2 = vmmov 1   ;;  %vm1113_vm5 = vcmp.ge.s32.totalorder %v6312_v56, 80  ;;  %vm1114_vm6 = vcmp.lt.s32.totalorder %v6312_v56, 96 }
  0x2c   : > { %1512 = vrot.lane.b32.xlu0 %v5979_v5, %s5860_s16  ;;  %5105 = vmatpush3.bf16.msra.mxu0 %v5736_v37  ;;  %v6206_v5 = vld [vmem:[%s5966_s13 + $0x40] sm:$0xff]  ;;  %v1453_v37 = vrot.slane %v6250_v22, 7  ;;  %vm6361_vm14 = vmand %vm851_vm7, %vm852_vm8 }
  0x2d   : > { %5106 = vmatprep.subr.bf16.mxu0 %v5737_v38  ;;  %v1612_v7 = vrot.slane %v6206_v5, 1  ;;  %v6278_v38 = vld [vmem:[%s5966_s13 + $0x58] sm:$0xff]  ;;  %vm6383_vm7 = vmand %vm950_vm12, %vm951_vm13  ;;  %vm9965_vm13 = vcmp.ge.s32.totalorder %v6312_v56, 112 }
  0x2e   : > { %v1454_v41 = vrot.slane %v6278_v38, 7 }
  0x2f   : > { %1514 = vrot.lane.b32.xlu1 %v5989_v11, %s5860_s16  ;;  %v1660_v9 = vsel %vm9964_vm0, %v1611_v2, %v1612_v7  ;;  %v1451_v11 = vrot.slane %v6206_v5, 7  ;;  %v1659_v28 = vsel %vm9964_vm0, %v1612_v7, %v1613_v20  ;;  %v360_v2 = vand.u32 15, %v328_v50 }
  0x30   : > { %1957 = vrot.lane.b32.xlu0 %v6073_v33, %s5864_s19  ;;  %5107 = vmatpush3.bf16.msra.mxu0 %v5738_v39  ;;  %v6309_v53 = vsel %vm9963_vm1, %v1453_v37, %v1454_v41 }
  0x31   : > { %5108 = vmatprep.subr.bf16.mxu0 %v5739_v40  ;;  %v6232_v16 = vsel %vm9963_vm1, %v1450_v61, %v1451_v11  ;;  %v6240_v18 = vsel %vm9963_vm1, %v1451_v11, %v1452_v15  ;;  %v6284_v40 = vld [vmem:[%s5966_s13 + $0xe8] sm:$0xff]  ;;  %vm426_vm9 = vcmp.ge.s32.totalorder %v360_v2, 1 }
  0x32   : > { %vm6371_vm3 = vmxor %vm426_vm9, %vm5868_vm2 }
  0x33   : > { %1959 = vrot.lane.b32.xlu1 %v6087_v36, %s5864_s19  ;;  %vm886_vm9 = vmand %vm6361_vm14, %vm6371_vm3 }
  0x34   : > { %1673 = vrot.lane.b32.xlu0 %v6040_v24, %s5861_s17  ;;  %5109 = vmatpush3.bf16.msra.mxu0 %v5740_v44  ;;  %v6293_v44 = vsel %vm9963_vm1, %v1452_v15, %v1453_v37  ;;  %v6366_v37 = vld [vmem:[%s5966_s13 + $0x60] sm:$0xff] }
  0x37   : > { %1675 = vrot.lane.b32.xlu1 %v6054_v27, %s5861_s17 }
  0x38   : > { %2053 = vrot.lane.b32.xlu0 %v6021_v19, %s10033_s26 }
  0x3b   : > { %2055 = vrot.lane.b32.xlu1 %v6058_v29, %s10033_s26 }
  0x3c   : > { %1769 = vrot.lane.b32.xlu0 %v6073_v33, %s5862_s10 }
  0x3f   : > { %1771 = vrot.lane.b32.xlu1 %v6087_v36, %s5862_s10 }
  0x40   : > { %2149 = vrot.lane.b32.xlu0 %v1665_v46, %s5866_s11 }
  0x43   : > { %2151 = vrot.lane.b32.xlu1 %v1664_v47, %s5866_s11 }
  0x44   : > { %1865 = vrot.lane.b32.xlu0 %v1665_v46, %s5863_s20 }
  0x47   : > { %1867 = vrot.lane.b32.xlu1 %v1664_v47, %s5863_s20 }
  0x48   : > { %1516 = vrot.lane.b32.xlu0 %v6021_v19, %s5860_s16 }
  0x4b   : > { %1518 = vrot.lane.b32.xlu1 %v6058_v29, %s5860_s16 }
  0x4c   : > { %1961 = vrot.lane.b32.xlu0 %v6142_v51, %s5864_s19 }
  0x4f   : > { %1963 = vrot.lane.b32.xlu1 %v6150_v52, %s5864_s19 }
  0x50   : > { %1677 = vrot.lane.b32.xlu0 %v1665_v46, %s5861_s17 }
  0x53   : > { %1679 = vrot.lane.b32.xlu1 %v1664_v47, %s5861_s17  ;;  %v9924_v47 = vrot.slane %v6284_v40, 7 }
  0x54   : > { %2057 = vrot.lane.b32.xlu0 %v6111_v42, %s10033_s26 }
  0x55   : > { %v6320_v61 = vsel %vm9963_vm1, %v9924_v47, %v1473_v48 }
  0x57   : > { %2059 = vrot.lane.b32.xlu1 %v6134_v49, %s10033_s26 }
  0x58   : > { %1773 = vrot.lane.b32.xlu0 %v6142_v51, %s5862_s10 }
  0x5b   : > { %1775 = vrot.lane.b32.xlu1 %v6150_v52, %s5862_s10 }
  0x5c   : > { %2153 = vrot.lane.b32.xlu0 %v1663_v57, %s5866_s11 }
  0x5f   : > { %2155 = vrot.lane.b32.xlu1 %v1662_v58, %s5866_s11 }
  0x60   : > { %1869 = vrot.lane.b32.xlu0 %v1663_v57, %s5863_s20 }
  0x63   : > { %1871 = vrot.lane.b32.xlu1 %v1662_v58, %s5863_s20 }
  0x64   : > { %1520 = vrot.lane.b32.xlu0 %v6111_v42, %s5860_s16 }
  0x67   : > { %1522 = vrot.lane.b32.xlu1 %v6134_v49, %s5860_s16 }
  0x68   : > { %1965 = vrot.lane.b32.xlu0 %v6188_v62, %s5864_s19 }
  0x6b   : > { %1967 = vrot.lane.b32.xlu1 %v6196_v63, %s5864_s19 }
  0x6c   : > { %1681 = vrot.lane.b32.xlu0 %v1663_v57, %s5861_s17 }
  0x6f   : > { %1683 = vrot.lane.b32.xlu1 %v1662_v58, %s5861_s17  ;;  %v329_v58 = vand.u32 255, %v297_v45 }
  0x70   : > { %2061 = vrot.lane.b32.xlu0 %v6160_v54, %s10033_s26 }
  0x73   : > { %2063 = vrot.lane.b32.xlu1 %v6180_v60, %s10033_s26 }
  0x74   : > { %1777 = vrot.lane.b32.xlu0 %v6188_v62, %s5862_s10 }
  0x77   : > { %1779 = vrot.lane.b32.xlu1 %v6196_v63, %s5862_s10 }
  0x78   : > { %2157 = vrot.lane.b32.xlu0 %v1661_v8, %s5866_s11 }
  0x7b   : > { %2159 = vrot.lane.b32.xlu1 %v1660_v9, %s5866_s11 }
  0x7c   : > { %1873 = vrot.lane.b32.xlu0 %v1661_v8, %s5863_s20 }
  0x7f   : > { %1875 = vrot.lane.b32.xlu1 %v1660_v9, %s5863_s20 }
  0x80   : > { %1524 = vrot.lane.b32.xlu0 %v6160_v54, %s5860_s16 }
  0x83   : > { %1526 = vrot.lane.b32.xlu1 %v6180_v60, %s5860_s16 }
  0x84   : > { %1969 = vrot.lane.b32.xlu0 %v6232_v16, %s5864_s19 }
  0x87   : > { %1971 = vrot.lane.b32.xlu1 %v6240_v18, %s5864_s19 }
  0x88   : > { %1685 = vrot.lane.b32.xlu0 %v1661_v8, %s5861_s17  ;;  %v361_v8 = vand.u32 15, %v329_v58 }
  0x8a   : > { %vm689_vm15 = vcmp.lt.s32.totalorder %v361_v8, 15 }
  0x8b   : > { %1687 = vrot.lane.b32.xlu1 %v1660_v9, %s5861_s17  ;;  %vm6395_vm8 = vmxor %vm689_vm15, %vm5868_vm2 }
  0x8c   : > { %2065 = vrot.lane.b32.xlu0 %v6206_v5, %s10033_s26  ;;  %vm986_vm12 = vmand %vm6383_vm7, %vm6395_vm8 }
  0x8e   : > { %v1509_v23 = vpop.permute.xlu0 %1508 }
  0x8f   : > { %2067 = vrot.lane.b32.xlu1 %v6224_v14, %s10033_s26  ;;  %v1572_v4 = vadd.f32 %v1509_v23, %v6320_v61  ;;  %v1615_v23 = vrot.slane %v6278_v38, 1 }
  0x90   : > { %1781 = vrot.lane.b32.xlu0 %v6232_v16, %s5862_s10 }
  0x91   : > { %v6257_v26 = vpop.permute.xlu1 %1669 }
  0x92   : > { %v1511_v30 = vpop.permute.xlu0 %1510  ;;  %v1733_v45 = vadd.f32 %v6257_v26, %v1572_v4  ;;  %v9927_v4 = vrot.slane %v6366_v37, 1 }
  0x93   : > { %1783 = vrot.lane.b32.xlu1 %v6240_v18, %s5862_s10  ;;  %v1573_v11 = vadd.f32 %v1511_v30, %v6328_v0 }
  0x94   : > { %2161 = vrot.lane.b32.xlu0 %v1659_v28, %s5866_s11 }
  0x95   : > { %v6268_v32 = vpop.permute.xlu1 %1671 }
  0x96   : > { %v6270_v34 = vpop.permute.xlu0 %1765  ;;  %v1734_v58 = vadd.f32 %v6268_v32, %v1573_v11  ;;  %v1657_v32 = vsel %vm9964_vm0, %v1614_v25, %v1615_v23 }
  0x97   : > { %2163 = vrot.lane.b32.xlu1 %v1658_v31, %s5866_s11  ;;  %v1829_v2 = vadd.f32 %v6270_v34, %v1733_v45  ;;  %v1656_v45 = vsel %vm9964_vm0, %v1615_v23, %v9927_v4  ;;  %v299_v4 = vadd.s32 24, %v5960_v1 }
  0x98   : > { %1877 = vrot.lane.b32.xlu0 %v1659_v28, %s5863_s20 }
  0x99   : > { %v6274_v35 = vpop.permute.xlu1 %1767  ;;  %v331_v55 = vand.u32 255, %v299_v4 }
  0x9a   : > { %v6280_v39 = vpop.permute.xlu0 %1861  ;;  %v1830_v34 = vadd.f32 %v6274_v35, %v1734_v58 }
  0x9b   : > { %1879 = vrot.lane.b32.xlu1 %v1658_v31, %s5863_s20  ;;  %v1925_v10 = vadd.f32 %v6280_v39, %v1829_v2 }
  0x9c   : > { %1528 = vrot.lane.b32.xlu0 %v6206_v5, %s5860_s16 }
  0x9d   : > { %v6289_v43 = vpop.permute.xlu1 %1863 }
  0x9e   : > { %v6296_v46 = vpop.permute.xlu0 %1512  ;;  %v1926_v35 = vadd.f32 %v6289_v43, %v1830_v34 }
  0x9f   : > { %1530 = vrot.lane.b32.xlu1 %v6224_v14, %s5860_s16 }
  0xa0   : > { %1973 = vrot.lane.b32.xlu0 %v6293_v44, %s5864_s19 }
  0xa1   : > { %v6314_v57 = vpop.permute.xlu1 %1514 }
  0xa2   : > { %v1958_v59 = vpop.permute.xlu0 %1957 }
  0xa3   : > { %1975 = vrot.lane.b32.xlu1 %v6309_v53, %s5864_s19  ;;  %v2021_v39 = vadd.f32 %v1958_v59, %v1925_v10 }
  0xa4   : > { %1689 = vrot.lane.b32.xlu0 %v1659_v28, %s5861_s17  ;;  %v9925_v28 = vmov 1.0  }
  0xa5   : > { %v1960_v7 = vpop.permute.xlu1 %1959  ;;  %v557_v30 = vsel %vm491_vm4, 0.0, %v9925_v28 }
  0xa6   : > { %v6337_v9 = vpop.permute.xlu0 %1673  ;;  %v656_v8 = vsel %vm6342_vm10, 0.0, %v557_v30  ;;  %vm6413_vm10 = vmand %vm1113_vm5, %vm1114_vm6  ;;  %v2022_v2 = vadd.f32 %v1960_v7, %v1926_v35  ;;  %v1455_v35 = vrot.slane %v6366_v37, 7 }
  0xa7   : > { %1691 = vrot.lane.b32.xlu1 %v1658_v31, %s5861_s17  ;;  %v819_v25 = vsel %vm6349_vm11, 0.0, %v656_v8  ;;  %vm1148_vm15 = vmand %vm6413_vm10, %vm6371_vm3 }
  0xa8   : > { %2069 = vrot.lane.b32.xlu0 %v6250_v22, %s10033_s26  ;;  %v918_v43 = vsel %vm886_vm9, 0.0, %v819_v25  ;;  %v1018_v34 = vsel %vm986_vm12, 0.0, %v819_v25  ;;  %vm1379_vm5 = vmand %vm9965_vm13, %vm6395_vm8 }
  0xa9   : > { %v6355_v20 = vpop.permute.xlu1 %1675  ;;  %v6449_v7 = vsel %vm1148_vm15, 0.0, %v918_v43 }
  0xaa   : > { %v2054_v48 = vpop.permute.xlu0 %2053  ;;  %10079 = vst [vmem:[#allocation7_spill] sm:$0xff] %v6449_v7 }
  0xab   : > { %2071 = vrot.lane.b32.xlu1 %v6278_v38, %s10033_s26  ;;  %v2117_v8 = vadd.f32 %v2054_v48, %v2021_v39  ;;  %v6451_v48 = vsel %vm1379_vm5, 0.0, %v1018_v34  ;;  %v6455_v39 = vld [vmem:[%s5966_s13 + $0x68] sm:$0xff]  ;;  %v330_v34 = vand.u32 255, %v298_v6 }
  0xac   : > { %1785 = vrot.lane.b32.xlu0 %v6293_v44, %s5862_s10  ;;  %10080 = vst [vmem:[#allocation8_spill] sm:$0xff] %v6451_v48 }
  0xad   : > { %v2056_v47 = vpop.permute.xlu1 %2055  ;;  %v362_v6 = vand.u32 15, %v330_v34 }
  0xae   : > { %v6409_v11 = vpop.permute.xlu0 %1769  ;;  %v2118_v23 = vadd.f32 %v2056_v47, %v2022_v2 }
  0xaf   : > { %1787 = vrot.lane.b32.xlu1 %v6309_v53, %s5862_s10  ;;  %vm428_vm3 = vcmp.ge.s32.totalorder %v362_v6, 1 }
  0xb0   : > { %2165 = vrot.lane.b32.xlu0 %v1657_v32, %s5866_s11  ;;  %vm6499_vm8 = vmxor %vm428_vm3, %vm5868_vm2 }
  0xb1   : > { %v6432_v58 = vpop.permute.xlu1 %1771  ;;  %vm527_vm12 = vmand %vm491_vm4, %vm6499_vm8 }
  0xb2   : > { %v2150_v59 = vpop.permute.xlu0 %2149  ;;  %vm888_vm5 = vmand %vm6361_vm14, %vm6499_vm8 }
  0xb3   : > { %2167 = vrot.lane.b32.xlu1 %v1656_v45, %s5866_s11  ;;  %v2213_v10 = vadd.f32 %v2150_v59, %v2117_v8  ;;  %v9928_v8 = vrot.slane %v6455_v39, 7  ;;  %v6469_v59 = vsel %vm9963_vm1, %v1454_v41, %v1455_v35 }
  0xb4   : > { %1881 = vrot.lane.b32.xlu0 %v1657_v32, %s5863_s20 }
  0xb5   : > { %v2152_v50 = vpop.permute.xlu1 %2151  ;;  %v2245_v47 = vmul.f32 %v2213_v10, %v6449_v7  ;;  %v6481_v10 = vsel %vm9963_vm1, %v1455_v35, %v9928_v8  ;;  %v1574_v35 = vadd.f32 %v6296_v46, %v6017_v17  ;;  %v1575_v46 = vadd.f32 %v6314_v57, %v6032_v21 }
  0xb6   : > { %v2214_v25 = vadd.f32 %v2152_v50, %v2118_v23  ;;  %v1866_v28 = vpop.permute.xlu0 %1865 }
  0xb7   : > { %1883 = vrot.lane.b32.xlu1 %v1656_v45, %s5863_s20  ;;  %v1735_v34 = vadd.f32 %v6337_v9, %v1574_v35  ;;  %v10086_v35 = vrot.slane %v6366_v37, 1 }
  0xb8   : > { %v2246_v2 = vmul.f32 %v2214_v25, %v6451_v48  ;;  %1532 = vrot.lane.b32.xlu0 %v6250_v22, %s5860_s16  ;;  %v10081_v25 = vpack.c.bf16 %v6058_v29, %v6021_v19 }
  0xb9   : > { %v1868_v43 = vpop.permute.xlu1 %1867 }
  0xba   : > { %v6471_v23 = vpop.permute.xlu0 %1516  ;;  %v2277_v50 = vpack.c.bf16 %v2246_v2, %v2245_v47  ;;  %v363_v47 = vand.u32 15, %v331_v55  ;;  %v1617_v55 = vrot.slane %v6455_v39, 1 }
  0xbb   : > { %1534 = vrot.lane.b32.xlu1 %v6278_v38, %s5860_s16 }
  0xbc   : > { %1977 = vrot.lane.b32.xlu0 %v6469_v59, %s5864_s19  ;;  %2474 = vmatmul.mubr.bf16.vlgmr.msra.gmra.mrb[0].mxu0 %v2277_v50  ;;  %vm691_vm6 = vcmp.lt.s32.totalorder %v363_v47, 15  ;;  %v1831_v47 = vadd.f32 %v6409_v11, %v1735_v34  ;;  %v1655_v8 = vsel %vm9964_vm0, %v10086_v35, %v1617_v55  ;;  %v10087_v34 = vmov 1.0  }
  0xbd   : > { %v6483_v41 = vpop.permute.xlu1 %1518  ;;  %2481 = vmatprep.mubr.bf16.mxu0 %v10081_v25  ;;  %vm6510_vm9 = vmxor %vm691_vm6, %vm5868_vm2  ;;  %v1736_v25 = vadd.f32 %v6355_v20, %v1575_v46  ;;  %v559_v57 = vsel %vm527_vm12, 0.0, %v10087_v34 }
  0xbe   : > { %v1962_v4 = vpop.permute.xlu0 %1961  ;;  %vm790_vm15 = vmand %vm6349_vm11, %vm6510_vm9  ;;  %v1927_v46 = vadd.f32 %v1866_v28, %v1831_v47  ;;  %v920_v24 = vsel %vm888_vm5, 0.0, %v559_v57  ;;  %v6574_v57 = vld [vmem:[%s5966_s13 + $0x78] sm:$0xff] }
  0xbf   : > { %1979 = vrot.lane.b32.xlu1 %v6481_v10, %s5864_s19  ;;  %v1832_v20 = vadd.f32 %v6432_v58, %v1736_v25  ;;  %v822_v7 = vsel %vm790_vm15, 0.0, %v10087_v34  ;;  %vm988_vm3 = vmand %vm6383_vm7, %vm6510_vm9 }
  0xc0   : > { %1693 = vrot.lane.b32.xlu0 %v1657_v32, %s5861_s17  ;;  %v6507_v32 = vld [vmem:[%s5966_s13 + $0x70] sm:$0xff]  ;;  %v2023_v58 = vadd.f32 %v1962_v4, %v1927_v46  ;;  %vm1150_vm6 = vmand %vm6413_vm10, %vm6499_vm8  ;;  %v1020_v4 = vsel %vm988_vm3, 0.0, %v822_v7  ;;  %v300_v7 = vadd.s32 32, %v5960_v1 }
  0xc1   : > { %v1964_v2 = vpop.permute.xlu1 %1963  ;;  %v1928_v28 = vadd.f32 %v1868_v43, %v1832_v20  ;;  %v10088_v25 = vrot.slane %v6507_v32, 1  ;;  %vm1381_vm12 = vmand %vm9965_vm13, %vm6510_vm9  ;;  %v6568_v19 = vsel %vm1150_vm6, 0.0, %v920_v24 }
  0xc2   : > { %v6491_v50 = vpop.permute.xlu0 %1677  ;;  %10089 = vst [vmem:[#allocation9_spill] sm:$0xff] %v6568_v19  ;;  %v6570_v46 = vsel %vm1381_vm12, 0.0, %v1020_v4  ;;  %v332_v4 = vand.u32 255, %v300_v7 }
  0xc3   : > { %1695 = vrot.lane.b32.xlu1 %v1656_v45, %s5861_s17  ;;  %v1654_v47 = vsel %vm9964_vm0, %v1617_v55, %v10088_v25  ;;  %v2024_v48 = vadd.f32 %v1964_v2, %v1928_v28  ;;  %10090 = vst [vmem:[#allocation10_spill] sm:$0xff] %v6570_v46  ;;  %v10091_v25 = vrot.slane %v6455_v39, 7 }
  0xc4   : > { %2073 = vrot.lane.b32.xlu0 %v6366_v37, %s10033_s26 }
  0xc5   : > { %v6503_v29 = vpop.permute.xlu1 %1679 }
  0xc6   : > { %v2058_v6 = vpop.permute.xlu0 %2057 }
  0xc7   : > { %2075 = vrot.lane.b32.xlu1 %v6455_v39, %s10033_s26  ;;  %v2119_v27 = vadd.f32 %v2058_v6, %v2023_v58  ;;  %v1457_v6 = vrot.slane %v6507_v32, 7  ;;  %v301_v58 = vadd.s32 40, %v5960_v1 }
  0xc8   : > { %1789 = vrot.lane.b32.xlu0 %v6469_v59, %s5862_s10 }
  0xc9   : > { %v2060_v9 = vpop.permute.xlu1 %2059 }
  0xca   : > { %v6537_v11 = vpop.permute.xlu0 %1773  ;;  %v2120_v55 = vadd.f32 %v2060_v9, %v2024_v48  ;;  %v9933_v48 = vrot.slane %v6574_v57, 7 }
  0xcb   : > { %1791 = vrot.lane.b32.xlu1 %v6481_v10, %s5862_s10 }
  0xcc   : > { %2169 = vrot.lane.b32.xlu0 %v1655_v8, %s5866_s11 }
  0xcd   : > { %v6556_v35 = vpop.permute.xlu1 %1775 }
  0xce   : > { %v2154_v43 = vpop.permute.xlu0 %2153 }
  0xcf   : > { %2171 = vrot.lane.b32.xlu1 %v1654_v47, %s5866_s11  ;;  %v2215_v20 = vadd.f32 %v2154_v43, %v2119_v27  ;;  %v6588_v43 = vsel %vm9963_vm1, %v10091_v25, %v1457_v6  ;;  %v6602_v25 = vsel %vm9963_vm1, %v1457_v6, %v9933_v48  ;;  %v1576_v6 = vadd.f32 %v6471_v23, %v6073_v33 }
  0xd0   : > { %1885 = vrot.lane.b32.xlu0 %v1655_v8, %s5863_s20  ;;  %v1577_v33 = vadd.f32 %v6483_v41, %v6087_v36 }
  0xd1   : > { %v2156_v2 = vpop.permute.xlu1 %2155  ;;  %v2247_v27 = vmul.f32 %v2215_v20, %v6568_v19  ;;  %v1737_v23 = vadd.f32 %v6491_v50, %v1576_v6  ;;  %v10096_v50 = vrot.slane %v6507_v32, 1 }
  0xd2   : > { %v2216_v45 = vadd.f32 %v2156_v2, %v2120_v55  ;;  %v1870_v28 = vpop.permute.xlu0 %1869  ;;  %v2295_v55 = vpack.c.bf16 %v6134_v49, %v6111_v42  ;;  %v364_v42 = vand.u32 15, %v332_v4 }
  0xd3   : > { %1887 = vrot.lane.b32.xlu1 %v1654_v47, %s5863_s20 }
  0xd4   : > { %v2248_v24 = vmul.f32 %v2216_v45, %v6570_v46  ;;  %1536 = vrot.lane.b32.xlu0 %v6366_v37, %s5860_s16  ;;  %v333_v45 = vand.u32 255, %v301_v58  ;;  %vm430_vm8 = vcmp.ge.s32.totalorder %v364_v42, 1  ;;  %v1738_v42 = vadd.f32 %v6503_v29, %v1577_v33 }
  0xd5   : > { %v1872_v9 = vpop.permute.xlu1 %1871  ;;  %vm6617_vm15 = vmxor %vm430_vm8, %vm5868_vm2 }
  0xd6   : > { %v6592_v2 = vpop.permute.xlu0 %1520  ;;  %v2278_v20 = vpack.c.bf16 %v2248_v24, %v2247_v27  ;;  %v365_v58 = vand.u32 15, %v333_v45  ;;  %vm529_vm3 = vmand %vm491_vm4, %vm6617_vm15  ;;  %v1834_v29 = vadd.f32 %v6556_v35, %v1738_v42 }
  0xd7   : > { %1538 = vrot.lane.b32.xlu1 %v6455_v39, %s5860_s16  ;;  %vm890_vm12 = vmand %vm6361_vm14, %vm6617_vm15 }
  0xd8   : > { %1981 = vrot.lane.b32.xlu0 %v6588_v43, %s5864_s19  ;;  %2482 = vmatmul.mubr.bf16.gmra.mrb[4].mxu0 %v2278_v20  ;;  %vm693_vm9 = vcmp.lt.s32.totalorder %v365_v58, 15  ;;  %v6625_v20 = vld [vmem:[%s5966_s13 + $0x80] sm:$0xff]  ;;  %v1833_v58 = vadd.f32 %v6537_v11, %v1737_v23  ;;  %v561_v23 = vsel %vm529_vm3, 0.0, %v10087_v34  ;;  %v1930_v35 = vadd.f32 %v1872_v9, %v1834_v29 }
  0xd9   : > { %v6604_v7 = vpop.permute.xlu1 %1522  ;;  %2489 = vmatprep.mubr.bf16.mxu0 %v2295_v55  ;;  %vm6628_vm5 = vmxor %vm693_vm9, %vm5868_vm2  ;;  %v9936_v36 = vrot.slane %v6625_v20, 1  ;;  %v922_v19 = vsel %vm890_vm12, 0.0, %v561_v23  ;;  %v6692_v23 = vld [vmem:[%s5966_s13 + $0x88] sm:$0xff] }
  0xda   : > { %v1966_v49 = vpop.permute.xlu0 %1965  ;;  %vm792_vm6 = vmand %vm6349_vm11, %vm6628_vm5  ;;  %v1929_v33 = vadd.f32 %v1870_v28, %v1833_v58 }
  0xdb   : > { %1983 = vrot.lane.b32.xlu1 %v6602_v25, %s5864_s19  ;;  %v824_v48 = vsel %vm792_vm6, 0.0, %v10087_v34  ;;  %vm990_vm8 = vmand %vm6383_vm7, %vm6628_vm5 }
  0xdc   : > { %1697 = vrot.lane.b32.xlu0 %v1655_v8, %s5861_s17  ;;  %v1619_v8 = vrot.slane %v6574_v57, 1  ;;  %v2025_v28 = vadd.f32 %v1966_v49, %v1929_v33  ;;  %vm1152_vm9 = vmand %vm6413_vm10, %vm6617_vm15  ;;  %v1022_v49 = vsel %vm990_vm8, 0.0, %v824_v48  ;;  %v302_v48 = vadd.s32 48, %v5960_v1 }
  0xdd   : > { %v1968_v27 = vpop.permute.xlu1 %1967  ;;  %vm1383_vm3 = vmand %vm9965_vm13, %vm6628_vm5  ;;  %v6686_v4 = vsel %vm1152_vm9, 0.0, %v922_v19 }
  0xde   : > { %v6609_v24 = vpop.permute.xlu0 %1681  ;;  %v1653_v6 = vsel %vm9964_vm0, %v10096_v50, %v1619_v8  ;;  %v1652_v42 = vsel %vm9964_vm0, %v1619_v8, %v9936_v36  ;;  %v2026_v50 = vadd.f32 %v1968_v27, %v1930_v35  ;;  %10097 = vst [vmem:[#allocation11_spill] sm:$0xff] %v6686_v4  ;;  %v6688_v33 = vsel %vm1383_vm3, 0.0, %v1022_v49 }
  0xdf   : > { %1699 = vrot.lane.b32.xlu1 %v1654_v47, %s5861_s17  ;;  %10098 = vst [vmem:[#allocation12_spill] sm:$0xff] %v6688_v33 }
  0xe0   : > { %2077 = vrot.lane.b32.xlu0 %v6507_v32, %s10033_s26 }
  0xe1   : > { %v6621_v55 = vpop.permute.xlu1 %1683 }
  0xe2   : > { %v2062_v45 = vpop.permute.xlu0 %2061 }
  0xe3   : > { %2079 = vrot.lane.b32.xlu1 %v6574_v57, %s10033_s26  ;;  %v2121_v46 = vadd.f32 %v2062_v45, %v2025_v28  ;;  %v1459_v45 = vrot.slane %v6625_v20, 7  ;;  %v303_v28 = vadd.s32 56, %v5960_v1 }
  0xe4   : > { %1793 = vrot.lane.b32.xlu0 %v6588_v43, %s5862_s10 }
  0xe5   : > { %v2064_v41 = vpop.permute.xlu1 %2063 }
  0xe6   : > { %v6655_v11 = vpop.permute.xlu0 %1777  ;;  %v2122_v8 = vadd.f32 %v2064_v41, %v2026_v50  ;;  %v9937_v41 = vrot.slane %v6692_v23, 7 }
  0xe7   : > { %1795 = vrot.lane.b32.xlu1 %v6602_v25, %s5862_s10 }
  0xe8   : > { %2173 = vrot.lane.b32.xlu0 %v1653_v6, %s5866_s11 }
  0xe9   : > { %v6674_v58 = vpop.permute.xlu1 %1779 }
  0xea   : > { %v2158_v9 = vpop.permute.xlu0 %2157 }
  0xeb   : > { %2175 = vrot.lane.b32.xlu1 %v1652_v42, %s5866_s11  ;;  %v2217_v29 = vadd.f32 %v2158_v9, %v2121_v46  ;;  %v10099_v9 = vrot.slane %v6574_v57, 7 }
  0xec   : > { %1889 = vrot.lane.b32.xlu0 %v1653_v6, %s5863_s20 }
  0xed   : > { %v2160_v27 = vpop.permute.xlu1 %2159  ;;  %v2249_v46 = vmul.f32 %v2217_v29, %v6686_v4  ;;  %v6706_v49 = vsel %vm9963_vm1, %v10099_v9, %v1459_v45  ;;  %v6720_v9 = vsel %vm9963_vm1, %v1459_v45, %v9937_v41  ;;  %v1578_v45 = vadd.f32 %v6592_v2, %v6142_v51 }
  0xee   : > { %v2218_v47 = vadd.f32 %v2160_v27, %v2122_v8  ;;  %v1874_v35 = vpop.permute.xlu0 %1873  ;;  %v334_v8 = vand.u32 255, %v302_v48  ;;  %v2296_v27 = vpack.c.bf16 %v6180_v60, %v6160_v54  ;;  %v1579_v51 = vadd.f32 %v6604_v7, %v6150_v52 }
  0xef   : > { %1891 = vrot.lane.b32.xlu1 %v1652_v42, %s5863_s20  ;;  %v1739_v2 = vadd.f32 %v6609_v24, %v1578_v45  ;;  %v10104_v24 = vrot.slane %v6625_v20, 1 }
  0xf0   : > { %v2250_v19 = vmul.f32 %v2218_v47, %v6688_v33  ;;  %1540 = vrot.lane.b32.xlu0 %v6507_v32, %s5860_s16  ;;  %v335_v47 = vand.u32 255, %v303_v28  ;;  %v366_v54 = vand.u32 15, %v334_v8 }
  0xf1   : > { %v1876_v50 = vpop.permute.xlu1 %1875 }
  0xf2   : > { %v6710_v36 = vpop.permute.xlu0 %1524  ;;  %v2279_v29 = vpack.c.bf16 %v2250_v19, %v2249_v46  ;;  %v367_v28 = vand.u32 15, %v335_v47  ;;  %vm432_vm15 = vcmp.ge.s32.totalorder %v366_v54, 1  ;;  %v1740_v54 = vadd.f32 %v6621_v55, %v1579_v51 }
  0xf3   : > { %1542 = vrot.lane.b32.xlu1 %v6574_v57, %s5860_s16  ;;  %vm6735_vm6 = vmxor %vm432_vm15, %vm5868_vm2 }
  0xf4   : > { %1985 = vrot.lane.b32.xlu0 %v6706_v49, %s5864_s19  ;;  %2490 = vmatmul.mubr.bf16.gmra.mrb[8].mxu0 %v2279_v29  ;;  %vm695_vm5 = vcmp.lt.s32.totalorder %v367_v28, 15  ;;  %v6743_v29 = vld [vmem:[%s5966_s13 + $0x90] sm:$0xff]  ;;  %vm531_vm8 = vmand %vm491_vm4, %vm6735_vm6  ;;  %v1835_v28 = vadd.f32 %v6655_v11, %v1739_v2  ;;  %v1836_v55 = vadd.f32 %v6674_v58, %v1740_v54 }
  0xf5   : > { %v6722_v48 = vpop.permute.xlu1 %1526  ;;  %2497 = vmatprep.mubr.bf16.mxu0 %v2296_v27  ;;  %vm6746_vm12 = vmxor %vm695_vm5, %vm5868_vm2  ;;  %v9940_v52 = vrot.slane %v6743_v29, 1  ;;  %v563_v2 = vsel %vm531_vm8, 0.0, %v10087_v34 }
  0xf6   : > { %v1970_v60 = vpop.permute.xlu0 %1969  ;;  %vm794_vm9 = vmand %vm6349_vm11, %vm6746_vm12  ;;  %v1931_v51 = vadd.f32 %v1874_v35, %v1835_v28  ;;  %v1932_v58 = vadd.f32 %v1876_v50, %v1836_v55 }
  0xf7   : > { %1987 = vrot.lane.b32.xlu1 %v6720_v9, %s5864_s19  ;;  %vm892_vm3 = vmand %vm6361_vm14, %vm6735_vm6  ;;  %v826_v41 = vsel %vm794_vm9, 0.0, %v10087_v34 }
  0xf8   : > { %1701 = vrot.lane.b32.xlu0 %v1653_v6, %s5861_s17  ;;  %v1621_v6 = vrot.slane %v6692_v23, 1  ;;  %vm992_vm15 = vmand %vm6383_vm7, %vm6746_vm12  ;;  %v2027_v35 = vadd.f32 %v1970_v60, %v1931_v51  ;;  %v924_v33 = vsel %vm892_vm3, 0.0, %v563_v2  ;;  %v6810_v2 = vld [vmem:[%s5966_s13 + $0x98] sm:$0xff] }
  0xf9   : > { %v1972_v46 = vpop.permute.xlu1 %1971  ;;  %vm1154_vm5 = vmand %vm6413_vm10, %vm6735_vm6  ;;  %v1024_v60 = vsel %vm992_vm15, 0.0, %v826_v41  ;;  %v304_v41 = vadd.s32 64, %v5960_v1 }
  0xfa   : > { %v6727_v19 = vpop.permute.xlu0 %1685  ;;  %v1651_v45 = vsel %vm9964_vm0, %v10104_v24, %v1621_v6  ;;  %v1650_v54 = vsel %vm9964_vm0, %v1621_v6, %v9940_v52  ;;  %v2028_v24 = vadd.f32 %v1972_v46, %v1932_v58  ;;  %vm1385_vm8 = vmand %vm9965_vm13, %vm6746_vm12  ;;  %v6804_v8 = vsel %vm1154_vm5, 0.0, %v924_v33 }
  0xfb   : > { %1703 = vrot.lane.b32.xlu1 %v1652_v42, %s5861_s17  ;;  %10105 = vst [vmem:[#allocation13_spill] sm:$0xff] %v6804_v8  ;;  %v6806_v51 = vsel %vm1385_vm8, 0.0, %v1024_v60 }
  0xfc   : > { %2081 = vrot.lane.b32.xlu0 %v6625_v20, %s10033_s26  ;;  %10106 = vst [vmem:[#allocation14_spill] sm:$0xff] %v6806_v51 }
  0xfd   : > { %v6739_v27 = vpop.permute.xlu1 %1687 }
  0xfe   : > { %v2066_v47 = vpop.permute.xlu0 %2065 }
  0xff   : > { %2083 = vrot.lane.b32.xlu1 %v6692_v23, %s10033_s26  ;;  %v2123_v4 = vadd.f32 %v2066_v47, %v2027_v35  ;;  %v1461_v47 = vrot.slane %v6743_v29, 7  ;;  %v305_v35 = vadd.s32 72, %v5960_v1 }
 0x100   : > { %1797 = vrot.lane.b32.xlu0 %v6706_v49, %s5862_s10 }
 0x101   : > { %v2068_v7 = vpop.permute.xlu1 %2067 }
 0x102   : > { %v6773_v11 = vpop.permute.xlu0 %1781  ;;  %v2124_v6 = vadd.f32 %v2068_v7, %v2028_v24  ;;  %v9941_v7 = vrot.slane %v6810_v2, 7 }
 0x103   : > { %1799 = vrot.lane.b32.xlu1 %v6720_v9, %s5862_s10 }
 0x104   : > { %2177 = vrot.lane.b32.xlu0 %v1651_v45, %s5866_s11 }
 0x105   : > { %v6792_v28 = vpop.permute.xlu1 %1783 }
 0x106   : > { %v2162_v50 = vpop.permute.xlu0 %2161 }
 0x107   : > { %2179 = vrot.lane.b32.xlu1 %v1650_v54, %s5866_s11  ;;  %v2219_v55 = vadd.f32 %v2162_v50, %v2123_v4  ;;  %v10107_v50 = vrot.slane %v6692_v23, 7 }
 0x108   : > { %1893 = vrot.lane.b32.xlu0 %v1651_v45, %s5863_s20 }
 0x109   : > { %v2164_v46 = vpop.permute.xlu1 %2163  ;;  %v2251_v4 = vmul.f32 %v2219_v55, %v6804_v8  ;;  %v6824_v60 = vsel %vm9963_vm1, %v10107_v50, %v1461_v47  ;;  %v6838_v50 = vsel %vm9963_vm1, %v1461_v47, %v9941_v7 }
 0x10a   : > { %v2220_v42 = vadd.f32 %v2164_v46, %v2124_v6  ;;  %v1878_v58 = vpop.permute.xlu0 %1877  ;;  %v336_v6 = vand.u32 255, %v304_v41  ;;  %v2297_v46 = vpack.c.bf16 %v6224_v14, %v6206_v5 }
 0x10b   : > { %1895 = vrot.lane.b32.xlu1 %v1650_v54, %s5863_s20 }
 0x10c   : > { %v2252_v33 = vmul.f32 %v2220_v42, %v6806_v51  ;;  %1544 = vrot.lane.b32.xlu0 %v6625_v20, %s5860_s16  ;;  %v337_v42 = vand.u32 255, %v305_v35  ;;  %v368_v5 = vand.u32 15, %v336_v6  ;;  %v1580_v6 = vadd.f32 %v6710_v36, %v6188_v62  ;;  %v5742_v62 = vld [vmem:[%s9919_s3 + $0x8] sm:$0xff]  }
 0x10d   : > { %v1880_v24 = vpop.permute.xlu1 %1879  ;;  %v1581_v36 = vadd.f32 %v6722_v48, %v6196_v63  ;;  %v2298_v51 = vpack.c.bf16 %v6278_v38, %v6250_v22 }
 0x10e   : > { %v6828_v52 = vpop.permute.xlu0 %1528  ;;  %v2280_v55 = vpack.c.bf16 %v2252_v33, %v2251_v4  ;;  %v369_v4 = vand.u32 15, %v337_v42  ;;  %vm434_vm6 = vcmp.ge.s32.totalorder %v368_v5, 1  ;;  %v5741_v33 = vld [vmem:[%s9919_s3] sm:$0xff]   ;;  %v1741_v5 = vadd.f32 %v6727_v19, %v1580_v6 }
 0x10f   : > { %1546 = vrot.lane.b32.xlu1 %v6692_v23, %s5860_s16  ;;  %5399 = vmatprep.subr.bf16.mxu1 %v5741_v33  ;;  %vm6856_vm9 = vmxor %vm434_vm6, %vm5868_vm2  ;;  %v6864_v42 = vld [vmem:[%s5966_s13 + $0xa0] sm:$0xff]  ;;  %v1742_v7 = vadd.f32 %v6739_v27, %v1581_v36  ;;  %v10114_v19 = vrot.slane %v6743_v29, 1  ;;  %v5743_v27 = vld [vmem:[%s9919_s3 + $0x10] sm:$0xff]  }
 0x110   : > { %1989 = vrot.lane.b32.xlu0 %v6824_v60, %s5864_s19  ;;  %2498 = vmatmul.mubr.bf16.gmra.mrb[12].mxu0 %v2280_v55  ;;  %vm697_vm12 = vcmp.lt.s32.totalorder %v369_v4, 15  ;;  %v1623_v55 = vrot.slane %v6810_v2, 1  ;;  %vm6883_vm15 = vmand %vm491_vm4, %vm6856_vm9  ;;  %v1837_v8 = vadd.f32 %v6773_v11, %v1741_v5  ;;  %v9943_v63 = vrot.slane %v6864_v42, 1 }
 0x111   : > { %v6840_v41 = vpop.permute.xlu1 %1530  ;;  %2505 = vmatprep.mubr.bf16.mxu0 %v2297_v46  ;;  %5400 = vmatpush3.bf16.msra.mxu1 %v5741_v33  ;;  %vm6867_vm3 = vmxor %vm697_vm12, %vm5868_vm2  ;;  %v1838_v11 = vadd.f32 %v6792_v28, %v1742_v7 }
 0x112   : > { %v1974_v14 = vpop.permute.xlu0 %1973  ;;  %5401 = vmatprep.subr.bf16.mxu1 %v5742_v62  ;;  %vm796_vm5 = vmand %vm6349_vm11, %vm6867_vm3  ;;  %v6900_v6 = vsel %vm9964_vm0, %v10114_v19, %v1623_v55  ;;  %v1933_v36 = vadd.f32 %v1878_v58, %v1837_v8  ;;  %v1648_v58 = vsel %vm9964_vm0, %v1623_v55, %v9943_v63  ;;  %v10117_v63 = vrot.slane %v6810_v2, 7 }
 0x113   : > { %1991 = vrot.lane.b32.xlu1 %v6838_v50, %s5864_s19  ;;  %vm894_vm8 = vmand %vm6361_vm14, %vm6856_vm9  ;;  %v828_v19 = vsel %vm796_vm5, 0.0, %v10087_v34  ;;  %v1934_v28 = vadd.f32 %v1880_v24, %v1838_v11  ;;  %v5744_v24 = vld [vmem:[%s9919_s3 + $0x18] sm:$0xff]  }
 0x114   : > { %1705 = vrot.lane.b32.xlu0 %v1651_v45, %s5861_s17  ;;  %vm994_vm6 = vmand %vm6383_vm7, %vm6867_vm3  ;;  %v2029_v8 = vadd.f32 %v1974_v14, %v1933_v36 }
 0x115   : > { %v1976_v35 = vpop.permute.xlu1 %1975  ;;  %5402 = vmatpush3.bf16.msra.mxu1 %v5742_v62  ;;  %v565_v62 = vsel %vm6883_vm15, 0.0, %v10087_v34  ;;  %vm1156_vm12 = vmand %vm6413_vm10, %vm6856_vm9  ;;  %v1026_v11 = vsel %vm994_vm6, 0.0, %v828_v19  ;;  %v1463_v19 = vrot.slane %v6864_v42, 7 }
 0x116   : > { %v6848_v47 = vpop.permute.xlu0 %1689  ;;  %5403 = vmatprep.subr.bf16.mxu1 %v5743_v27  ;;  %v2030_v14 = vadd.f32 %v1976_v35, %v1934_v28  ;;  %v926_v55 = vsel %vm894_vm8, 0.0, %v565_v62  ;;  %vm1387_vm15 = vmand %vm9965_vm13, %vm6867_vm3  ;;  %v306_v28 = vadd.s32 80, %v5960_v1 }
 0x117   : > { %1707 = vrot.lane.b32.xlu1 %v1650_v54, %s5861_s17  ;;  %v6951_v45 = vsel %vm1387_vm15, 0.0, %v1026_v11  ;;  %v6955_v54 = vld [vmem:[%s5966_s13 + $0xa8] sm:$0xff] }
 0x118   : > { %2085 = vrot.lane.b32.xlu0 %v6743_v29, %s10033_s26  ;;  %10116 = vst [vmem:[#allocation16_spill] sm:$0xff] %v6951_v45 }
 0x119   : > { %v6860_v46 = vpop.permute.xlu1 %1691  ;;  %5404 = vmatpush3.bf16.msra.mxu1 %v5743_v27 }
 0x11a   : > { %v2070_v4 = vpop.permute.xlu0 %2069  ;;  %5405 = vmatprep.subr.bf16.mxu1 %v5744_v24 }
 0x11b   : > { %2087 = vrot.lane.b32.xlu1 %v6810_v2, %s10033_s26  ;;  %v2125_v33 = vadd.f32 %v2070_v4, %v2029_v8  ;;  %v6949_v4 = vsel %vm1156_vm12, 0.0, %v926_v55 }
 0x11c   : > { %1801 = vrot.lane.b32.xlu0 %v6824_v60, %s5862_s10  ;;  %10115 = vst [vmem:[#allocation15_spill] sm:$0xff] %v6949_v4 }
 0x11d   : > { %v2072_v48 = vpop.permute.xlu1 %2071  ;;  %5406 = vmatpush3.bf16.msra.mxu1 %v5744_v24 }
 0x11e   : > { %v6906_v5 = vpop.permute.xlu0 %1785  ;;  %v2126_v36 = vadd.f32 %v2072_v48, %v2030_v14  ;;  %v5745_v48 = vld [vmem:[%s9919_s3 + $0x20] sm:$0xff]  }
 0x11f   : > { %1803 = vrot.lane.b32.xlu1 %v6838_v50, %s5862_s10  ;;  %5407 = vmatprep.subr.bf16.mxu1 %v5745_v48 }
 0x120   : > { %2181 = vrot.lane.b32.xlu0 %v6900_v6, %s5866_s11 }
 0x121   : > { %v6928_v7 = vpop.permute.xlu1 %1787  ;;  %5408 = vmatpush3.bf16.msra.mxu1 %v5745_v48  ;;  %v5747_v48 = vld [vmem:[%s9919_s3 + $0x30] sm:$0xff]  }
 0x122   : > { %v2166_v27 = vpop.permute.xlu0 %2165 }
 0x123   : > { %2183 = vrot.lane.b32.xlu1 %v1648_v58, %s5866_s11  ;;  %v2221_v35 = vadd.f32 %v2166_v27, %v2125_v33  ;;  %v307_v33 = vadd.s32 88, %v5960_v1 }
 0x124   : > { %1897 = vrot.lane.b32.xlu0 %v6900_v6, %s5863_s20 }
 0x125   : > { %v2168_v62 = vpop.permute.xlu1 %2167  ;;  %v2253_v24 = vmul.f32 %v2221_v35, %v6949_v4  ;;  %v5746_v35 = vld [vmem:[%s9919_s3 + $0x28] sm:$0xff]   ;;  %v339_v27 = vand.u32 255, %v307_v33 }
 0x126   : > { %v2222_v8 = vadd.f32 %v2168_v62, %v2126_v36  ;;  %v1882_v14 = vpop.permute.xlu0 %1881  ;;  %v6972_v36 = vsel %vm9963_vm1, %v10117_v63, %v1463_v19  ;;  %v338_v62 = vand.u32 255, %v306_v28  ;;  %5409 = vmatprep.subr.bf16.mxu1 %v5746_v35  ;;  %v10118_v63 = vrot.slane %v6955_v54, 7 }
 0x127   : > { %1899 = vrot.lane.b32.xlu1 %v1648_v58, %s5863_s20  ;;  %5410 = vmatpush3.bf16.msra.mxu1 %v5746_v35  ;;  %v7019_v35 = vld [vmem:[%s5966_s13 + $0xb0] sm:$0xff] }
 0x128   : > { %v2254_v55 = vmul.f32 %v2222_v8, %v6951_v45  ;;  %1548 = vrot.lane.b32.xlu0 %v6743_v29, %s5860_s16  ;;  %v6989_v22 = vsel %vm9963_vm1, %v1463_v19, %v10118_v63  ;;  %v370_v28 = vand.u32 15, %v338_v62  ;;  %5411 = vmatprep.subr.bf16.mxu1 %v5747_v48  ;;  %v1625_v62 = vrot.slane %v6955_v54, 1 }
 0x129   : > { %v1884_v11 = vpop.permute.xlu1 %1883 }
 0x12a   : > { %v6979_v8 = vpop.permute.xlu0 %1532  ;;  %v2281_v4 = vpack.c.bf16 %v2254_v55, %v2253_v24  ;;  %v371_v24 = vand.u32 15, %v339_v27  ;;  %vm436_vm9 = vcmp.ge.s32.totalorder %v370_v28, 1  ;;  %v1582_v55 = vadd.f32 %v6828_v52, %v6232_v16 }
 0x12b   : > { %1550 = vrot.lane.b32.xlu1 %v6810_v2, %s5860_s16  ;;  %5412 = vmatpush3.bf16.msra.mxu1 %v5747_v48  ;;  %vm7011_vm5 = vmxor %vm436_vm9, %vm5868_vm2  ;;  %v1583_v16 = vadd.f32 %v6840_v41, %v6240_v18  ;;  %v9947_v18 = vrot.slane %v7019_v35, 1 }
 0x12c   : > { %1993 = vrot.lane.b32.xlu0 %v6972_v36, %s5864_s19  ;;  %2506 = vmatmul.mubr.bf16.gmra.mrb[16].mxu0 %v2281_v4  ;;  %vm699_vm3 = vcmp.lt.s32.totalorder %v371_v24, 15  ;;  %v1743_v52 = vadd.f32 %v6848_v47, %v1582_v55  ;;  %vm535_vm6 = vmand %vm491_vm4, %vm7011_vm5  ;;  %v10123_v47 = vrot.slane %v6864_v42, 1 }
 0x12d   : > { %v6991_v38 = vpop.permute.xlu1 %1534  ;;  %2513 = vmatprep.mubr.bf16.mxu0 %v2298_v51  ;;  %v5748_v51 = vld [vmem:[%s9919_s3 + $0x38] sm:$0xff]   ;;  %vm7022_vm8 = vmxor %vm699_vm3, %vm5868_vm2  ;;  %v1744_v28 = vadd.f32 %v6860_v46, %v1583_v16  ;;  %v567_v55 = vsel %vm535_vm6, 0.0, %v10087_v34 }
 0x12e   : > { %v1978_v33 = vpop.permute.xlu0 %1977  ;;  %5413 = vmatprep.subr.bf16.mxu1 %v5748_v51  ;;  %v1839_v48 = vadd.f32 %v6906_v5, %v1743_v52  ;;  %vm798_vm12 = vmand %vm6349_vm11, %vm7022_vm8  ;;  %v1647_v24 = vsel %vm9964_vm0, %v10123_v47, %v1625_v62  ;;  %v1646_v52 = vsel %vm9964_vm0, %v1625_v62, %v9947_v18 }
 0x12f   : > { %1995 = vrot.lane.b32.xlu1 %v6989_v22, %s5864_s19  ;;  %5414 = vmatpush3.bf16.msra.mxu1 %v5748_v51  ;;  %v1840_v46 = vadd.f32 %v6928_v7, %v1744_v28  ;;  %vm896_vm15 = vmand %vm6361_vm14, %vm7011_vm5  ;;  %v830_v16 = vsel %vm798_vm12, 0.0, %v10087_v34 }
 0x130   : > { %1709 = vrot.lane.b32.xlu0 %v6900_v6, %s5861_s17  ;;  %v1935_v51 = vadd.f32 %v1882_v14, %v1839_v48  ;;  %vm996_vm9 = vmand %vm6383_vm7, %vm7022_vm8  ;;  %v928_v45 = vsel %vm896_vm15, 0.0, %v567_v55  ;;  %v7086_v55 = vld [vmem:[%s5966_s13 + $0xb8] sm:$0xff] }
 0x131   : > { %v1980_v4 = vpop.permute.xlu1 %1979  ;;  %v1936_v7 = vadd.f32 %v1884_v11, %v1840_v46  ;;  %vm1158_vm3 = vmand %vm6413_vm10, %vm7011_vm5 }
 0x132   : > { %v7003_v19 = vpop.permute.xlu0 %1693  ;;  %v2031_v14 = vadd.f32 %v1978_v33, %v1935_v51  ;;  %v1028_v33 = vsel %vm996_vm9, 0.0, %v830_v16  ;;  %vm1389_vm6 = vmand %vm9965_vm13, %vm7022_vm8  ;;  %v7080_v6 = vsel %vm1158_vm3, 0.0, %v928_v45 }
 0x133   : > { %1711 = vrot.lane.b32.xlu1 %v1648_v58, %s5861_s17  ;;  %v2032_v48 = vadd.f32 %v1980_v4, %v1936_v7  ;;  %10124 = vst [vmem:[#allocation17_spill] sm:$0xff] %v7080_v6  ;;  %v7082_v51 = vsel %vm1389_vm6, 0.0, %v1028_v33  ;;  %v308_v58 = vadd.s32 96, %v5960_v1 }
 0x134   : > { %2089 = vrot.lane.b32.xlu0 %v6864_v42, %s10033_s26  ;;  %10125 = vst [vmem:[#allocation18_spill] sm:$0xff] %v7082_v51 }
 0x135   : > { %v7015_v27 = vpop.permute.xlu1 %1695 }
 0x136   : > { %v2074_v63 = vpop.permute.xlu0 %2073 }
 0x137   : > { %2091 = vrot.lane.b32.xlu1 %v6955_v54, %s10033_s26  ;;  %v2127_v47 = vadd.f32 %v2074_v63, %v2031_v14  ;;  %v1465_v63 = vrot.slane %v7019_v35, 7  ;;  %v309_v14 = vadd.s32 104, %v5960_v1 }
 0x138   : > { %1805 = vrot.lane.b32.xlu0 %v6972_v36, %s5862_s10 }
 0x139   : > { %v2076_v41 = vpop.permute.xlu1 %2075 }
 0x13a   : > { %v7049_v5 = vpop.permute.xlu0 %1789  ;;  %v2128_v62 = vadd.f32 %v2076_v41, %v2032_v48  ;;  %v9948_v48 = vrot.slane %v7086_v55, 7 }
 0x13b   : > { %1807 = vrot.lane.b32.xlu1 %v6989_v22, %s5862_s10 }
 0x13c   : > { %2185 = vrot.lane.b32.xlu0 %v1647_v24, %s5866_s11 }
 0x13d   : > { %v7068_v28 = vpop.permute.xlu1 %1791 }
 0x13e   : > { %v2170_v11 = vpop.permute.xlu0 %2169 }
 0x13f   : > { %2187 = vrot.lane.b32.xlu1 %v1646_v52, %s5866_s11  ;;  %v2223_v46 = vadd.f32 %v2170_v11, %v2127_v47  ;;  %v10126_v11 = vrot.slane %v6955_v54, 7 }
 0x140   : > { %1901 = vrot.lane.b32.xlu0 %v1647_v24, %s5863_s20 }
 0x141   : > { %v2172_v4 = vpop.permute.xlu1 %2171  ;;  %v2255_v41 = vmul.f32 %v2223_v46, %v7080_v6  ;;  %v7100_v33 = vsel %vm9963_vm1, %v10126_v11, %v1465_v63  ;;  %v7114_v11 = vsel %vm9963_vm1, %v1465_v63, %v9948_v48  ;;  %v1584_v63 = vadd.f32 %v6979_v8, %v6293_v44 }
 0x142   : > { %v2224_v16 = vadd.f32 %v2172_v4, %v2128_v62  ;;  %v1886_v7 = vpop.permute.xlu0 %1885  ;;  %v340_v62 = vand.u32 255, %v308_v58  ;;  %v2299_v4 = vpack.c.bf16 %v6455_v39, %v6366_v37  ;;  %v1585_v44 = vadd.f32 %v6991_v38, %v6309_v53 }
 0x143   : > { %1903 = vrot.lane.b32.xlu1 %v1646_v52, %s5863_s20  ;;  %v1745_v8 = vadd.f32 %v7003_v19, %v1584_v63  ;;  %v10131_v19 = vrot.slane %v7019_v35, 1 }
 0x144   : > { %v2256_v45 = vmul.f32 %v2224_v16, %v7082_v51  ;;  %1552 = vrot.lane.b32.xlu0 %v6864_v42, %s5860_s16  ;;  %v341_v16 = vand.u32 255, %v309_v14  ;;  %v372_v37 = vand.u32 15, %v340_v62 }
 0x145   : > { %v1888_v47 = vpop.permute.xlu1 %1887 }
 0x146   : > { %v7104_v18 = vpop.permute.xlu0 %1536  ;;  %v2282_v46 = vpack.c.bf16 %v2256_v45, %v2255_v41  ;;  %v373_v14 = vand.u32 15, %v341_v16  ;;  %vm438_vm5 = vcmp.ge.s32.totalorder %v372_v37, 1  ;;  %v1746_v37 = vadd.f32 %v7015_v27, %v1585_v44 }
 0x147   : > { %1554 = vrot.lane.b32.xlu1 %v6955_v54, %s5860_s16  ;;  %vm7129_vm12 = vmxor %vm438_vm5, %vm5868_vm2 }
 0x148   : > { %1997 = vrot.lane.b32.xlu0 %v7100_v33, %s5864_s19  ;;  %2514 = vmatmul.mubr.bf16.gmra.mrb[20].mxu0 %v2282_v46  ;;  %vm701_vm8 = vcmp.lt.s32.totalorder %v373_v14, 15  ;;  %v7137_v46 = vld [vmem:[%s5966_s13 + $0xc0] sm:$0xff]  ;;  %vm537_vm9 = vmand %vm491_vm4, %vm7129_vm12  ;;  %v1841_v14 = vadd.f32 %v7049_v5, %v1745_v8  ;;  %v1842_v27 = vadd.f32 %v7068_v28, %v1746_v37 }
 0x149   : > { %v7116_v58 = vpop.permute.xlu1 %1538  ;;  %2521 = vmatprep.mubr.bf16.mxu0 %v2299_v4  ;;  %vm7140_vm15 = vmxor %vm701_vm8, %vm5868_vm2  ;;  %v9951_v53 = vrot.slane %v7137_v46, 1  ;;  %v569_v8 = vsel %vm537_vm9, 0.0, %v10087_v34 }
 0x14a   : > { %v1982_v39 = vpop.permute.xlu0 %1981  ;;  %vm800_vm3 = vmand %vm6349_vm11, %vm7140_vm15  ;;  %v1937_v44 = vadd.f32 %v1886_v7, %v1841_v14  ;;  %v1938_v28 = vadd.f32 %v1888_v47, %v1842_v27 }
 0x14b   : > { %1999 = vrot.lane.b32.xlu1 %v7114_v11, %s5864_s19  ;;  %vm898_vm6 = vmand %vm6361_vm14, %vm7129_vm12  ;;  %v832_v48 = vsel %vm800_vm3, 0.0, %v10087_v34 }
 0x14c   : > { %1713 = vrot.lane.b32.xlu0 %v1647_v24, %s5861_s17  ;;  %v1627_v24 = vrot.slane %v7086_v55, 1  ;;  %vm998_vm5 = vmand %vm6383_vm7, %vm7140_vm15  ;;  %v2033_v7 = vadd.f32 %v1982_v39, %v1937_v44  ;;  %v930_v51 = vsel %vm898_vm6, 0.0, %v569_v8  ;;  %v7204_v8 = vld [vmem:[%s5966_s13 + $0xc8] sm:$0xff] }
 0x14d   : > { %v1984_v41 = vpop.permute.xlu1 %1983  ;;  %vm1160_vm8 = vmand %vm6413_vm10, %vm7129_vm12  ;;  %v1030_v39 = vsel %vm998_vm5, 0.0, %v832_v48  ;;  %v310_v48 = vadd.s32 112, %v5960_v1 }
 0x14e   : > { %v7121_v45 = vpop.permute.xlu0 %1697  ;;  %v1645_v63 = vsel %vm9964_vm0, %v10131_v19, %v1627_v24  ;;  %v1644_v37 = vsel %vm9964_vm0, %v1627_v24, %v9951_v53  ;;  %v2034_v19 = vadd.f32 %v1984_v41, %v1938_v28  ;;  %vm1391_vm9 = vmand %vm9965_vm13, %vm7140_vm15  ;;  %v7198_v62 = vsel %vm1160_vm8, 0.0, %v930_v51 }
 0x14f   : > { %1715 = vrot.lane.b32.xlu1 %v1646_v52, %s5861_s17  ;;  %10132 = vst [vmem:[#allocation19_spill] sm:$0xff] %v7198_v62  ;;  %v7200_v44 = vsel %vm1391_vm9, 0.0, %v1030_v39 }
 0x150   : > { %2093 = vrot.lane.b32.xlu0 %v7019_v35, %s10033_s26  ;;  %10133 = vst [vmem:[#allocation20_spill] sm:$0xff] %v7200_v44 }
 0x151   : > { %v7133_v4 = vpop.permute.xlu1 %1699 }
 0x152   : > { %v2078_v16 = vpop.permute.xlu0 %2077 }
 0x153   : > { %2095 = vrot.lane.b32.xlu1 %v7086_v55, %s10033_s26  ;;  %v2129_v6 = vadd.f32 %v2078_v16, %v2033_v7  ;;  %v1467_v16 = vrot.slane %v7137_v46, 7  ;;  %v311_v7 = vadd.s32 120, %v5960_v1 }
 0x154   : > { %1809 = vrot.lane.b32.xlu0 %v7100_v33, %s5862_s10 }
 0x155   : > { %v2080_v38 = vpop.permute.xlu1 %2079 }
 0x156   : > { %v7167_v5 = vpop.permute.xlu0 %1793  ;;  %v2130_v24 = vadd.f32 %v2080_v38, %v2034_v19  ;;  %v9952_v38 = vrot.slane %v7204_v8, 7 }
 0x157   : > { %1811 = vrot.lane.b32.xlu1 %v7114_v11, %s5862_s10 }
 0x158   : > { %2189 = vrot.lane.b32.xlu0 %v1645_v63, %s5866_s11 }
 0x159   : > { %v7186_v14 = vpop.permute.xlu1 %1795 }
 0x15a   : > { %v2174_v47 = vpop.permute.xlu0 %2173 }
 0x15b   : > { %2191 = vrot.lane.b32.xlu1 %v1644_v37, %s5866_s11  ;;  %v2225_v27 = vadd.f32 %v2174_v47, %v2129_v6  ;;  %v10134_v47 = vrot.slane %v7086_v55, 7 }
 0x15c   : > { %1905 = vrot.lane.b32.xlu0 %v1645_v63, %s5863_s20 }
 0x15d   : > { %v2176_v41 = vpop.permute.xlu1 %2175  ;;  %v2257_v6 = vmul.f32 %v2225_v27, %v7198_v62  ;;  %v7218_v39 = vsel %vm9963_vm1, %v10134_v47, %v1467_v16  ;;  %v7232_v47 = vsel %vm9963_vm1, %v1467_v16, %v9952_v38  ;;  %v1586_v16 = vadd.f32 %v7104_v18, %v6469_v59 }
 0x15e   : > { %v2226_v52 = vadd.f32 %v2176_v41, %v2130_v24  ;;  %v1890_v28 = vpop.permute.xlu0 %1889  ;;  %v342_v24 = vand.u32 255, %v310_v48  ;;  %v2300_v41 = vpack.c.bf16 %v6574_v57, %v6507_v32  ;;  %10135 = vst [vmem:[#allocation21_spill] sm:$0xff] %v7232_v47  ;;  %v1587_v59 = vadd.f32 %v7116_v58, %v6481_v10 }
 0x15f   : > { %1907 = vrot.lane.b32.xlu1 %v1644_v37, %s5863_s20  ;;  %v1747_v18 = vadd.f32 %v7121_v45, %v1586_v16  ;;  %v10140_v45 = vrot.slane %v7137_v46, 1 }
 0x160   : > { %v2258_v51 = vmul.f32 %v2226_v52, %v7200_v44  ;;  %1556 = vrot.lane.b32.xlu0 %v7019_v35, %s5860_s16  ;;  %v343_v52 = vand.u32 255, %v311_v7  ;;  %v374_v32 = vand.u32 15, %v342_v24 }
 0x161   : > { %v1892_v19 = vpop.permute.xlu1 %1891 }
 0x162   : > { %v7222_v53 = vpop.permute.xlu0 %1540  ;;  %v2283_v27 = vpack.c.bf16 %v2258_v51, %v2257_v6  ;;  %v375_v7 = vand.u32 15, %v343_v52  ;;  %vm440_vm12 = vcmp.ge.s32.totalorder %v374_v32, 1  ;;  %v1748_v32 = vadd.f32 %v7133_v4, %v1587_v59 }
 0x163   : > { %1558 = vrot.lane.b32.xlu1 %v7086_v55, %s5860_s16  ;;  %vm7247_vm3 = vmxor %vm440_vm12, %vm5868_vm2 }
 0x164   : > { %2001 = vrot.lane.b32.xlu0 %v7218_v39, %s5864_s19  ;;  %2522 = vmatmul.mubr.bf16.gmra.mrb[24].mxu0 %v2283_v27  ;;  %vm703_vm15 = vcmp.lt.s32.totalorder %v375_v7, 15  ;;  %v7255_v27 = vld [vmem:[%s5966_s13 + $0xd0] sm:$0xff]  ;;  %vm539_vm5 = vmand %vm491_vm4, %vm7247_vm3  ;;  %v1843_v7 = vadd.f32 %v7167_v5, %v1747_v18  ;;  %v1844_v4 = vadd.f32 %v7186_v14, %v1748_v32 }
 0x165   : > { %v7234_v48 = vpop.permute.xlu1 %1542  ;;  %2529 = vmatprep.mubr.bf16.mxu0 %v2300_v41  ;;  %vm7258_vm6 = vmxor %vm703_vm15, %vm5868_vm2  ;;  %v9955_v10 = vrot.slane %v7255_v27, 1  ;;  %v571_v18 = vsel %vm539_vm5, 0.0, %v10087_v34 }
 0x166   : > { %v1986_v57 = vpop.permute.xlu0 %1985  ;;  %vm802_vm8 = vmand %vm6349_vm11, %vm7258_vm6  ;;  %v1939_v59 = vadd.f32 %v1890_v28, %v1843_v7  ;;  %v1940_v14 = vadd.f32 %v1892_v19, %v1844_v4 }
 0x167   : > { %2003 = vrot.lane.b32.xlu1 %v7232_v47, %s5864_s19  ;;  %vm900_vm9 = vmand %vm6361_vm14, %vm7247_vm3  ;;  %v834_v38 = vsel %vm802_vm8, 0.0, %v10087_v34 }
 0x168   : > { %1717 = vrot.lane.b32.xlu0 %v1645_v63, %s5861_s17  ;;  %v1629_v63 = vrot.slane %v7204_v8, 1  ;;  %vm1000_vm12 = vmand %vm6383_vm7, %vm7258_vm6  ;;  %v2035_v28 = vadd.f32 %v1986_v57, %v1939_v59  ;;  %v932_v44 = vsel %vm900_vm9, 0.0, %v571_v18  ;;  %v7322_v18 = vld [vmem:[%s5966_s13 + $0xd8] sm:$0xff] }
 0x169   : > { %v1988_v6 = vpop.permute.xlu1 %1987  ;;  %vm1162_vm15 = vmand %vm6413_vm10, %vm7247_vm3  ;;  %v1032_v57 = vsel %vm1000_vm12, 0.0, %v834_v38  ;;  %v312_v38 = vadd.s32 128, %v5960_v1 }
 0x16a   : > { %v7239_v51 = vpop.permute.xlu0 %1701  ;;  %v1643_v16 = vsel %vm9964_vm0, %v10140_v45, %v1629_v63  ;;  %v1642_v32 = vsel %vm9964_vm0, %v1629_v63, %v9955_v10  ;;  %v2036_v45 = vadd.f32 %v1988_v6, %v1940_v14  ;;  %vm1393_vm5 = vmand %vm9965_vm13, %vm7258_vm6  ;;  %v7316_v24 = vsel %vm1162_vm15, 0.0, %v932_v44 }
 0x16b   : > { %1719 = vrot.lane.b32.xlu1 %v1644_v37, %s5861_s17  ;;  %10141 = vst [vmem:[#allocation22_spill] sm:$0xff] %v7316_v24  ;;  %v7318_v59 = vsel %vm1393_vm5, 0.0, %v1032_v57 }
 0x16c   : > { %2097 = vrot.lane.b32.xlu0 %v7137_v46, %s10033_s26  ;;  %10142 = vst [vmem:[#allocation23_spill] sm:$0xff] %v7318_v59 }
 0x16d   : > { %v7251_v41 = vpop.permute.xlu1 %1703 }
 0x16e   : > { %v2082_v52 = vpop.permute.xlu0 %2081 }
 0x16f   : > { %2099 = vrot.lane.b32.xlu1 %v7204_v8, %s10033_s26  ;;  %v2131_v62 = vadd.f32 %v2082_v52, %v2035_v28  ;;  %v1469_v52 = vrot.slane %v7255_v27, 7  ;;  %v313_v28 = vadd.s32 136, %v5960_v1 }
 0x170   : > { %1813 = vrot.lane.b32.xlu0 %v7218_v39, %s5862_s10 }
 0x171   : > { %v2084_v58 = vpop.permute.xlu1 %2083 }
 0x172   : > { %v7285_v5 = vpop.permute.xlu0 %1797  ;;  %v2132_v63 = vadd.f32 %v2084_v58, %v2036_v45  ;;  %v9956_v58 = vrot.slane %v7322_v18, 7 }
 0x173   : > { %1815 = vrot.lane.b32.xlu1 %v7232_v47, %s5862_s10 }
 0x174   : > { %2193 = vrot.lane.b32.xlu0 %v1643_v16, %s5866_s11 }
 0x175   : > { %v7304_v7 = vpop.permute.xlu1 %1799 }
 0x176   : > { %v2178_v19 = vpop.permute.xlu0 %2177 }
 0x177   : > { %2195 = vrot.lane.b32.xlu1 %v1642_v32, %s5866_s11  ;;  %v2227_v4 = vadd.f32 %v2178_v19, %v2131_v62  ;;  %v10143_v19 = vrot.slane %v7204_v8, 7 }
 0x178   : > { %1909 = vrot.lane.b32.xlu0 %v1643_v16, %s5863_s20 }
 0x179   : > { %v2180_v6 = vpop.permute.xlu1 %2179  ;;  %v2259_v62 = vmul.f32 %v2227_v4, %v7316_v24  ;;  %v7336_v57 = vsel %vm9963_vm1, %v10143_v19, %v1469_v52  ;;  %v7350_v19 = vsel %vm9963_vm1, %v1469_v52, %v9956_v58  ;;  %v1588_v52 = vadd.f32 %v7222_v53, %v6588_v43 }
 0x17a   : > { %v2228_v37 = vadd.f32 %v2180_v6, %v2132_v63  ;;  %v1894_v14 = vpop.permute.xlu0 %1893  ;;  %10144 = vst [vmem:[#allocation24_spill] sm:$0xff] %v7336_v57  ;;  %v344_v63 = vand.u32 255, %v312_v38  ;;  %v2301_v6 = vpack.c.bf16 %v6692_v23, %v6625_v20  ;;  %10145 = vst [vmem:[#allocation25_spill] sm:$0xff] %v7350_v19  ;;  %v1589_v43 = vadd.f32 %v7234_v48, %v6602_v25 }
 0x17b   : > { %1911 = vrot.lane.b32.xlu1 %v1642_v32, %s5863_s20  ;;  %v1749_v53 = vadd.f32 %v7239_v51, %v1588_v52  ;;  %v10150_v51 = vrot.slane %v7255_v27, 1 }
 0x17c   : > { %v2260_v44 = vmul.f32 %v2228_v37, %v7318_v59  ;;  %1560 = vrot.lane.b32.xlu0 %v7137_v46, %s5860_s16  ;;  %v345_v37 = vand.u32 255, %v313_v28  ;;  %v376_v20 = vand.u32 15, %v344_v63 }
 0x17d   : > { %v1896_v45 = vpop.permute.xlu1 %1895 }
 0x17e   : > { %v7340_v10 = vpop.permute.xlu0 %1544  ;;  %v2284_v4 = vpack.c.bf16 %v2260_v44, %v2259_v62  ;;  %v377_v28 = vand.u32 15, %v345_v37  ;;  %vm442_vm3 = vcmp.ge.s32.totalorder %v376_v20, 1  ;;  %v1750_v20 = vadd.f32 %v7251_v41, %v1589_v43 }
 0x17f   : > { %1562 = vrot.lane.b32.xlu1 %v7204_v8, %s5860_s16  ;;  %vm7365_vm8 = vmxor %vm442_vm3, %vm5868_vm2 }
 0x180   : > { %2005 = vrot.lane.b32.xlu0 %v7336_v57, %s5864_s19  ;;  %2530 = vmatmul.mubr.bf16.gmra.mrb[28].mxu0 %v2284_v4  ;;  %vm705_vm6 = vcmp.lt.s32.totalorder %v377_v28, 15  ;;  %v7373_v4 = vld [vmem:[%s5966_s13 + $0xe0] sm:$0xff]  ;;  %vm541_vm12 = vmand %vm491_vm4, %vm7365_vm8  ;;  %v1845_v28 = vadd.f32 %v7285_v5, %v1749_v53  ;;  %v1846_v41 = vadd.f32 %v7304_v7, %v1750_v20 }
 0x181   : > { %v7352_v38 = vpop.permute.xlu1 %1546  ;;  %2537 = vmatprep.mubr.bf16.mxu0 %v2301_v6  ;;  %vm7376_vm9 = vmxor %vm705_vm6, %vm5868_vm2  ;;  %v573_v53 = vsel %vm541_vm12, 0.0, %v10087_v34  ;;  %v7424_v20 = vld [vmem:[%s9920_s4] ss:$0 sm:$0xff] }
 0x182   : > { %v1990_v23 = vpop.permute.xlu0 %1989  ;;  %vm804_vm15 = vmand %vm6349_vm11, %vm7376_vm9  ;;  %v1941_v5 = vadd.f32 %v1894_v14, %v1845_v28  ;;  %v1942_v7 = vadd.f32 %v1896_v45, %v1846_v41 }
 0x183   : > { %2007 = vrot.lane.b32.xlu1 %v7350_v19, %s5864_s19  ;;  %vm902_vm5 = vmand %vm6361_vm14, %vm7365_vm8  ;;  %v836_v25 = vsel %vm804_vm15, 0.0, %v10087_v34 }
 0x184   : > { %1721 = vrot.lane.b32.xlu0 %v1643_v16, %s5861_s17  ;;  %v1631_v16 = vrot.slane %v7322_v18, 1  ;;  %vm1002_vm3 = vmand %vm6383_vm7, %vm7376_vm9  ;;  %v2037_v14 = vadd.f32 %v1990_v23, %v1941_v5  ;;  %v934_v45 = vsel %vm902_vm5, 0.0, %v573_v53 }
 0x185   : > { %v1992_v62 = vpop.permute.xlu1 %1991  ;;  %vm1164_vm6 = vmand %vm6413_vm10, %vm7365_vm8 }
 0x186   : > { %v7357_v44 = vpop.permute.xlu0 %1705  ;;  %v7402_v52 = vsel %vm9964_vm0, %v10150_v51, %v1631_v16  ;;  %v10151_v51 = vrot.slane %v7373_v4, 1  ;;  %v2038_v23 = vadd.f32 %v1992_v62, %v1942_v7  ;;  %vm1395_vm12 = vmand %vm9965_vm13, %vm7376_vm9 }
 0x187   : > { %1723 = vrot.lane.b32.xlu1 %v1642_v32, %s5861_s17 }
 0x188   : > { %2101 = vrot.lane.b32.xlu0 %v7255_v27, %s10033_s26  ;;  %v1640_v24 = vsel %vm9964_vm0, %v1631_v16, %v10151_v51  ;;  %v1034_v16 = vsel %vm1002_vm3, 0.0, %v836_v25 }
 0x189   : > { %v7369_v6 = vpop.permute.xlu1 %1707  ;;  %v7452_v25 = vsel %vm1395_vm12, 0.0, %v1034_v16  ;;  %v10153_v16 = vrot.slane %v7322_v18, 7 }
 0x18a   : > { %v2086_v37 = vpop.permute.xlu0 %2085 }
 0x18b   : > { %2103 = vrot.lane.b32.xlu1 %v7322_v18, %s10033_s26  ;;  %v2133_v41 = vadd.f32 %v2086_v37, %v2037_v14  ;;  %v7447_v37 = vsel %vm1164_vm6, 0.0, %v934_v45  ;;  %v1471_v14 = vrot.slane %v7373_v4, 7 }
 0x18c   : > { %1817 = vrot.lane.b32.xlu0 %v7336_v57, %s5862_s10 }
 0x18d   : > { %v2088_v48 = vpop.permute.xlu1 %2087 }
 0x18e   : > { %v7405_v43 = vpop.permute.xlu0 %1801  ;;  %v2134_v62 = vadd.f32 %v2088_v48, %v2038_v23 }
 0x18f   : > { %v5110_v58 = vpop.f32.mrb[0].mxu0  ;;  %1819 = vrot.lane.b32.xlu1 %v7350_v19, %s5862_s10 }
 0x190   : > { %2197 = vrot.lane.b32.xlu0 %v7402_v52, %s5866_s11  ;;  %v5111_v28 = vpop.f32.mrb[1].mxu0 }
 0x191   : > { %v5112_v59 = vadd.f32 %v5111_v28, %v5110_v58  ;;  %v5113_v19 = vpop.f32.mrb[2].mxu0  ;;  %v7430_v57 = vpop.permute.xlu1 %1803  ;;  %v314_v28 = vadd.s32 144, %v5960_v1 }
 0x192   : > { %v2182_v5 = vpop.permute.xlu0 %2181  ;;  %v5114_v47 = vpop.f32.mrb[3].mxu0 }
 0x193   : > { %v2476_v58 = vadd.f32 %v5112_v59, %v7424_v20  ;;  %v5115_v63 = vadd.f32 %v5114_v47, %v5113_v19  ;;  %2199 = vrot.lane.b32.xlu1 %v1640_v24, %s5866_s11  ;;  %v2229_v53 = vadd.f32 %v2182_v5, %v2133_v41  ;;  %v315_v19 = vadd.s32 152, %v5960_v1 }
 0x194   : > { %1913 = vrot.lane.b32.xlu0 %v7402_v52, %s5863_s20 }
 0x195   : > { %v2479_v7 = vadd.f32 %v5115_v63, %v7424_v20  ;;  %v2184_v32 = vpop.permute.xlu1 %2183  ;;  %v2602_v48 = vmax.f32 %v2476_v58, 0.0  ;;  %v2261_v45 = vmul.f32 %v2229_v53, %v7447_v37  ;;  %v7468_v63 = vsel %vm9963_vm1, %v10153_v16, %v1471_v14 }
 0x196   : > { %v2230_v59 = vadd.f32 %v2184_v32, %v2134_v62  ;;  %v1898_v47 = vpop.permute.xlu0 %1897  ;;  %v346_v58 = vand.u32 255, %v314_v28  ;;  %v2302_v62 = vpack.c.bf16 %v6810_v2, %v6743_v29  ;;  %v347_v32 = vand.u32 255, %v315_v19 }
 0x197   : > { %v2603_v51 = vmax.f32 %v2479_v7, 0.0  ;;  %1915 = vrot.lane.b32.xlu1 %v1640_v24, %s5863_s20 }
 0x198   : > { %v2262_v23 = vmul.f32 %v2230_v59, %v7452_v25  ;;  %1564 = vrot.lane.b32.xlu0 %v7255_v27, %s5860_s16  ;;  %v10154_v59 = vrot.slane %v6284_v40, 7  ;;  %v378_v2 = vand.u32 15, %v346_v58 }
 0x199   : > { %v1900_v41 = vpop.permute.xlu1 %1899  ;;  %v7462_v5 = vpack.c.bf16 %v2603_v51, %v2602_v48  ;;  %v379_v48 = vand.u32 15, %v347_v32 }
 0x19a   : > { %v7472_v7 = vpop.permute.xlu0 %1548  ;;  %v2285_v53 = vpack.c.bf16 %v2262_v23, %v2261_v45  ;;  %v7483_v28 = vsel %vm9963_vm1, %v1471_v14, %v10154_v59  ;;  %vm444_vm8 = vcmp.ge.s32.totalorder %v378_v2, 1  ;;  %v1590_v14 = vadd.f32 %v7340_v10, %v6706_v49 }
 0x19b   : > { %10152 = vst [vmem:[#allocation26_spill] sm:$0xff] %v7462_v5  ;;  %5415 = vmatprep.mubr.bf16.mxu1 %v7462_v5  ;;  %1566 = vrot.lane.b32.xlu1 %v7322_v18, %s5860_s16  ;;  %vm707_vm9 = vcmp.lt.s32.totalorder %v379_v48, 15  ;;  %vm7499_vm15 = vmxor %vm444_vm8, %vm5868_vm2  ;;  %v1591_v49 = vadd.f32 %v7352_v38, %v6720_v9  ;;  %v10159_v38 = vrot.slane %v7373_v4, 1 }
 0x19c   : > { %2009 = vrot.lane.b32.xlu0 %v7468_v63, %s5864_s19  ;;  %2538 = vmatmul.mubr.bf16.gmra.mrb[32].mxu0 %v2285_v53  ;;  %vm7510_vm5 = vmxor %vm707_vm9, %vm5868_vm2  ;;  %v1751_v10 = vadd.f32 %v7357_v44, %v1590_v14 }
 0x19d   : > { %v7485_v29 = vpop.permute.xlu1 %1550  ;;  %2545 = vmatprep.mubr.bf16.mxu0 %v2302_v62  ;;  %vm543_vm3 = vmand %vm491_vm4, %vm7499_vm15  ;;  %v1752_v62 = vadd.f32 %v7369_v6, %v1591_v49  ;;  %v10160_v49 = vrot.slane %v5972_v3, 1 }
 0x19e   : > { %v1994_v19 = vpop.permute.xlu0 %1993  ;;  %v1847_v53 = vadd.f32 %v7405_v43, %v1751_v10  ;;  %vm806_vm6 = vmand %vm6349_vm11, %vm7510_vm5  ;;  %v575_v2 = vsel %vm543_vm3, 0.0, %v10087_v34 }
 0x19f   : > { %2011 = vrot.lane.b32.xlu1 %v7483_v28, %s5864_s19  ;;  %v1848_v32 = vadd.f32 %v7430_v57, %v1752_v62  ;;  %vm904_vm12 = vmand %vm6361_vm14, %vm7499_vm15  ;;  %v838_v48 = vsel %vm806_vm6, 0.0, %v10087_v34 }
 0x1a0   : > { %1725 = vrot.lane.b32.xlu0 %v7402_v52, %s5861_s17  ;;  %v7506_v52 = vld [vmem:[%s5966_s13 + $0xe8] sm:$0xff]  ;;  %v1943_v59 = vadd.f32 %v1898_v47, %v1847_v53  ;;  %vm1004_vm8 = vmand %vm6383_vm7, %vm7510_vm5  ;;  %v936_v3 = vsel %vm904_vm12, 0.0, %v575_v2 }
 0x1a1   : > { %v1996_v51 = vpop.permute.xlu1 %1995  ;;  %v1633_v16 = vrot.slane %v7506_v52, 1  ;;  %v1944_v57 = vadd.f32 %v1900_v41, %v1848_v32  ;;  %vm1166_vm9 = vmand %vm6413_vm10, %vm7499_vm15 }
 0x1a2   : > { %v7491_v40 = vpop.permute.xlu0 %1709  ;;  %v2039_v47 = vadd.f32 %v1994_v19, %v1943_v59  ;;  %vm1397_vm3 = vmand %vm9965_vm13, %vm7510_vm5  ;;  %v7573_v45 = vsel %vm1166_vm9, 0.0, %v936_v3 }
 0x1a3   : > { %1727 = vrot.lane.b32.xlu1 %v1640_v24, %s5861_s17  ;;  %v1639_v44 = vsel %vm9964_vm0, %v10159_v38, %v1633_v16  ;;  %v1638_v10 = vsel %vm9964_vm0, %v1633_v16, %v10160_v49  ;;  %v2040_v5 = vadd.f32 %v1996_v51, %v1944_v57  ;;  %v1036_v16 = vsel %vm1004_vm8, 0.0, %v838_v48  ;;  %10161 = vst [vmem:[#allocation27_spill] sm:$0xff] %v7573_v45 }
 0x1a4   : > { %2105 = vrot.lane.b32.xlu0 %v7373_v4, %s10033_s26  ;;  %v7576_v57 = vsel %vm1397_vm3, 0.0, %v1036_v16  ;;  %v316_v24 = vadd.s32 160, %v5960_v1  ;;  %v317_v49 = vadd.s32 168, %v5960_v1 }
 0x1a5   : > { %v7503_v23 = vpop.permute.xlu1 %1711  ;;  %10162 = vst [vmem:[#allocation28_spill] sm:$0xff] %v7576_v57 }
 0x1a6   : > { %v2090_v58 = vpop.permute.xlu0 %2089 }
 0x1a7   : > { %2107 = vrot.lane.b32.xlu1 %v7506_v52, %s10033_s26  ;;  %v2135_v41 = vadd.f32 %v2090_v58, %v2039_v47 }
 0x1a8   : > { %1821 = vrot.lane.b32.xlu0 %v7468_v63, %s5862_s10 }
 0x1a9   : > { %v2092_v9 = vpop.permute.xlu1 %2091 }
 0x1aa   : > { %v7536_v6 = vpop.permute.xlu0 %1805  ;;  %v2136_v51 = vadd.f32 %v2092_v9, %v2040_v5 }
 0x1ab   : > { %v5116_v43 = vpop.f32.mrb[4].mxu0  ;;  %1823 = vrot.lane.b32.xlu1 %v7483_v28, %s5862_s10 }
 0x1ac   : > { %2201 = vrot.lane.b32.xlu0 %v1639_v44, %s5866_s11  ;;  %v5117_v14 = vpop.f32.mrb[5].mxu0 }
 0x1ad   : > { %v5118_v62 = vadd.f32 %v5117_v14, %v5116_v43  ;;  %v5119_v53 = vpop.f32.mrb[6].mxu0  ;;  %v7555_v38 = vpop.permute.xlu1 %1807 }
 0x1ae   : > { %v2186_v19 = vpop.permute.xlu0 %2185  ;;  %v5120_v32 = vpop.f32.mrb[7].mxu0 }
 0x1af   : > { %v2484_v59 = vadd.f32 %v5118_v62, %v7424_v20  ;;  %v5121_v43 = vadd.f32 %v5120_v32, %v5119_v53  ;;  %2203 = vrot.lane.b32.xlu1 %v1638_v10, %s5866_s11  ;;  %v2231_v58 = vadd.f32 %v2186_v19, %v2135_v41  ;;  %v348_v19 = vand.u32 255, %v316_v24 }
 0x1b0   : > { %1917 = vrot.lane.b32.xlu0 %v1639_v44, %s5863_s20  ;;  %v2303_v32 = vpack.c.bf16 %v6955_v54, %v6864_v42  ;;  %v1592_v24 = vadd.f32 %v7472_v7, %v6824_v60  ;;  %v1593_v60 = vadd.f32 %v7485_v29, %v6838_v50 }
 0x1b1   : > { %v2487_v2 = vadd.f32 %v5121_v43, %v7424_v20  ;;  %v2188_v48 = vpop.permute.xlu1 %2187  ;;  %v2604_v62 = vmax.f32 %v2484_v59, 0.0  ;;  %v2263_v5 = vmul.f32 %v2231_v58, %v7573_v45  ;;  %v349_v43 = vand.u32 255, %v317_v49 }
 0x1b2   : > { %v2232_v47 = vadd.f32 %v2188_v48, %v2136_v51  ;;  %v1902_v14 = vpop.permute.xlu0 %1901  ;;  %v380_v58 = vand.u32 15, %v348_v19  ;;  %v1753_v7 = vadd.f32 %v7491_v40, %v1592_v24 }
 0x1b3   : > { %v2605_v53 = vmax.f32 %v2487_v2, 0.0  ;;  %1919 = vrot.lane.b32.xlu1 %v1638_v10, %s5863_s20  ;;  %v381_v42 = vand.u32 15, %v349_v43 }
 0x1b4   : > { %v2264_v9 = vmul.f32 %v2232_v47, %v7576_v57  ;;  %1568 = vrot.lane.b32.xlu0 %v7373_v4, %s5860_s16  ;;  %vm446_vm15 = vcmp.ge.s32.totalorder %v380_v58, 1  ;;  %v7607_v47 = vld [vmem:[%s5966_s13 + $0xf0] sm:$0xff] }
 0x1b5   : > { %v1904_v41 = vpop.permute.xlu1 %1903  ;;  %v7585_v3 = vpack.c.bf16 %v2605_v53, %v2604_v62  ;;  %vm709_vm5 = vcmp.lt.s32.totalorder %v381_v42, 15  ;;  %vm7612_vm6 = vmxor %vm446_vm15, %vm5868_vm2  ;;  %v7627_v53 = vld [vmem:[%s5966_s13 + $0xf8] sm:$0xff] }
 0x1b6   : > { %v7589_v16 = vpop.permute.xlu0 %1552  ;;  %v2286_v59 = vpack.c.bf16 %v2264_v9, %v2263_v5  ;;  %vm7619_vm12 = vmxor %vm709_vm5, %vm5868_vm2  ;;  %v1754_v5 = vadd.f32 %v7503_v23, %v1593_v60  ;;  %v1849_v9 = vadd.f32 %v7536_v6, %v1753_v7 }
 0x1b7   : > { %10163 = vst [vmem:[#allocation29_spill] sm:$0xff] %v7585_v3  ;;  %5416 = vmatmul.mubr.bf16.vlgmr.msra.gmra.mrb[0].mxu1 %v7585_v3  ;;  %1570 = vrot.lane.b32.xlu1 %v7506_v52, %s5860_s16  ;;  %vm545_vm8 = vmand %vm491_vm4, %vm7612_vm6 }
 0x1b8   : > { %2013 = vrot.lane.b32.xlu0 %v6320_v61, %s5864_s19  ;;  %2546 = vmatmul.mubr.bf16.gmra.mrb[36].mxu0 %v2286_v59  ;;  %vm808_vm9 = vmand %vm6349_vm11, %vm7619_vm12  ;;  %v1850_v29 = vadd.f32 %v7555_v38, %v1754_v5  ;;  %v1945_v40 = vadd.f32 %v1902_v14, %v1849_v9 }
 0x1b9   : > { %v7596_v51 = vpop.permute.xlu1 %1554  ;;  %2553 = vmatprep.mubr.bf16.mxu0 %v2303_v32  ;;  %vm906_vm3 = vmand %vm6361_vm14, %vm7612_vm6  ;;  %v840_v6 = vsel %vm808_vm9, 0.0, %v10087_v34 }
 0x1ba   : > { %v1998_v2 = vpop.permute.xlu0 %1997  ;;  %vm1006_vm15 = vmand %vm6383_vm7, %vm7619_vm12  ;;  %v1946_v38 = vadd.f32 %v1904_v41, %v1850_v29 }
 0x1bb   : > { %2015 = vrot.lane.b32.xlu1 %v6328_v0, %s5864_s19  ;;  %v2041_v14 = vadd.f32 %v1998_v2, %v1945_v40  ;;  %vm1168_vm5 = vmand %vm6413_vm10, %vm7612_vm6  ;;  %v1038_v60 = vsel %vm1006_vm15, 0.0, %v840_v6  ;;  %v318_v40 = vadd.s32 176, %v5960_v1  ;;  %v319_v6 = vadd.s32 184, %v5960_v1 }
 0x1bc   : > { %1729 = vrot.lane.b32.xlu0 %v1639_v44, %s5861_s17 }
 0x1bd   : > { %v2000_v54 = vpop.permute.xlu1 %1999 }
 0x1be   : > { %v7601_v48 = vpop.permute.xlu0 %1713 }
 0x1bf   : > { %1731 = vrot.lane.b32.xlu1 %v1638_v10, %s5861_s17 }
 0x1c0   : > { %2109 = vrot.lane.b32.xlu0 %v7607_v47, %s10033_s26 }
 0x1c1   : > { %v7616_v44 = vpop.permute.xlu1 %1715 }
 0x1c2   : > { %v2094_v10 = vpop.permute.xlu0 %2093 }
 0x1c3   : > { %2111 = vrot.lane.b32.xlu1 %v7627_v53, %s10033_s26  ;;  %v2137_v42 = vadd.f32 %v2094_v10, %v2041_v14 }
 0x1c4   : > { %1825 = vrot.lane.b32.xlu0 %v6320_v61, %s5862_s10  ;;  %v577_v61 = vsel %vm545_vm8, 0.0, %v10087_v34  ;;  %vm1399_vm8 = vmand %vm9965_vm13, %vm7619_vm12 }
 0x1c5   : > { %v2096_v50 = vpop.permute.xlu1 %2095  ;;  %v938_v41 = vsel %vm906_vm3, 0.0, %v577_v61  ;;  %v7683_v29 = vsel %vm1399_vm8, 0.0, %v1038_v60 }
 0x1c6   : > { %v7644_v19 = vpop.permute.xlu0 %1809  ;;  %v7680_v49 = vsel %vm1168_vm5, 0.0, %v938_v41  ;;  %10169 = vst [vmem:[#allocation31_spill] sm:$0xff] %v7683_v29 }
 0x1c7   : > { %v5122_v23 = vpop.f32.mrb[8].mxu0  ;;  %1827 = vrot.lane.b32.xlu1 %v6328_v0, %s5862_s10  ;;  %v2042_v0 = vadd.f32 %v2000_v54, %v1946_v38  ;;  %10168 = vst [vmem:[#allocation30_spill] sm:$0xff] %v7680_v49 }
 0x1c8   : > { %2205 = vrot.lane.b32.xlu0 %v5995_v12, %s5866_s11  ;;  %v5123_v32 = vpop.f32.mrb[9].mxu0 }
 0x1c9   : > { %v5124_v59 = vadd.f32 %v5123_v32, %v5122_v23  ;;  %v5125_v43 = vpop.f32.mrb[10].mxu0  ;;  %v7660_v58 = vpop.permute.xlu1 %1811  ;;  %v2138_v54 = vadd.f32 %v2096_v50, %v2042_v0  ;;  %v2304_v0 = vpack.c.bf16 %v7086_v55, %v7019_v35  ;;  %v5793_v35 = vld [vmem:[%s5966_s13 + $0x8] sm:$0xff] }
 0x1ca   : > { %v2190_v2 = vpop.permute.xlu0 %2189  ;;  %v5126_v24 = vpop.f32.mrb[11].mxu0  ;;  %v10171_v55 = vld [vmem:[#allocation5_spill] sm:$0xff] }
 0x1cb   : > { %v2492_v7 = vadd.f32 %v5124_v59, %v7424_v20  ;;  %v5127_v5 = vadd.f32 %v5126_v24, %v5125_v43  ;;  %2207 = vrot.lane.b32.xlu1 %v6004_v13, %s5866_s11  ;;  %v2233_v10 = vadd.f32 %v2190_v2, %v2137_v42  ;;  %v350_v43 = vand.u32 255, %v318_v40 }
 0x1cc   : > { %1921 = vrot.lane.b32.xlu0 %v5995_v12, %s5863_s20  ;;  %v351_v2 = vand.u32 255, %v319_v6  ;;  %v321_v40 = vadd.s32 200, %v5960_v1 }
 0x1cd   : > { %v2495_v9 = vadd.f32 %v5127_v5, %v7424_v20  ;;  %v2192_v62 = vpop.permute.xlu1 %2191  ;;  %v2606_v38 = vmax.f32 %v2492_v7, 0.0  ;;  %v2265_v12 = vmul.f32 %v2233_v10, %v7680_v49  ;;  %v382_v24 = vand.u32 15, %v350_v43 }
 0x1ce   : > { %v2234_v23 = vadd.f32 %v2192_v62, %v2138_v54  ;;  %v1906_v61 = vpop.permute.xlu0 %1905  ;;  %v383_v7 = vand.u32 15, %v351_v2  ;;  %v1594_v10 = vadd.f32 %v7589_v16, %v6972_v36 }
 0x1cf   : > { %v2607_v50 = vmax.f32 %v2495_v9, 0.0  ;;  %1923 = vrot.lane.b32.xlu1 %v6004_v13, %s5863_s20  ;;  %v5792_v13 = vld [vmem:[%s5966_s13] sm:$0xff]  ;;  %vm448_vm6 = vcmp.ge.s32.totalorder %v382_v24, 1  ;;  %s251_s13 = scalar_lea.vmem [#allocation2], %s250_s9 }
 0x1d0   : > { %v2266_v14 = vmul.f32 %v2234_v23, %v7683_v29  ;;  %2017 = vrot.lane.b32.xlu0 %v6017_v17, %s5864_s19  ;;  %vm711_vm12 = vcmp.lt.s32.totalorder %v383_v7, 15  ;;  %vm7717_vm9 = vmxor %vm448_vm6, %vm5868_vm2  ;;  %v1595_v23 = vadd.f32 %v7596_v51, %v6989_v22  ;;  %v1755_v6 = vadd.f32 %v7601_v48, %v1594_v10 }
 0x1d1   : > { %v1908_v32 = vpop.permute.xlu1 %1907  ;;  %v7693_v59 = vpack.c.bf16 %v2607_v50, %v2606_v38  ;;  %vm7724_vm3 = vmxor %vm711_vm12, %vm5868_vm2 }
 0x1d2   : > { %v7697_v42 = vpop.permute.xlu0 %1556  ;;  %v2287_v41 = vpack.c.bf16 %v2266_v14, %v2265_v12  ;;  %vm547_vm15 = vmand %vm491_vm4, %vm7717_vm9  ;;  %v1756_v36 = vadd.f32 %v7616_v44, %v1595_v23  ;;  %v1851_v16 = vadd.f32 %v7644_v19, %v1755_v6 }
 0x1d3   : > { %10170 = vst [vmem:[#allocation32_spill] sm:$0xff] %v7693_v59  ;;  %5419 = vmatprep.mubr.bf16.mxu1 %v7693_v59  ;;  %2019 = vrot.lane.b32.xlu1 %v6032_v21, %s5864_s19  ;;  %v10172_v21 = vld [vmem:[#allocation6_spill] sm:$0xff]  ;;  %vm810_vm5 = vmand %vm6349_vm11, %vm7724_vm3  ;;  %v579_v44 = vsel %vm547_vm15, 0.0, %v10087_v34 }
 0x1d4   : > { %2113 = vrot.lane.b32.xlu0 %v5792_v13, %s10033_s26  ;;  %2554 = vmatmul.mubr.bf16.gmra.mrb[40].mxu0 %v2287_v41  ;;  %v1852_v22 = vadd.f32 %v7660_v58, %v1756_v36  ;;  %v1947_v51 = vadd.f32 %v1906_v61, %v1851_v16  ;;  %vm908_vm8 = vmand %vm6361_vm14, %vm7717_vm9  ;;  %v842_v19 = vsel %vm810_vm5, 0.0, %v10087_v34 }
 0x1d5   : > { %v7704_v17 = vpop.permute.xlu1 %1558  ;;  %2561 = vmatprep.mubr.bf16.mxu0 %v2304_v0  ;;  %vm1008_vm6 = vmand %vm6383_vm7, %vm7724_vm3  ;;  %v940_v24 = vsel %vm908_vm8, 0.0, %v579_v44 }
 0x1d6   : > { %v2002_v60 = vpop.permute.xlu0 %2001  ;;  %v1948_v14 = vadd.f32 %v1908_v32, %v1852_v22  ;;  %vm1170_vm12 = vmand %vm6413_vm10, %vm7717_vm9 }
 0x1d7   : > { %2115 = vrot.lane.b32.xlu1 %v5793_v35, %s10033_s26  ;;  %v2043_v58 = vadd.f32 %v2002_v60, %v1947_v51  ;;  %vm1401_vm15 = vmand %vm9965_vm13, %vm7724_vm3  ;;  %v7763_v9 = vsel %vm1170_vm12, 0.0, %v940_v24 }
 0x1d8   : > { %2209 = vrot.lane.b32.xlu0 %v10171_v55, %s5866_s11  ;;  %v1040_v55 = vsel %vm1008_vm6, 0.0, %v842_v19  ;;  %10177 = vst [vmem:[#allocation5_spill] sm:$0xff] %v7763_v9 }
 0x1d9   : > { %v2004_v5 = vpop.permute.xlu1 %2003 }
 0x1da   : > { %v7710_v54 = vpop.permute.xlu0 %1717  ;;  %v2044_v2 = vadd.f32 %v2004_v5, %v1948_v14  ;;  %v7766_v5 = vsel %vm1401_vm15, 0.0, %v1040_v55 }
 0x1db   : > { %2211 = vrot.lane.b32.xlu1 %v10172_v21, %s5866_s11  ;;  %10178 = vst [vmem:[#allocation6_spill] sm:$0xff] %v7766_v5 }
 0x1dd   : > { %v7721_v62 = vpop.permute.xlu1 %1719 }
 0x1de   : > { %v2098_v38 = vpop.permute.xlu0 %2097 }
 0x1df   : > { %v2139_v13 = vadd.f32 %v2098_v38, %v2043_v58  ;;  %v320_v38 = vadd.s32 192, %v5960_v1  ;;  %v2305_v58 = vpack.c.bf16 %v7204_v8, %v7137_v46  ;;  %v1596_v46 = vadd.f32 %v7697_v42, %v7100_v33 }
 0x1e1   : > { %v2100_v50 = vpop.permute.xlu1 %2099  ;;  %v352_v14 = vand.u32 255, %v320_v38 }
 0x1e2   : > { %v7742_v48 = vpop.permute.xlu0 %1813  ;;  %v2140_v21 = vadd.f32 %v2100_v50, %v2044_v2 }
 0x1e3   : > { %v5128_v12 = vpop.f32.mrb[12].mxu0 }
 0x1e4   : > { %v5129_v61 = vpop.f32.mrb[13].mxu0 }
 0x1e5   : > { %v5130_v43 = vadd.f32 %v5129_v61, %v5128_v12  ;;  %v5131_v0 = vpop.f32.mrb[14].mxu0  ;;  %v1816_v41 = vpop.permute.xlu1 %1815 }
 0x1e6   : > { %v2194_v7 = vpop.permute.xlu0 %2193  ;;  %v5132_v35 = vpop.f32.mrb[15].mxu0 }
 0x1e7   : > { %v2500_v32 = vadd.f32 %v5130_v43, %v7424_v20  ;;  %v5133_v60 = vadd.f32 %v5132_v35, %v5131_v0  ;;  %v2235_v10 = vadd.f32 %v2194_v7, %v2139_v13  ;;  %v353_v0 = vand.u32 255, %v321_v40 }
 0x1e8   : > { %v384_v13 = vand.u32 15, %v352_v14 }
 0x1e9   : > { %v2503_v23 = vadd.f32 %v5133_v60, %v7424_v20  ;;  %v2196_v6 = vpop.permute.xlu1 %2195  ;;  %v2608_v22 = vmax.f32 %v2500_v32, 0.0  ;;  %v2267_v12 = vmul.f32 %v2235_v10, %v7763_v9  ;;  %v385_v7 = vand.u32 15, %v353_v0 }
 0x1ea   : > { %v2236_v36 = vadd.f32 %v2196_v6, %v2140_v21  ;;  %v1910_v16 = vpop.permute.xlu0 %1909  ;;  %vm450_vm9 = vcmp.ge.s32.totalorder %v384_v13, 1  ;;  %v1597_v21 = vadd.f32 %v7704_v17, %v7114_v11  ;;  %v1757_v10 = vadd.f32 %v7710_v54, %v1596_v46 }
 0x1eb   : > { %v2609_v51 = vmax.f32 %v2503_v23, 0.0  ;;  %vm713_vm3 = vcmp.lt.s32.totalorder %v385_v7, 15  ;;  %vm7786_vm5 = vmxor %vm450_vm9, %vm5868_vm2  ;;  %v323_v60 = vadd.s32 216, %v5960_v1 }
 0x1ec   : > { %v2268_v50 = vmul.f32 %v2236_v36, %v7766_v5  ;;  %vm7793_vm8 = vmxor %vm713_vm3, %vm5868_vm2  ;;  %v1758_v33 = vadd.f32 %v7721_v62, %v1597_v21  ;;  %v1853_v42 = vadd.f32 %v7742_v48, %v1757_v10  ;;  %v322_v10 = vadd.s32 208, %v5960_v1 }
 0x1ed   : > { %v1912_v44 = vpop.permute.xlu1 %1911  ;;  %v7772_v19 = vpack.c.bf16 %v2609_v51, %v2608_v22  ;;  %vm549_vm6 = vmand %vm491_vm4, %vm7786_vm5 }
 0x1ee   : > { %v7776_v61 = vpop.permute.xlu0 %1560  ;;  %v2288_v43 = vpack.c.bf16 %v2268_v50, %v2267_v12  ;;  %vm812_vm12 = vmand %vm6349_vm11, %vm7793_vm8  ;;  %v1854_v38 = vadd.f32 %v1816_v41, %v1758_v33  ;;  %v1949_v11 = vadd.f32 %v1910_v16, %v1853_v42  ;;  %v581_v62 = vsel %vm549_vm6, 0.0, %v10087_v34 }
 0x1ef   : > { %10179 = vst [vmem:[#allocation33_spill] sm:$0xff] %v7772_v19  ;;  %5420 = vmatmul.mubr.bf16.gmra.mrb[4].mxu1 %v7772_v19  ;;  %vm910_vm15 = vmand %vm6361_vm14, %vm7786_vm5  ;;  %v844_v48 = vsel %vm812_vm12, 0.0, %v10087_v34 }
 0x1f0   : > { %2562 = vmatmul.mubr.bf16.gmra.mrb[44].mxu0 %v2288_v43  ;;  %vm1010_vm9 = vmand %vm6383_vm7, %vm7793_vm8  ;;  %v1950_v36 = vadd.f32 %v1912_v44, %v1854_v38  ;;  %v942_v14 = vsel %vm910_vm15, 0.0, %v581_v62 }
 0x1f1   : > { %v7779_v2 = vpop.permute.xlu1 %1562  ;;  %2569 = vmatprep.mubr.bf16.mxu0 %v2305_v58  ;;  %vm1172_vm3 = vmand %vm6413_vm10, %vm7786_vm5  ;;  %v1042_v0 = vsel %vm1010_vm9, 0.0, %v844_v48  ;;  %v354_v48 = vand.u32 255, %v322_v10 }
 0x1f2   : > { %v2006_v24 = vpop.permute.xlu0 %2005  ;;  %vm1403_vm6 = vmand %vm9965_vm13, %vm7793_vm8  ;;  %v7831_v46 = vsel %vm1172_vm3, 0.0, %v942_v14 }
 0x1f3   : > { %v2045_v41 = vadd.f32 %v2006_v24, %v1949_v11  ;;  %10184 = vst [vmem:[#allocation34_spill] sm:$0xff] %v7831_v46 }
 0x1f5   : > { %v2008_v35 = vpop.permute.xlu1 %2007 }
 0x1f6   : > { %v7781_v55 = vpop.permute.xlu0 %1721  ;;  %v2046_v12 = vadd.f32 %v2008_v35, %v1950_v36  ;;  %v7834_v35 = vsel %vm1403_vm6, 0.0, %v1042_v0  ;;  %v2306_v36 = vpack.c.bf16 %v7322_v18, %v7255_v27  ;;  %v1598_v27 = vadd.f32 %v7776_v61, %v7218_v39 }
 0x1f7   : > { %10185 = vst [vmem:[#allocation35_spill] sm:$0xff] %v7834_v35 }
 0x1f9   : > { %v7790_v32 = vpop.permute.xlu1 %1723 }
 0x1fa   : > { %v2102_v23 = vpop.permute.xlu0 %2101 }
 0x1fb   : > { %v2141_v50 = vadd.f32 %v2102_v23, %v2045_v41 }
 0x1fd   : > { %v2104_v6 = vpop.permute.xlu1 %2103 }
 0x1fe   : > { %v7810_v17 = vpop.permute.xlu0 %1817  ;;  %v2142_v24 = vadd.f32 %v2104_v6, %v2046_v12  ;;  %v386_v12 = vand.u32 15, %v354_v48 }
 0x1ff   : > { %v5134_v54 = vpop.f32.mrb[16].mxu0 }
 0x200   : > { %v5135_v16 = vpop.f32.mrb[17].mxu0  ;;  %vm452_vm5 = vcmp.ge.s32.totalorder %v386_v12, 1 }
 0x201   : > { %v5136_v40 = vadd.f32 %v5135_v16, %v5134_v54  ;;  %v5137_v22 = vpop.f32.mrb[18].mxu0  ;;  %v1820_v51 = vpop.permute.xlu1 %1819  ;;  %vm7854_vm12 = vmxor %vm452_vm5, %vm5868_vm2 }
 0x202   : > { %v2198_v58 = vpop.permute.xlu0 %2197  ;;  %v5138_v43 = vpop.f32.mrb[19].mxu0  ;;  %vm551_vm9 = vmand %vm491_vm4, %vm7854_vm12 }
 0x203   : > { %v2508_v44 = vadd.f32 %v5136_v40, %v7424_v20  ;;  %v5139_v13 = vadd.f32 %v5138_v43, %v5137_v22  ;;  %v2237_v7 = vadd.f32 %v2198_v58, %v2141_v50  ;;  %v355_v40 = vand.u32 255, %v323_v60  ;;  %vm912_vm6 = vmand %vm6361_vm14, %vm7854_vm12 }
 0x205   : > { %v2511_v8 = vadd.f32 %v5139_v13, %v7424_v20  ;;  %v2200_v21 = vpop.permute.xlu1 %2199  ;;  %v2610_v42 = vmax.f32 %v2508_v44, 0.0  ;;  %v2269_v11 = vmul.f32 %v2237_v7, %v7831_v46  ;;  %v387_v14 = vand.u32 15, %v355_v40  ;;  %v10191_v13 = vld [vmem:[#allocation21_spill] sm:$0xff] }
 0x206   : > { %v2238_v23 = vadd.f32 %v2200_v21, %v2142_v24  ;;  %v1914_v33 = vpop.permute.xlu0 %1913  ;;  %v1599_v24 = vadd.f32 %v7779_v2, %v10191_v13  ;;  %v1759_v7 = vadd.f32 %v7781_v55, %v1598_v27  ;;  %v325_v44 = vadd.s32 232, %v5960_v1 }
 0x207   : > { %v2611_v38 = vmax.f32 %v2511_v8, 0.0  ;;  %vm715_vm8 = vcmp.lt.s32.totalorder %v387_v14, 15 }
 0x208   : > { %v2270_v6 = vmul.f32 %v2238_v23, %v7834_v35  ;;  %vm7861_vm15 = vmxor %vm715_vm8, %vm5868_vm2  ;;  %v1760_v39 = vadd.f32 %v7790_v32, %v1599_v24  ;;  %v1855_v61 = vadd.f32 %v7810_v17, %v1759_v7  ;;  %v583_v32 = vsel %vm551_vm9, 0.0, %v10087_v34 }
 0x209   : > { %v1916_v54 = vpop.permute.xlu1 %1915  ;;  %v7840_v62 = vpack.c.bf16 %v2611_v38, %v2610_v42  ;;  %vm814_vm3 = vmand %vm6349_vm11, %vm7861_vm15  ;;  %v324_v7 = vadd.s32 224, %v5960_v1 }
 0x20a   : > { %v7844_v41 = vpop.permute.xlu0 %1564  ;;  %v2289_v16 = vpack.c.bf16 %v2270_v6, %v2269_v11  ;;  %v1856_v10 = vadd.f32 %v1820_v51, %v1760_v39  ;;  %v1951_v2 = vadd.f32 %v1914_v33, %v1855_v61  ;;  %v846_v17 = vsel %vm814_vm3, 0.0, %v10087_v34  ;;  %vm1012_vm5 = vmand %vm6383_vm7, %vm7861_vm15 }
 0x20b   : > { %10186 = vst [vmem:[#allocation36_spill] sm:$0xff] %v7840_v62  ;;  %5423 = vmatprep.mubr.bf16.mxu1 %v7840_v62  ;;  %vm1174_vm8 = vmand %vm6413_vm10, %vm7854_vm12  ;;  %v1044_v12 = vsel %vm1012_vm5, 0.0, %v846_v17  ;;  %v356_v17 = vand.u32 255, %v324_v7  ;;  %v10200_v7 = vld [vmem:[#allocation25_spill] sm:$0xff] }
 0x20c   : > { %2570 = vmatmul.mubr.bf16.gmra.mrb[48].mxu0 %v2289_v16  ;;  %v1952_v60 = vadd.f32 %v1916_v54, %v1856_v10  ;;  %vm1405_vm9 = vmand %vm9965_vm13, %vm7861_vm15 }
 0x20d   : > { %v7847_v22 = vpop.permute.xlu1 %1566  ;;  %2577 = vmatprep.mubr.bf16.mxu0 %v2306_v36  ;;  %v944_v36 = vsel %vm912_vm6, 0.0, %v583_v32 }
 0x20e   : > { %v2010_v50 = vpop.permute.xlu0 %2009  ;;  %v7899_v18 = vsel %vm1174_vm8, 0.0, %v944_v36 }
 0x20f   : > { %v2047_v51 = vadd.f32 %v2010_v50, %v1951_v2  ;;  %10192 = vst [vmem:[#allocation21_spill] sm:$0xff] %v7899_v18 }
 0x211   : > { %v2012_v58 = vpop.permute.xlu1 %2011 }
 0x212   : > { %v7849_v43 = vpop.permute.xlu0 %1725  ;;  %v2048_v6 = vadd.f32 %v2012_v58, %v1952_v60  ;;  %v7902_v58 = vsel %vm1405_vm9, 0.0, %v1044_v12  ;;  %v2307_v60 = vpack.c.bf16 %v7506_v52, %v7373_v4 }
 0x213   : > { %10193 = vst [vmem:[#allocation37_spill] sm:$0xff] %v7902_v58 }
 0x215   : > { %v7858_v0 = vpop.permute.xlu1 %1727 }
 0x216   : > { %v2106_v8 = vpop.permute.xlu0 %2105 }
 0x217   : > { %v2143_v48 = vadd.f32 %v2106_v8, %v2047_v51 }
 0x219   : > { %v2108_v21 = vpop.permute.xlu1 %2107 }
 0x21a   : > { %v7878_v23 = vpop.permute.xlu0 %1821  ;;  %v2144_v14 = vadd.f32 %v2108_v21, %v2048_v6  ;;  %v388_v6 = vand.u32 15, %v356_v17 }
 0x21b   : > { %v5140_v55 = vpop.f32.mrb[20].mxu0 }
 0x21c   : > { %v5141_v33 = vpop.f32.mrb[21].mxu0  ;;  %vm454_vm12 = vcmp.ge.s32.totalorder %v388_v6, 1 }
 0x21d   : > { %v5142_v42 = vadd.f32 %v5141_v33, %v5140_v55  ;;  %v5143_v38 = vpop.f32.mrb[22].mxu0  ;;  %v1824_v11 = vpop.permute.xlu1 %1823  ;;  %vm7924_vm3 = vmxor %vm454_vm12, %vm5868_vm2 }
 0x21e   : > { %v2202_v16 = vpop.permute.xlu0 %2201  ;;  %v5144_v40 = vpop.f32.mrb[23].mxu0  ;;  %vm553_vm5 = vmand %vm491_vm4, %vm7924_vm3 }
 0x21f   : > { %v2516_v54 = vadd.f32 %v5142_v42, %v7424_v20  ;;  %v5145_v50 = vadd.f32 %v5144_v40, %v5143_v38  ;;  %v2239_v27 = vadd.f32 %v2202_v16, %v2143_v48  ;;  %v357_v42 = vand.u32 255, %v325_v44  ;;  %vm914_vm9 = vmand %vm6361_vm14, %vm7924_vm3 }
 0x220   : > { %v326_v16 = vadd.s32 240, %v5960_v1  ;;  %v327_v40 = vadd.s32 248, %v5960_v1  ;;  %vm1176_vm1 = vmand %vm6413_vm10, %vm7924_vm3 }
 0x221   : > { %v2519_v13 = vadd.f32 %v5145_v50, %v7424_v20  ;;  %v2204_v24 = vpop.permute.xlu1 %2203  ;;  %v2612_v61 = vmax.f32 %v2516_v54, 0.0  ;;  %v2271_v2 = vmul.f32 %v2239_v27, %v7899_v18  ;;  %v389_v36 = vand.u32 15, %v357_v42  ;;  %v10195_v54 = vld [vmem:[#allocation24_spill] sm:$0xff] }
 0x222   : > { %v2240_v8 = vadd.f32 %v2204_v24, %v2144_v14  ;;  %v1918_v39 = vpop.permute.xlu0 %1917  ;;  %v358_v52 = vand.u32 255, %v326_v16  ;;  %v1600_v50 = vadd.f32 %v7844_v41, %v10195_v54  ;;  %v359_v27 = vand.u32 255, %v327_v40 }
 0x223   : > { %v2613_v10 = vmax.f32 %v2519_v13, 0.0  ;;  %vm717_vm15 = vcmp.lt.s32.totalorder %v389_v36, 15 }
 0x224   : > { %v2272_v21 = vmul.f32 %v2240_v8, %v7902_v58  ;;  %vm7931_vm6 = vmxor %vm717_vm15, %vm5868_vm2  ;;  %v1601_v8 = vadd.f32 %v7847_v22, %v10200_v7  ;;  %v1761_v44 = vadd.f32 %v7849_v43, %v1600_v50  ;;  %v390_v41 = vand.u32 15, %v358_v52 }
 0x225   : > { %v1920_v55 = vpop.permute.xlu1 %1919  ;;  %v7908_v32 = vpack.c.bf16 %v2613_v10, %v2612_v61  ;;  %vm816_vm8 = vmand %vm6349_vm11, %vm7931_vm6 }
 0x226   : > { %v7912_v51 = vpop.permute.xlu0 %1568  ;;  %v2290_v33 = vpack.c.bf16 %v2272_v21, %v2271_v2  ;;  %v1762_v10 = vadd.f32 %v7858_v0, %v1601_v8  ;;  %v1857_v2 = vadd.f32 %v7878_v23, %v1761_v44  ;;  %v391_v21 = vand.u32 15, %v359_v27  ;;  %vm1014_vm12 = vmand %vm6383_vm7, %vm7931_vm6 }
 0x227   : > { %10194 = vst [vmem:[#allocation38_spill] sm:$0xff] %v7908_v32  ;;  %5424 = vmatmul.mubr.bf16.gmra.mrb[8].mxu1 %v7908_v32  ;;  %v585_v0 = vsel %vm553_vm5, 0.0, %v10087_v34  ;;  %v848_v23 = vsel %vm816_vm8, 0.0, %v10087_v34  ;;  %vm456_vm15 = vcmp.ge.s32.totalorder %v390_v41, 1  ;;  %vm1407_vm5 = vmand %vm9965_vm13, %vm7931_vm6  ;;  %vm10217_vm6 = vcmp.lt.s32.totalorder %v5960_v1, 1 }
 0x228   : > { %2578 = vmatmul.mubr.bf16.gmra.mrb[52].mxu0 %v2290_v33  ;;  %v1858_v17 = vadd.f32 %v1824_v11, %v1762_v10  ;;  %v1953_v43 = vadd.f32 %v1918_v39, %v1857_v2  ;;  %vm719_vm0 = vcmp.lt.s32.totalorder %v391_v21, 15  ;;  %v1046_v50 = vsel %vm1014_vm12, 0.0, %v848_v23  ;;  %vm7978_vm8 = vmxor %vm456_vm15, %vm5868_vm2 }
 0x229   : > { %v7915_v38 = vpop.permute.xlu1 %1570  ;;  %2585 = vmatprep.mubr.bf16.mxu0 %v2307_v60  ;;  %vm7984_vm13 = vmxor %vm719_vm0, %vm5868_vm2  ;;  %v7996_v10 = vsel %vm1407_vm5, 0.0, %v1046_v50 }
 0x22a   : > { %v2014_v48 = vpop.permute.xlu0 %2013  ;;  %v1954_v42 = vadd.f32 %v1920_v55, %v1858_v17  ;;  %v946_v55 = vsel %vm914_vm9, 0.0, %v585_v0  ;;  %10206 = vst [vmem:[#allocation25_spill] sm:$0xff] %v7996_v10  ;;  %vm555_vm0 = vmand %vm491_vm4, %vm7978_vm8 }
 0x22b   : > { %v2049_v11 = vadd.f32 %v2014_v48, %v1953_v43  ;;  %v7993_v24 = vsel %vm1176_vm1, 0.0, %v946_v55  ;;  %vm818_vm2 = vmand %vm6349_vm11, %vm7984_vm13  ;;  %v587_v0 = vsel %vm555_vm0, 0.0, %v10087_v34  ;;  %vm1212_vm11 = vcmp.ge.s32.totalorder %v6312_v56, 96 }
 0x22c   : > { %10205 = vst [vmem:[#allocation24_spill] sm:$0xff] %v7993_v24  ;;  %vm916_vm1 = vmand %vm6361_vm14, %vm7978_vm8  ;;  %v850_v15 = vsel %vm818_vm2, 0.0, %v10087_v34  ;;  %vm1213_vm14 = vcmp.lt.s32.totalorder %v6312_v56, 112 }
 0x22d   : > { %v2016_v12 = vpop.permute.xlu1 %2015  ;;  %vm1016_vm4 = vmand %vm6383_vm7, %vm7984_vm13  ;;  %vm10208_vm13 = vcmp.ge.s32.totalorder %v6312_v56, 112 }
 0x22e   : > { %v7919_v4 = vpop.permute.xlu0 %1729  ;;  %v2050_v40 = vadd.f32 %v2016_v12, %v1954_v42  ;;  %v1048_v26 = vsel %vm1016_vm4, 0.0, %v850_v15  ;;  %vm1214_vm7 = vmand %vm1212_vm11, %vm1213_vm14 }
 0x22f   : > { %vm10210_vm3 = vmmov %vm10208_vm13 }
 0x230   : > { %vm10221_vm9 = vmmov %vm10217_vm6 }
 0x231   : > { %v7928_v13 = vpop.permute.xlu1 %1731  ;;  %vm10226_vm5 = vmmov %vm10217_vm6 }
 0x232   : > { %v2110_v61 = vpop.permute.xlu0 %2109  ;;  %vm10232_vm8 = vmmov %vm10226_vm5 }
 0x233   : > { %v2145_v52 = vadd.f32 %v2110_v61, %v2049_v11 }
 0x235   : > { %v2112_v22 = vpop.permute.xlu1 %2111 }
 0x236   : > { %v1826_v60 = vpop.permute.xlu0 %1825  ;;  %v2146_v44 = vadd.f32 %v2112_v22, %v2050_v40  ;;  %v1211_v40 = vsel %vm6413_vm10, 0.0, %v1048_v26 }
 0x237   : > { %v5146_v33 = vpop.f32.mrb[24].mxu0  ;;  %v1310_v27 = vsel %vm1214_vm7, 0.0, %v1211_v40 }
 0x238   : > { %v5147_v39 = vpop.f32.mrb[25].mxu0  ;;  %v8041_v8 = vsel %vm10210_vm3, 0.0, %v1310_v27 }
 0x239   : > { %v5148_v6 = vadd.f32 %v5147_v39, %v5146_v33  ;;  %v5149_v36 = vpop.f32.mrb[26].mxu0  ;;  %v1828_v16 = vpop.permute.xlu1 %1827  ;;  %10211 = vst [vmem:[#allocation41_spill] sm:$0xff] %v8041_v8 }
 0x23a   : > { %v2206_v48 = vpop.permute.xlu0 %2205  ;;  %v5150_v54 = vpop.f32.mrb[27].mxu0 }
 0x23b   : > { %v2524_v12 = vadd.f32 %v5148_v6, %v7424_v20  ;;  %v5151_v7 = vadd.f32 %v5150_v54, %v5149_v36  ;;  %v2241_v61 = vadd.f32 %v2206_v48, %v2145_v52  ;;  %v948_v6 = vsel %vm916_vm1, 0.0, %v587_v0  ;;  %vm10236_vm1 = vmmov %vm10226_vm5 }
 0x23c   : > { %vm10239_vm11 = vmmov %vm10236_vm1 }
 0x23d   : > { %v2527_v41 = vadd.f32 %v5151_v7, %v7424_v20  ;;  %v2208_v2 = vpop.permute.xlu1 %2207  ;;  %v2614_v14 = vmax.f32 %v2524_v12, 0.0  ;;  %v1602_v20 = vadd.f32 %v7912_v51, %v7468_v63  ;;  %v2273_v43 = vmul.f32 %v2241_v61, %v7993_v24  ;;  %vm10241_vm14 = vmmov %vm10236_vm1 }
 0x23e   : > { %v2242_v21 = vadd.f32 %v2208_v2, %v2146_v44  ;;  %v1922_v22 = vpop.permute.xlu0 %1921  ;;  %v2308_v63 = vpack.c.bf16 %v7627_v53, %v7607_v47  ;;  %v1603_v51 = vadd.f32 %v7915_v38, %v7483_v28 }
 0x23f   : > { %v2615_v17 = vmax.f32 %v2527_v41, 0.0  ;;  %v1763_v11 = vadd.f32 %v7919_v4, %v1602_v20  ;;  %v1210_v4 = vsel %vm6413_vm10, 0.0, %v948_v6  ;;  %vm10216_vm10 = vcmp.lt.s32.totalorder %v5960_v1, 7 }
 0x240   : > { %v2274_v33 = vmul.f32 %v2242_v21, %v7996_v10  ;;  %v1764_v34 = vadd.f32 %v7928_v13, %v1603_v51  ;;  %v1309_v54 = vsel %vm1214_vm7, 0.0, %v1210_v4  ;;  %vm10222_vm12 = vmmov %vm10216_vm10 }
 0x241   : > { %v1924_v23 = vpop.permute.xlu1 %1923  ;;  %v8015_v42 = vpack.c.bf16 %v2615_v17, %v2614_v14  ;;  %v1859_v36 = vadd.f32 %v1826_v60, %v1763_v11  ;;  %vm10224_vm15 = vmmov %vm10216_vm10 }
 0x242   : > { %v2018_v31 = vpop.permute.xlu0 %2017  ;;  %v2291_v39 = vpack.c.bf16 %v2274_v33, %v2273_v43  ;;  %v1860_v53 = vadd.f32 %v1828_v16, %v1764_v34  ;;  %v8037_v16 = vsel %vm10208_vm13, 0.0, %v1309_v54  ;;  %v8048_v43 = vld [vmem:[%s9920_s4] ss:$0 sm:$0xff]  ;;  %vm10234_vm0 = vmmov %vm10216_vm10 }
 0x243   : > { %10207 = vst [vmem:[#allocation39_spill] sm:$0xff] %v8015_v42  ;;  %5427 = vmatprep.mubr.bf16.mxu1 %v8015_v42  ;;  %v1955_v28 = vadd.f32 %v1922_v22, %v1859_v36  ;;  %10209 = vst [vmem:[#allocation40_spill] sm:$0xff] %v8037_v16 }
 0x244   : > { %2586 = vmatmul.mubr.bf16.gmra.mrb[56].mxu0 %v2291_v39  ;;  %v1956_v52 = vadd.f32 %v1924_v23, %v1860_v53  ;;  %vm10235_vm2 = vmmov %vm10234_vm0 }
 0x245   : > { %v2020_v47 = vpop.permute.xlu1 %2019  ;;  %2593 = vmatprep.mubr.bf16.mxu0 %v2308_v63  ;;  %v2051_v55 = vadd.f32 %v2018_v31, %v1955_v28  ;;  %vm10238_vm4 = vmmov %vm10234_vm0 }
 0x246   : > { %v2114_v38 = vpop.permute.xlu0 %2113  ;;  %v2052_v60 = vadd.f32 %v2020_v47, %v1956_v52  ;;  %vm10243_vm7 = vmmov %vm10234_vm0 }
 0x247   : > { %v2147_v48 = vadd.f32 %v2114_v38, %v2051_v55  ;;  %v8063_v38 = vld [vmem:[%s9920_s4 + $0x1] ss:$0 sm:$0xff]  ;;  %vm10251_vm13 = vmmov %vm10236_vm1 }
 0x248   : > { %vm10254_vm3 = vmmov %vm10234_vm0 }
 0x249   : > { %v2116_v13 = vpop.permute.xlu1 %2115 }
 0x24a   : > { %v2210_v50 = vpop.permute.xlu0 %2209  ;;  %v2148_v12 = vadd.f32 %v2116_v13, %v2052_v60 }
 0x24b   : > { %v2243_v7 = vadd.f32 %v2210_v50, %v2147_v48 }
 0x24d   : > { %v2212_v30 = vpop.permute.xlu1 %2211  ;;  %v2275_v61 = vmul.f32 %v2243_v7, %v8037_v16 }
 0x24e   : > { %v2244_v44 = vadd.f32 %v2212_v30, %v2148_v12 }
 0x250   : > { %v2276_v41 = vmul.f32 %v2244_v44, %v8041_v8 }
 0x252   : > { %v2292_v2 = vpack.c.bf16 %v2276_v41, %v2275_v61 }
 0x253   : > { %v5152_v21 = vpop.f32.mrb[28].mxu0 }
 0x254   : > { %v5153_v22 = vpop.f32.mrb[29].mxu0  ;;  %2594 = vmatmul.mubr.bf16.gmra.mrb[60].mxu0 %v2292_v2 }
 0x255   : > { %v5154_v14 = vadd.f32 %v5153_v22, %v5152_v21  ;;  %v5155_v17 = vpop.f32.mrb[30].mxu0 }
 0x256   : > { %v5156_v20 = vpop.f32.mrb[31].mxu0 }
 0x257   : > { %v2532_v56 = vadd.f32 %v8048_v43, %v5154_v14  ;;  %v5157_v33 = vadd.f32 %v5156_v20, %v5155_v17 }
 0x259   : > { %v2535_v0 = vadd.f32 %v8048_v43, %v5157_v33  ;;  %v2616_v23 = vmax.f32 %v2532_v56, 0.0 }
 0x25b   : > { %v2617_v15 = vmax.f32 %v2535_v0, 0.0 }
 0x25d   : > { %v8052_v63 = vpack.c.bf16 %v2617_v15, %v2616_v23 }
 0x25f   : > { %10212 = vst [vmem:[#allocation42_spill] sm:$0xff] %v8052_v63  ;;  %5428 = vmatmul.mubr.bf16.gmra.mrb[12].mxu1 %v8052_v63 }
 0x26f   : > { %v5158_v51 = vpop.f32.mrb[32].mxu0 }
 0x270   : > { %v5159_v11 = vpop.f32.mrb[33].mxu0 }
 0x271   : > { %v5160_v31 = vadd.f32 %v5159_v11, %v5158_v51  ;;  %v5161_v39 = vpop.f32.mrb[34].mxu0 }
 0x272   : > { %v5162_v6 = vpop.f32.mrb[35].mxu0 }
 0x273   : > { %v2540_v34 = vadd.f32 %v8048_v43, %v5160_v31  ;;  %v5163_v36 = vadd.f32 %v5162_v6, %v5161_v39 }
 0x275   : > { %v2543_v26 = vadd.f32 %v8048_v43, %v5163_v36  ;;  %v2618_v47 = vmax.f32 %v2540_v34, 0.0 }
 0x277   : > { %v2619_v53 = vmax.f32 %v2543_v26, 0.0 }
 0x279   : > { %v8057_v28 = vpack.c.bf16 %v2619_v53, %v2618_v47 }
 0x27b   : > { %10213 = vst [vmem:[#allocation43_spill] sm:$0xff] %v8057_v28  ;;  %5431 = vmatprep.mubr.bf16.mxu1 %v8057_v28 }
 0x28a   : > { %v5417_v4 = vpop.f32.mrb[0].mxu1 }
 0x28b   : > { %v2762_v40 = vadd.f32 %v5417_v4, %v8063_v38  ;;  %v5164_v52 = vpop.f32.mrb[36].mxu0  ;;  %v2753_v55 = vpop.f32.mrb[1].mxu1 }
 0x28c   : > { %v5165_v13 = vpop.f32.mrb[37].mxu0  ;;  %v5418_v60 = vpop.f32.mrb[2].mxu1  ;;  %v2754_v41 = vadd.f32 %v8063_v38, %v2753_v55 }
 0x28d   : > { %v8066_v48 = vmax.f32 %v2762_v40, 0.0  ;;  %v5166_v54 = vadd.f32 %v5165_v13, %v5164_v52  ;;  %v2765_v50 = vadd.f32 %v5418_v60, %v8063_v38  ;;  %v5167_v27 = vpop.f32.mrb[38].mxu0  ;;  %v2756_v12 = vpop.f32.mrb[3].mxu1 }
 0x28e   : > { %v5168_v7 = vpop.f32.mrb[39].mxu0  ;;  %v2757_v20 = vadd.f32 %v8063_v38, %v2756_v12  ;;  %v8097_v51 = vmax.f32 %v2754_v41, 0.0 }
 0x28f   : > { %10214 = vst [vmem:[#allocation44_spill] sm:$0xff] %v8066_v48  ;;  %v2548_v30 = vadd.f32 %v8048_v43, %v5166_v54  ;;  %v8070_v44 = vmax.f32 %v2765_v50, 0.0  ;;  %v5169_v61 = vadd.f32 %v5168_v7, %v5167_v27  ;;  %3521 = vrot.lane.b32.xlu0 %v8066_v48, %s10033_s26  ;;  %v3075_v2 = vrot.slane %v8066_v48, 1 }
 0x290   : > { %v2915_v14 = vrot.slane %v8066_v48, 7  ;;  %10218 = vst [vmem:[#allocation46_spill] sm:$0xff] %v8097_v51  ;;  %v8103_v31 = vmax.f32 %v2757_v20, 0.0  ;;  %v9966_v6 = vrot.slane %v8097_v51, 7  ;;  %v9967_v26 = vrot.slane %v8097_v51, 1 }
 0x291   : > { %10215 = vst [vmem:[#allocation45_spill] sm:$0xff] %v8070_v44  ;;  %v2551_v21 = vadd.f32 %v8048_v43, %v5169_v61  ;;  %3523 = vrot.lane.b32.xlu1 %v8070_v44, %s10033_s26  ;;  %v3076_v22 = vrot.slane %v8070_v44, 1  ;;  %v2916_v17 = vrot.slane %v8070_v44, 7  ;;  %v2620_v33 = vmax.f32 %v2548_v30, 0.0 }
 0x292   : > { %10220 = vst [vmem:[#allocation48_spill] sm:$0xff] %v8103_v31  ;;  %v2914_v39 = vrot.slane %v8103_v31, 7  ;;  %v3074_v34 = vrot.slane %v8103_v31, 1 }
 0x293   : > { %v2621_v0 = vmax.f32 %v2551_v21, 0.0  ;;  %2985 = vrot.lane.b32.xlu0 %v8066_v48, %s5860_s16  ;;  %v3133_v23 = vsel %vm10216_vm10, %v3075_v2, %v3076_v22  ;;  %v8095_v15 = vsel %vm10217_vm6, %v2915_v14, %v2916_v17  ;;  %vm10255_vm10 = vmmov %vm10234_vm0 }
 0x294   : > { %v8124_v36 = vsel %vm10221_vm9, %v9966_v6, %v2914_v39  ;;  %v8133_v47 = vsel %vm10222_vm12, %v9967_v26, %v3074_v34  ;;  %v8139_v40 = vsel %vm10224_vm15, %v3074_v34, %v3075_v2  ;;  %v8145_v60 = vsel %vm10226_vm5, %v2914_v39, %v2915_v14  ;;  %vm10257_vm6 = vmmov %vm10236_vm1 }
 0x295   : > { %2987 = vrot.lane.b32.xlu1 %v8070_v44, %s5860_s16  ;;  %v8101_v11 = vpack.c.bf16 %v2621_v0, %v2620_v33  ;;  %10223 = vst [vmem:[#allocation49_spill] sm:$0xff] %v8133_v47  ;;  %10225 = vst [vmem:[#allocation50_spill] sm:$0xff] %v8139_v40 }
 0x296   : > { %vm10259_vm9 = vmmov %vm10234_vm0 }
 0x297   : > { %10219 = vst [vmem:[#allocation47_spill] sm:$0xff] %v8101_v11  ;;  %2981 = vrot.lane.b32.xlu0 %v8097_v51, %s5860_s16  ;;  %5432 = vmatmul.mubr.bf16.gmra.mrb[16].mxu1 %v8101_v11  ;;  %vm10260_vm12 = vmmov %vm10236_vm1 }
 0x298   : > { %vm10262_vm15 = vmmov %vm10236_vm1 }
 0x299   : > { %2983 = vrot.lane.b32.xlu1 %v8103_v31, %s5860_s16  ;;  %vm10264_vm5 = vmmov %vm10234_vm0 }
 0x29b   : > { %3617 = vrot.lane.b32.xlu0 %v3133_v23, %s5866_s11 }
 0x29d   : > { %3427 = vrot.lane.b32.xlu1 %v8095_v15, %s5864_s19 }
 0x29f   : > { %3333 = vrot.lane.b32.xlu0 %v3133_v23, %s5863_s20 }
 0x2a1   : > { %3239 = vrot.lane.b32.xlu1 %v8095_v15, %s5862_s10 }
 0x2a3   : > { %3145 = vrot.lane.b32.xlu0 %v3133_v23, %s5861_s17 }
 0x2a5   : > { %3235 = vrot.lane.b32.xlu1 %v8124_v36, %s5862_s10 }
 0x2a7   : > { %3329 = vrot.lane.b32.xlu0 %v8133_v47, %s5863_s20  ;;  %v5170_v53 = vpop.f32.mrb[40].mxu0 }
 0x2a8   : > { %v5171_v4 = vpop.f32.mrb[41].mxu0 }
 0x2a9   : > { %v5172_v52 = vadd.f32 %v5171_v4, %v5170_v53  ;;  %3331 = vrot.lane.b32.xlu1 %v8139_v40, %s5863_s20  ;;  %v5173_v55 = vpop.f32.mrb[42].mxu0 }
 0x2aa   : > { %v5174_v13 = vpop.f32.mrb[43].mxu0 }
 0x2ab   : > { %v2556_v54 = vadd.f32 %v8048_v43, %v5172_v52  ;;  %v5175_v50 = vadd.f32 %v5174_v13, %v5173_v55  ;;  %3425 = vrot.lane.b32.xlu0 %v8145_v60, %s5864_s19 }
 0x2ad   : > { %v2559_v27 = vadd.f32 %v8048_v43, %v5175_v50  ;;  %3143 = vrot.lane.b32.xlu1 %v8139_v40, %s5861_s17  ;;  %v2622_v12 = vmax.f32 %v2556_v54, 0.0 }
 0x2af   : > { %v2623_v7 = vmax.f32 %v2559_v27, 0.0  ;;  %3141 = vrot.lane.b32.xlu0 %v8133_v47, %s5861_s17 }
 0x2b1   : > { %v8155_v30 = vpack.c.bf16 %v2623_v7, %v2622_v12 }
 0x2b3   : > { %10227 = vst [vmem:[#allocation51_spill] sm:$0xff] %v8155_v30  ;;  %3237 = vrot.lane.b32.xlu0 %v8145_v60, %s5862_s10  ;;  %5435 = vmatprep.mubr.bf16.mxu1 %v8155_v30 }
 0x2c2   : > { %v5421_v61 = vpop.f32.mrb[4].mxu1 }
 0x2c3   : > { %v2778_v41 = vadd.f32 %v5421_v61, %v8063_v38  ;;  %v5176_v2 = vpop.f32.mrb[44].mxu0  ;;  %v2769_v21 = vpop.f32.mrb[5].mxu1 }
 0x2c4   : > { %v2770_v14 = vadd.f32 %v8063_v38, %v2769_v21  ;;  %v5177_v20 = vpop.f32.mrb[45].mxu0  ;;  %v5422_v33 = vpop.f32.mrb[6].mxu1 }
 0x2c5   : > { %v8162_v0 = vmax.f32 %v2778_v41, 0.0  ;;  %v5178_v23 = vadd.f32 %v5177_v20, %v5176_v2  ;;  %v2781_v39 = vadd.f32 %v5422_v33, %v8063_v38  ;;  %v5179_v34 = vpop.f32.mrb[46].mxu0  ;;  %v2772_v53 = vpop.f32.mrb[7].mxu1 }
 0x2c6   : > { %v8165_v4 = vmax.f32 %v2770_v14, 0.0  ;;  %v2773_v52 = vadd.f32 %v8063_v38, %v2772_v53  ;;  %v5180_v55 = vpop.f32.mrb[47].mxu0 }
 0x2c7   : > { %10228 = vst [vmem:[#allocation52_spill] sm:$0xff] %v8162_v0  ;;  %v2564_v13 = vadd.f32 %v8048_v43, %v5178_v23  ;;  %v8169_v54 = vmax.f32 %v2781_v39, 0.0  ;;  %v5181_v50 = vadd.f32 %v5180_v55, %v5179_v34  ;;  %3529 = vrot.lane.b32.xlu0 %v8162_v0, %s10033_s26  ;;  %v3079_v27 = vrot.slane %v8162_v0, 1 }
 0x2c8   : > { %10229 = vst [vmem:[#allocation53_spill] sm:$0xff] %v8165_v4  ;;  %v8174_v12 = vmax.f32 %v2773_v52, 0.0  ;;  %v2917_v7 = vrot.slane %v8165_v4, 7  ;;  %v3077_v61 = vrot.slane %v8165_v4, 1  ;;  %v2919_v41 = vrot.slane %v8162_v0, 7 }
 0x2c9   : > { %10230 = vst [vmem:[#allocation54_spill] sm:$0xff] %v8169_v54  ;;  %v2624_v2 = vmax.f32 %v2564_v13, 0.0  ;;  %v2567_v21 = vadd.f32 %v8048_v43, %v5181_v50  ;;  %3531 = vrot.lane.b32.xlu1 %v8169_v54, %s10033_s26  ;;  %v9968_v14 = vrot.slane %v8169_v54, 1  ;;  %v9969_v20 = vrot.slane %v8169_v54, 7 }
 0x2ca   : > { %10231 = vst [vmem:[#allocation55_spill] sm:$0xff] %v8174_v12  ;;  %v8188_v33 = vsel %vm10232_vm8, %v2916_v17, %v2917_v7  ;;  %v3132_v23 = vsel %vm10234_vm0, %v3076_v22, %v3077_v61  ;;  %v3078_v39 = vrot.slane %v8174_v12, 1  ;;  %v2918_v34 = vrot.slane %v8174_v12, 7  ;;  %vm10273_vm8 = vmmov %vm10236_vm1 }
 0x2cb   : > { %10233 = vst [vmem:[#allocation56_spill] sm:$0xff] %v8188_v33  ;;  %v2625_v53 = vmax.f32 %v2567_v21, 0.0  ;;  %2993 = vrot.lane.b32.xlu0 %v8162_v0, %s5860_s16  ;;  %v3129_v52 = vsel %vm10235_vm2, %v3079_v27, %v9968_v14  ;;  %v8206_v17 = vsel %vm10236_vm1, %v2919_v41, %v9969_v20  ;;  %vm10278_vm2 = vmmov %vm10234_vm0 }
 0x2cc   : > { %10237 = vst [vmem:[#allocation57_spill] sm:$0xff] %v8206_v17  ;;  %v3131_v55 = vsel %vm10238_vm4, %v3077_v61, %v3078_v39  ;;  %v8214_v13 = vsel %vm10239_vm11, %v2917_v7, %v2918_v34  ;;  %v8218_v50 = vsel %vm10241_vm14, %v2918_v34, %v2919_v41  ;;  %v3130_v21 = vsel %vm10243_vm7, %v3078_v39, %v3079_v27  ;;  %vm10280_vm4 = vmmov %vm10234_vm0 }
 0x2cd   : > { %10240 = vst [vmem:[#allocation58_spill] sm:$0xff] %v8214_v13  ;;  %10242 = vst [vmem:[#allocation59_spill] sm:$0xff] %v8218_v50  ;;  %2995 = vrot.lane.b32.xlu1 %v8169_v54, %s5860_s16  ;;  %v8224_v56 = vpack.c.bf16 %v2625_v53, %v2624_v2 }
 0x2ce   : > { %vm10281_vm11 = vmmov %vm10236_vm1 }
 0x2cf   : > { %10244 = vst [vmem:[#allocation60_spill] sm:$0xff] %v8224_v56  ;;  %3525 = vrot.lane.b32.xlu0 %v8165_v4, %s10033_s26  ;;  %5436 = vmatmul.mubr.bf16.gmra.mrb[20].mxu1 %v8224_v56  ;;  %vm10282_vm14 = vmmov %vm10236_vm1 }
 0x2d0   : > { %vm10284_vm7 = vmmov %vm10234_vm0 }
 0x2d1   : > { %3527 = vrot.lane.b32.xlu1 %v8174_v12, %s10033_s26 }
 0x2d3   : > { %2989 = vrot.lane.b32.xlu0 %v8165_v4, %s5860_s16 }
 0x2d5   : > { %2991 = vrot.lane.b32.xlu1 %v8174_v12, %s5860_s16 }
 0x2d7   : > { %3429 = vrot.lane.b32.xlu0 %v8188_v33, %s5864_s19 }
 0x2d9   : > { %3619 = vrot.lane.b32.xlu1 %v3132_v23, %s5866_s11 }
 0x2db   : > { %3241 = vrot.lane.b32.xlu0 %v8188_v33, %s5862_s10 }
 0x2dd   : > { %3335 = vrot.lane.b32.xlu1 %v3132_v23, %s5863_s20 }
 0x2df   : > { %3625 = vrot.lane.b32.xlu0 %v3129_v52, %s5866_s11  ;;  %v5182_v27 = vpop.f32.mrb[48].mxu0 }
 0x2e0   : > { %v5183_v7 = vpop.f32.mrb[49].mxu0 }
 0x2e1   : > { %v5184_v61 = vadd.f32 %v5183_v7, %v5182_v27  ;;  %3147 = vrot.lane.b32.xlu1 %v3132_v23, %s5861_s17  ;;  %v5185_v41 = vpop.f32.mrb[50].mxu0 }
 0x2e2   : > { %v5186_v2 = vpop.f32.mrb[51].mxu0 }
 0x2e3   : > { %v2572_v39 = vadd.f32 %v8048_v43, %v5184_v61  ;;  %v5187_v34 = vadd.f32 %v5186_v2, %v5185_v41  ;;  %3341 = vrot.lane.b32.xlu0 %v3129_v52, %s5863_s20 }
 0x2e5   : > { %v2575_v53 = vadd.f32 %v8048_v43, %v5187_v34  ;;  %3435 = vrot.lane.b32.xlu1 %v8206_v17, %s5864_s19  ;;  %v2626_v22 = vmax.f32 %v2572_v39, 0.0 }
 0x2e7   : > { %v2627_v6 = vmax.f32 %v2575_v53, 0.0  ;;  %3153 = vrot.lane.b32.xlu0 %v3129_v52, %s5861_s17 }
 0x2e9   : > { %3247 = vrot.lane.b32.xlu1 %v8206_v17, %s5862_s10  ;;  %v8253_v23 = vpack.c.bf16 %v2627_v6, %v2626_v22 }
 0x2eb   : > { %10245 = vst [vmem:[#allocation61_spill] sm:$0xff] %v8253_v23  ;;  %3621 = vrot.lane.b32.xlu0 %v3131_v55, %s5866_s11  ;;  %5439 = vmatprep.mubr.bf16.mxu1 %v8253_v23 }
 0x2ed   : > { %3431 = vrot.lane.b32.xlu1 %v8214_v13, %s5864_s19 }
 0x2ef   : > { %3337 = vrot.lane.b32.xlu0 %v3131_v55, %s5863_s20 }
 0x2f1   : > { %3243 = vrot.lane.b32.xlu1 %v8214_v13, %s5862_s10 }
 0x2f3   : > { %3433 = vrot.lane.b32.xlu0 %v8218_v50, %s5864_s19 }
 0x2f5   : > { %3623 = vrot.lane.b32.xlu1 %v3130_v21, %s5866_s11 }
 0x2f7   : > { %3149 = vrot.lane.b32.xlu0 %v3131_v55, %s5861_s17 }
 0x2f9   : > { %3339 = vrot.lane.b32.xlu1 %v3130_v21, %s5863_s20 }
 0x2fa   : > { %v5425_v6 = vpop.f32.mrb[8].mxu1 }
 0x2fb   : > { %v2794_v52 = vadd.f32 %v5425_v6, %v8063_v38  ;;  %3245 = vrot.lane.b32.xlu0 %v8218_v50, %s5862_s10  ;;  %v5188_v22 = vpop.f32.mrb[52].mxu0  ;;  %v2785_v27 = vpop.f32.mrb[9].mxu1 }
 0x2fc   : > { %v2786_v7 = vadd.f32 %v8063_v38, %v2785_v27  ;;  %v5189_v61 = vpop.f32.mrb[53].mxu0  ;;  %v5426_v41 = vpop.f32.mrb[10].mxu1 }
 0x2fd   : > { %v8271_v2 = vmax.f32 %v2794_v52, 0.0  ;;  %v5190_v39 = vadd.f32 %v5189_v61, %v5188_v22  ;;  %v2797_v34 = vadd.f32 %v5426_v41, %v8063_v38  ;;  %v2788_v55 = vpop.f32.mrb[11].mxu1  ;;  %3151 = vrot.lane.b32.xlu1 %v3130_v21, %s5861_s17  ;;  %v5191_v53 = vpop.f32.mrb[54].mxu0 }
 0x2fe   : > { %v8275_v26 = vmax.f32 %v2786_v7, 0.0  ;;  %v2789_v6 = vadd.f32 %v8063_v38, %v2788_v55  ;;  %v5192_v14 = vpop.f32.mrb[55].mxu0 }
 0x2ff   : > { %10246 = vst [vmem:[#allocation62_spill] sm:$0xff] %v8271_v2  ;;  %v2580_v20 = vadd.f32 %v8048_v43, %v5190_v39  ;;  %v8279_v23 = vmax.f32 %v2797_v34, 0.0  ;;  %v5193_v27 = vadd.f32 %v5192_v14, %v5191_v53  ;;  %3537 = vrot.lane.b32.xlu0 %v8271_v2, %s10033_s26  ;;  %v3083_v52 = vrot.slane %v8271_v2, 1 }
 0x300   : > { %10247 = vst [vmem:[#allocation63_spill] sm:$0xff] %v8275_v26  ;;  %v8284_v22 = vmax.f32 %v2789_v6, 0.0  ;;  %v2921_v21 = vrot.slane %v8275_v26, 7  ;;  %v3081_v7 = vrot.slane %v8275_v26, 1  ;;  %v2923_v61 = vrot.slane %v8271_v2, 7 }
 0x301   : > { %10248 = vst [vmem:[#allocation64_spill] sm:$0xff] %v8279_v23  ;;  %v2628_v41 = vmax.f32 %v2580_v20, 0.0  ;;  %v2583_v55 = vadd.f32 %v8048_v43, %v5193_v27  ;;  %3539 = vrot.lane.b32.xlu1 %v8279_v23, %s10033_s26  ;;  %v9976_v14 = vrot.slane %v8279_v23, 1  ;;  %v10250_v34 = vrot.slane %v8169_v54, 7 }
 0x302   : > { %10249 = vst [vmem:[#allocation65_spill] sm:$0xff] %v8284_v22  ;;  %v10253_v6 = vrot.slane %v8169_v54, 1  ;;  %v3082_v27 = vrot.slane %v8284_v22, 1  ;;  %v2922_v56 = vrot.slane %v8284_v22, 7  ;;  %v10275_v5 = vrot.slane %v8279_v23, 1 }
 0x303   : > { %v8298_v53 = vsel %vm10251_vm13, %v10250_v34, %v2921_v21  ;;  %v2629_v30 = vmax.f32 %v2583_v55, 0.0  ;;  %3001 = vrot.lane.b32.xlu0 %v8271_v2, %s5860_s16  ;;  %v3125_v39 = vsel %vm10255_vm10, %v3083_v52, %v9976_v14  ;;  %v10256_v34 = vrot.slane %v8279_v23, 7  ;;  %vm10299_vm13 = vmmov %vm10236_vm1 }
 0x304   : > { %10252 = vst [vmem:[#allocation66_spill] sm:$0xff] %v8298_v53  ;;  %v3128_v20 = vsel %vm10254_vm3, %v10253_v6, %v3081_v7  ;;  %v3127_v55 = vsel %vm10259_vm9, %v3081_v7, %v3082_v27  ;;  %v8324_v28 = vsel %vm10260_vm12, %v2921_v21, %v2922_v56  ;;  %v8328_v63 = vsel %vm10262_vm15, %v2922_v56, %v2923_v61  ;;  %v8347_v56 = vpop.permute.xlu1 %3523  ;;  %vm10302_vm3 = vmmov %vm10234_vm0 }
 0x305   : > { %v8316_v11 = vsel %vm10257_vm6, %v2923_v61, %v10256_v34  ;;  %10261 = vst [vmem:[#allocation68_spill] sm:$0xff] %v8324_v28  ;;  %10263 = vst [vmem:[#allocation69_spill] sm:$0xff] %v8328_v63  ;;  %v8332_v14 = vsel %vm10264_vm5, %v3082_v27, %v3083_v52  ;;  %3003 = vrot.lane.b32.xlu1 %v8279_v23, %s5860_s16  ;;  %v8336_v34 = vpack.c.bf16 %v2629_v30, %v2628_v41  ;;  %v8351_v30 = vpop.permute.xlu0 %3521 }
 0x306   : > { %10258 = vst [vmem:[#allocation67_spill] sm:$0xff] %v8316_v11  ;;  %vm10304_vm10 = vmmov %vm10236_vm1 }
 0x307   : > { %10265 = vst [vmem:[#allocation70_spill] sm:$0xff] %v8336_v34  ;;  %3533 = vrot.lane.b32.xlu0 %v8275_v26, %s10033_s26  ;;  %5440 = vmatmul.mubr.bf16.gmra.mrb[24].mxu1 %v8336_v34  ;;  %vm10306_vm6 = vmmov %vm10234_vm0 }
 0x308   : > { %v8356_v52 = vpop.permute.xlu1 %2987  ;;  %vm10314_vm9 = vmmov %vm10236_vm1 }
 0x309   : > { %3535 = vrot.lane.b32.xlu1 %v8284_v22, %s10033_s26  ;;  %v8360_v21 = vpop.permute.xlu0 %2985  ;;  %vm10316_vm12 = vmmov %vm10234_vm0 }
 0x30a   : > { %vm10322_vm15 = vmmov %vm10236_vm1 }
 0x30b   : > { %2997 = vrot.lane.b32.xlu0 %v8275_v26, %s5860_s16  ;;  %vm10366_vm5 = vmmov %vm10234_vm0 }
 0x30c   : > { %v8364_v27 = vpop.permute.xlu1 %2983 }
 0x30d   : > { %2999 = vrot.lane.b32.xlu1 %v8284_v22, %s5860_s16  ;;  %v8367_v42 = vpop.permute.xlu0 %2981 }
 0x30f   : > { %3437 = vrot.lane.b32.xlu0 %v8298_v53, %s5864_s19 }
 0x310   : > { %v8374_v59 = vpop.permute.xlu1 %3427 }
 0x311   : > { %3627 = vrot.lane.b32.xlu1 %v3128_v20, %s5866_s11 }
 0x313   : > { %3249 = vrot.lane.b32.xlu0 %v8298_v53, %s5862_s10 }
 0x315   : > { %3343 = vrot.lane.b32.xlu1 %v3128_v20, %s5863_s20 }
 0x317   : > { %3633 = vrot.lane.b32.xlu0 %v3125_v39, %s5866_s11  ;;  %v5194_v61 = vpop.f32.mrb[56].mxu0 }
 0x318   : > { %v5195_v41 = vpop.f32.mrb[57].mxu0 }
 0x319   : > { %v5196_v7 = vadd.f32 %v5195_v41, %v5194_v61  ;;  %3155 = vrot.lane.b32.xlu1 %v3128_v20, %s5861_s17  ;;  %v5197_v6 = vpop.f32.mrb[58].mxu0  ;;  %v8377_v20 = vpop.permute.xlu0 %3617 }
 0x31a   : > { %v5198_v34 = vpop.f32.mrb[59].mxu0 }
 0x31b   : > { %v2588_v32 = vadd.f32 %v8048_v43, %v5196_v7  ;;  %v5199_v62 = vadd.f32 %v5198_v34, %v5197_v6  ;;  %3349 = vrot.lane.b32.xlu0 %v3125_v39, %s5863_s20 }
 0x31d   : > { %v2591_v19 = vadd.f32 %v8048_v43, %v5199_v62  ;;  %3443 = vrot.lane.b32.xlu1 %v8316_v11, %s5864_s19  ;;  %v2630_v3 = vmax.f32 %v2588_v32, 0.0  ;;  %v8385_v62 = vpop.permute.xlu1 %3239  ;;  %v8389_v32 = vpop.permute.xlu0 %3333 }
 0x31f   : > { %v2631_v61 = vmax.f32 %v2591_v19, 0.0  ;;  %3161 = vrot.lane.b32.xlu0 %v3125_v39, %s5861_s17 }
 0x321   : > { %3255 = vrot.lane.b32.xlu1 %v8316_v11, %s5862_s10  ;;  %v8381_v7 = vpack.c.bf16 %v2631_v61, %v2630_v3  ;;  %v8394_v41 = vpop.permute.xlu1 %3235  ;;  %v8399_v16 = vpop.permute.xlu0 %3145 }
 0x323   : > { %10266 = vst [vmem:[#allocation71_spill] sm:$0xff] %v8381_v7  ;;  %3629 = vrot.lane.b32.xlu0 %v3127_v55, %s5866_s11  ;;  %5443 = vmatprep.mubr.bf16.mxu1 %v8381_v7 }
 0x325   : > { %3439 = vrot.lane.b32.xlu1 %v8324_v28, %s5864_s19  ;;  %v8405_v24 = vpop.permute.xlu1 %3331  ;;  %v8413_v10 = vpop.permute.xlu0 %3329 }
 0x327   : > { %3345 = vrot.lane.b32.xlu0 %v3127_v55, %s5863_s20  ;;  %v5200_v19 = vpop.f32.mrb[60].mxu0 }
 0x328   : > { %v5201_v39 = vpop.f32.mrb[61].mxu0 }
 0x329   : > { %v5202_v6 = vadd.f32 %v5201_v39, %v5200_v19  ;;  %3251 = vrot.lane.b32.xlu1 %v8324_v28, %s5862_s10  ;;  %v5203_v3 = vpop.f32.mrb[62].mxu0  ;;  %v8428_v58 = vpop.permute.xlu1 %3143 }
 0x32a   : > { %v5204_v34 = vpop.f32.mrb[63].mxu0 }
 0x32b   : > { %v2596_v61 = vadd.f32 %v8048_v43, %v5202_v6  ;;  %v5205_v7 = vadd.f32 %v5204_v34, %v5203_v3  ;;  %3441 = vrot.lane.b32.xlu0 %v8328_v63, %s5864_s19  ;;  %v3761_v34 = vpack.c.bf16 %v8103_v31, %v8097_v51 }
 0x32d   : > { %v2599_v8 = vadd.f32 %v8048_v43, %v5205_v7  ;;  %3631 = vrot.lane.b32.xlu1 %v8332_v14, %s5866_s11  ;;  %v2632_v19 = vmax.f32 %v2596_v61, 0.0 }
 0x32f   : > { %v2633_v39 = vmax.f32 %v2599_v8, 0.0  ;;  %3157 = vrot.lane.b32.xlu0 %v3127_v55, %s5861_s17 }
 0x331   : > { %3347 = vrot.lane.b32.xlu1 %v8332_v14, %s5863_s20  ;;  %v8409_v6 = vpack.c.bf16 %v2633_v39, %v2632_v19 }
 0x332   : > { %v5429_v3 = vpop.f32.mrb[12].mxu1 }
 0x333   : > { %10267 = vst [vmem:[#allocation72_spill] sm:$0xff] %v8409_v6  ;;  %v2810_v43 = vadd.f32 %v5429_v3, %v8063_v38  ;;  %3253 = vrot.lane.b32.xlu0 %v8328_v63, %s5862_s10  ;;  %v2801_v8 = vpop.f32.mrb[13].mxu1  ;;  %5444 = vmatmul.mubr.bf16.gmra.mrb[28].mxu1 %v8409_v6  ;;  %v10272_v6 = vrot.slane %v8279_v23, 7 }
 0x334   : > { %v2802_v55 = vadd.f32 %v8063_v38, %v2801_v8  ;;  %v5430_v7 = vpop.f32.mrb[14].mxu1  ;;  %3941 = vmatprep.mubr.bf16.mxu1 %v3761_v34 }
 0x335   : > { %v8420_v61 = vmax.f32 %v2810_v43, 0.0  ;;  %v2813_v19 = vadd.f32 %v5430_v7, %v8063_v38  ;;  %v2804_v39 = vpop.f32.mrb[15].mxu1  ;;  %3159 = vrot.lane.b32.xlu1 %v8332_v14, %s5861_s17  ;;  %v8439_v14 = vpop.permute.xlu0 %3425 }
 0x336   : > { %v8425_v18 = vmax.f32 %v2802_v55, 0.0  ;;  %v2805_v3 = vadd.f32 %v8063_v38, %v2804_v39 }
 0x337   : > { %10268 = vst [vmem:[#allocation73_spill] sm:$0xff] %v8420_v61  ;;  %v8430_v46 = vmax.f32 %v2813_v19, 0.0  ;;  %3545 = vrot.lane.b32.xlu0 %v8420_v61, %s10033_s26  ;;  %v3087_v7 = vrot.slane %v8420_v61, 1  ;;  %v2927_v19 = vrot.slane %v8420_v61, 7 }
 0x338   : > { %10269 = vst [vmem:[#allocation74_spill] sm:$0xff] %v8425_v18  ;;  %v8434_v34 = vmax.f32 %v2805_v3, 0.0  ;;  %v2925_v43 = vrot.slane %v8425_v18, 7  ;;  %v3085_v8 = vrot.slane %v8425_v18, 1 }
 0x339   : > { %10270 = vst [vmem:[#allocation75_spill] sm:$0xff] %v8430_v46  ;;  %3547 = vrot.lane.b32.xlu1 %v8430_v46, %s10033_s26  ;;  %v10277_v3 = vrot.slane %v8430_v46, 1  ;;  %v10279_v45 = vrot.slane %v8430_v46, 7  ;;  %v10301_v12 = vrot.slane %v8430_v46, 1 }
 0x33a   : > { %10271 = vst [vmem:[#allocation76_spill] sm:$0xff] %v8434_v34  ;;  %v8452_v35 = vsel %vm10273_vm8, %v10272_v6, %v2925_v43  ;;  %v3124_v9 = vsel %vm10234_vm0, %v10275_v5, %v3085_v8  ;;  %v3086_v55 = vrot.slane %v8434_v34, 1  ;;  %v2926_v57 = vrot.slane %v8434_v34, 7  ;;  %vm10369_vm8 = vmmov %vm10234_vm0 }
 0x33b   : > { %10274 = vst [vmem:[#allocation77_spill] sm:$0xff] %v8452_v35  ;;  %3541 = vrot.lane.b32.xlu0 %v8425_v18, %s10033_s26  ;;  %v8462_v39 = vpop.permute.xlu1 %3531  ;;  %v3121_v6 = vsel %vm10278_vm2, %v3087_v7, %v10277_v3  ;;  %v8472_v47 = vsel %vm10236_vm1, %v2927_v19, %v10279_v45  ;;  %v8490_v45 = vpop.permute.xlu0 %3141  ;;  %vm10373_vm0 = vmmov %vm10236_vm1 }
 0x33c   : > { %10276 = vst [vmem:[#allocation78_spill] sm:$0xff] %v8462_v39  ;;  %v3123_v40 = vsel %vm10280_vm4, %v3085_v8, %v3086_v55  ;;  %v8480_v31 = vsel %vm10281_vm11, %v2926_v57, %v2927_v19  ;;  %v8484_v49 = vsel %vm10282_vm14, %v2925_v43, %v2926_v57  ;;  %v3122_v3 = vsel %vm10284_vm7, %v3086_v55, %v3087_v7  ;;  %vm10377_vm1 = vmmov %vm10278_vm2 }
 0x33d   : > { %10283 = vst [vmem:[#allocation79_spill] sm:$0xff] %v8484_v49  ;;  %3543 = vrot.lane.b32.xlu1 %v8434_v34, %s10033_s26  ;;  %vm10381_vm4 = vmmov %vm10373_vm0 }
 0x33e   : > { %vm10386_vm11 = vmmov %vm10373_vm0 }
 0x33f   : > { %3005 = vrot.lane.b32.xlu0 %v8425_v18, %s5860_s16  ;;  %v8494_v8 = vpop.permute.xlu1 %2995  ;;  %v8500_v57 = vpop.permute.xlu0 %3237  ;;  %vm10393_vm14 = vmmov %vm10377_vm1 }
 0x340   : > { %10285 = vst [vmem:[#allocation80_spill] sm:$0xff] %v8494_v8  ;;  %vm10396_vm7 = vmmov %vm10377_vm1 }
 0x341   : > { %3007 = vrot.lane.b32.xlu1 %v8434_v34, %s5860_s16 }
 0x343   : > { %3445 = vrot.lane.b32.xlu0 %v8452_v35, %s5864_s19  ;;  %v8502_v43 = vpop.permute.xlu1 %3527  ;;  %v8507_v7 = vpop.permute.xlu0 %3529 }
 0x344   : > { %10286 = vst [vmem:[#allocation81_spill] sm:$0xff] %v8502_v43  ;;  %10287 = vst [vmem:[#allocation82_spill] sm:$0xff] %v8507_v7 }
 0x345   : > { %3635 = vrot.lane.b32.xlu1 %v3124_v9, %s5866_s11 }
 0x347   : > { %3257 = vrot.lane.b32.xlu0 %v8452_v35, %s5862_s10  ;;  %v8510_v55 = vpop.permute.xlu1 %2991  ;;  %v8514_v19 = vpop.permute.xlu0 %2993 }
 0x348   : > { %10288 = vst [vmem:[#allocation83_spill] sm:$0xff] %v8510_v55  ;;  %10289 = vst [vmem:[#allocation84_spill] sm:$0xff] %v8514_v19 }
 0x349   : > { %3351 = vrot.lane.b32.xlu1 %v3124_v9, %s5863_s20 }
 0x34b   : > { %3641 = vrot.lane.b32.xlu0 %v3121_v6, %s5866_s11  ;;  %v8517_v5 = vpop.permute.xlu1 %3619  ;;  %v8522_v29 = vpop.permute.xlu0 %3525 }
 0x34c   : > { %10290 = vst [vmem:[#allocation85_spill] sm:$0xff] %v8522_v29 }
 0x34d   : > { %3163 = vrot.lane.b32.xlu1 %v3124_v9, %s5861_s17 }
 0x34f   : > { %3637 = vrot.lane.b32.xlu0 %v3123_v40, %s5866_s11  ;;  %v8526_v18 = vpop.permute.xlu1 %3335  ;;  %v8532_v9 = vpop.permute.xlu0 %2989 }
 0x350   : > { %10291 = vst [vmem:[#allocation86_spill] sm:$0xff] %v8532_v9 }
 0x351   : > { %3451 = vrot.lane.b32.xlu1 %v8472_v47, %s5864_s19 }
 0x353   : > { %3353 = vrot.lane.b32.xlu0 %v3123_v40, %s5863_s20  ;;  %v8535_v34 = vpop.permute.xlu1 %3147  ;;  %v8541_v35 = vpop.permute.xlu0 %3429 }
 0x355   : > { %3263 = vrot.lane.b32.xlu1 %v8472_v47, %s5862_s10 }
 0x357   : > { %3449 = vrot.lane.b32.xlu0 %v8480_v31, %s5864_s19  ;;  %v8544_v2 = vpop.permute.xlu1 %3435  ;;  %v8548_v23 = vpop.permute.xlu0 %3241 }
 0x358   : > { %10292 = vst [vmem:[#allocation87_spill] sm:$0xff] %v8544_v2  ;;  %10293 = vst [vmem:[#allocation88_spill] sm:$0xff] %v8548_v23 }
 0x359   : > { %3447 = vrot.lane.b32.xlu1 %v8484_v49, %s5864_s19 }
 0x35b   : > { %3165 = vrot.lane.b32.xlu0 %v3123_v40, %s5861_s17  ;;  %v8552_v40 = vpop.permute.xlu1 %3247  ;;  %v8557_v11 = vpop.permute.xlu0 %3625 }
 0x35c   : > { %10294 = vst [vmem:[#allocation89_spill] sm:$0xff] %v8552_v40  ;;  %10295 = vst [vmem:[#allocation90_spill] sm:$0xff] %v8557_v11 }
 0x35d   : > { %3259 = vrot.lane.b32.xlu1 %v8484_v49, %s5862_s10 }
 0x35f   : > { %3261 = vrot.lane.b32.xlu0 %v8480_v31, %s5862_s10  ;;  %v8564_v53 = vpop.permute.xlu1 %3431  ;;  %v8582_v11 = vpop.permute.xlu0 %3341 }
 0x360   : > { %10303 = vst [vmem:[#allocation94_spill] sm:$0xff] %v8582_v11 }
 0x361   : > { %3639 = vrot.lane.b32.xlu1 %v3122_v3, %s5866_s11 }
 0x363   : > { %3357 = vrot.lane.b32.xlu0 %v3121_v6, %s5863_s20  ;;  %v8593_v19 = vpop.permute.xlu1 %3243  ;;  %v8600_v11 = vpop.permute.xlu0 %3153 }
 0x364   : > { %10307 = vst [vmem:[#allocation96_spill] sm:$0xff] %v8600_v11 }
 0x365   : > { %3355 = vrot.lane.b32.xlu1 %v3122_v3, %s5863_s20 }
 0x367   : > { %3009 = vrot.lane.b32.xlu0 %v8420_v61, %s5860_s16  ;;  %v8602_v50 = vpop.permute.xlu1 %3623 }
 0x368   : > { %10308 = vst [vmem:[#allocation97_spill] sm:$0xff] %v8602_v50  ;;  %v5749_v50 = vld [vmem:[%s9918_s2 + $0x40] sm:$0xff]  }
 0x369   : > { %3167 = vrot.lane.b32.xlu1 %v3122_v3, %s5861_s17  ;;  %5230 = vmatprep.subr.bf16.mxu1 %v5749_v50 }
 0x36a   : > { %v5433_v49 = vpop.f32.mrb[16].mxu1 }
 0x36b   : > { %3169 = vrot.lane.b32.xlu0 %v3121_v6, %s5861_s17  ;;  %v2817_v26 = vpop.f32.mrb[17].mxu1 }
 0x36c   : > { %v2818_v22 = vadd.f32 %v8063_v38, %v2817_v26  ;;  %v5434_v63 = vpop.f32.mrb[18].mxu1  ;;  %v10298_v26 = vrot.slane %v8430_v46, 7 }
 0x36d   : > { %v2820_v0 = vpop.f32.mrb[19].mxu1  ;;  %3011 = vrot.lane.b32.xlu1 %v8430_v46, %s5860_s16  ;;  %v2829_v17 = vadd.f32 %v5434_v63, %v8063_v38 }
 0x36e   : > { %v8561_v54 = vmax.f32 %v2818_v22, 0.0  ;;  %v2821_v61 = vadd.f32 %v8063_v38, %v2820_v0 }
 0x370   : > { %10296 = vst [vmem:[#allocation91_spill] sm:$0xff] %v8561_v54  ;;  %v8566_v3 = vmax.f32 %v2821_v61, 0.0  ;;  %v2929_v6 = vrot.slane %v8561_v54, 7  ;;  %v3089_v28 = vrot.slane %v8561_v54, 1 }
 0x372   : > { %10297 = vst [vmem:[#allocation92_spill] sm:$0xff] %v8566_v3  ;;  %v8574_v4 = vsel %vm10299_vm13, %v10298_v26, %v2929_v6  ;;  %v3120_v22 = vsel %vm10302_vm3, %v10301_v12, %v3089_v28  ;;  %v2930_v0 = vrot.slane %v8566_v3, 7  ;;  %v3090_v61 = vrot.slane %v8566_v3, 1  ;;  %v8613_v12 = vpop.permute.xlu1 %3339  ;;  %vm10399_vm13 = vmmov %vm10373_vm0 }
 0x373   : > { %10300 = vst [vmem:[#allocation93_spill] sm:$0xff] %v8574_v4  ;;  %3453 = vrot.lane.b32.xlu0 %v8574_v4, %s5864_s19  ;;  %3643 = vrot.lane.b32.xlu1 %v3120_v22, %s5866_s11  ;;  %10310 = vst [vmem:[#allocation99_spill] sm:$0xff] %v8613_v12 }
 0x374   : > { %v8589_v26 = vsel %vm10304_vm10, %v2929_v6, %v2930_v0  ;;  %v3119_v46 = vsel %vm10306_vm6, %v3089_v28, %v3090_v61  ;;  %v8608_v28 = vpop.permute.xlu0 %3621  ;;  %v2826_v6 = vadd.f32 %v5433_v49, %v8063_v38  ;;  %vm10402_vm3 = vmmov %vm10373_vm0 }
 0x375   : > { %10305 = vst [vmem:[#allocation95_spill] sm:$0xff] %v8589_v26  ;;  %10309 = vst [vmem:[#allocation98_spill] sm:$0xff] %v8608_v28 }
 0x376   : > { %v8618_v11 = vmax.f32 %v2826_v6, 0.0  ;;  %v8622_v8 = vpop.permute.xlu1 %3151  ;;  %vm10408_vm10 = vmmov %vm10377_vm1 }
 0x377   : > { %3549 = vrot.lane.b32.xlu0 %v8561_v54, %s10033_s26  ;;  %3359 = vrot.lane.b32.xlu1 %v3120_v22, %s5863_s20  ;;  %10313 = vst [vmem:[#allocation102_spill] sm:$0xff] %v8622_v8  ;;  %vm10409_vm6 = vmmov %vm10377_vm1 }
 0x378   : > { %10311 = vst [vmem:[#allocation100_spill] sm:$0xff] %v8618_v11  ;;  %v2931_v49 = vrot.slane %v8618_v11, 7 }
 0x37a   : > { %v8633_v6 = vsel %vm10314_vm9, %v2930_v0, %v2931_v49  ;;  %vm10413_vm9 = vmmov %vm10373_vm0 }
 0x37b   : > { %3265 = vrot.lane.b32.xlu0 %v8574_v4, %s5862_s10  ;;  %3455 = vrot.lane.b32.xlu1 %v8589_v26, %s5864_s19  ;;  %v8620_v4 = vpop.permute.xlu0 %3337  ;;  %10315 = vst [vmem:[#allocation103_spill] sm:$0xff] %v8633_v6 }
 0x37c   : > { %10312 = vst [vmem:[#allocation101_spill] sm:$0xff] %v8620_v4 }
 0x37f   : > { %3645 = vrot.lane.b32.xlu0 %v3119_v46, %s5866_s11  ;;  %3171 = vrot.lane.b32.xlu1 %v3120_v22, %s5861_s17  ;;  %v10026_v22 = vrot.slane %v8618_v11, 1  ;;  %v8639_v39 = vpop.permute.xlu0 %3433 }
 0x380   : > { %10317 = vst [vmem:[#allocation104_spill] sm:$0xff] %v8639_v39 }
 0x381   : > { %v3118_v40 = vsel %vm10316_vm12, %v3090_v61, %v10026_v22  ;;  %vm10415_vm12 = vmmov %vm10373_vm0 }
 0x383   : > { %3361 = vrot.lane.b32.xlu0 %v3119_v46, %s5863_s20  ;;  %3551 = vrot.lane.b32.xlu1 %v8566_v3, %s10033_s26  ;;  %v8650_v63 = vpop.permute.xlu0 %3149 }
 0x384   : > { %10320 = vst [vmem:[#allocation107_spill] sm:$0xff] %v8650_v63 }
 0x387   : > { %3013 = vrot.lane.b32.xlu0 %v8561_v54, %s5860_s16  ;;  %3267 = vrot.lane.b32.xlu1 %v8589_v26, %s5862_s10  ;;  %v8644_v54 = vpop.permute.xlu1 %3539  ;;  %v8646_v26 = vmax.f32 %v2829_v17, 0.0 }
 0x388   : > { %10318 = vst [vmem:[#allocation105_spill] sm:$0xff] %v8644_v54 }
 0x389   : > { %10319 = vst [vmem:[#allocation106_spill] sm:$0xff] %v8646_v26  ;;  %v10028_v0 = vrot.slane %v8646_v26, 7 }
 0x38b   : > { %3457 = vrot.lane.b32.xlu0 %v8633_v6, %s5864_s19  ;;  %3647 = vrot.lane.b32.xlu1 %v3118_v40, %s5866_s11  ;;  %v8653_v61 = vpop.permute.xlu1 %3003  ;;  %v8663_v17 = vsel %vm10322_vm15, %v2931_v49, %v10028_v0  ;;  %vm10419_vm15 = vmmov %vm10377_vm1 }
 0x38c   : > { %10321 = vst [vmem:[#allocation108_spill] sm:$0xff] %v8653_v61  ;;  %10323 = vst [vmem:[#allocation109_spill] sm:$0xff] %v8663_v17 }
 0x38f   : > { %3173 = vrot.lane.b32.xlu0 %v3119_v46, %s5861_s17  ;;  %3363 = vrot.lane.b32.xlu1 %v3118_v40, %s5863_s20  ;;  %v8665_v46 = vpop.permute.xlu0 %3245  ;;  %v8671_v22 = vpop.permute.xlu1 %3535 }
 0x390   : > { %10324 = vst [vmem:[#allocation110_spill] sm:$0xff] %v8665_v46  ;;  %10325 = vst [vmem:[#allocation111_spill] sm:$0xff] %v8671_v22 }
 0x393   : > { %3553 = vrot.lane.b32.xlu0 %v8618_v11, %s10033_s26  ;;  %3015 = vrot.lane.b32.xlu1 %v8566_v3, %s5860_s16  ;;  %v8674_v61 = vpop.permute.xlu0 %3537  ;;  %v8676_v3 = vpop.permute.xlu1 %2999 }
 0x394   : > { %10326 = vst [vmem:[#allocation112_spill] sm:$0xff] %v8674_v61  ;;  %10327 = vst [vmem:[#allocation113_spill] sm:$0xff] %v8676_v3 }
 0x397   : > { %3269 = vrot.lane.b32.xlu0 %v8633_v6, %s5862_s10  ;;  %3459 = vrot.lane.b32.xlu1 %v8663_v17, %s5864_s19  ;;  %v8682_v0 = vpop.permute.xlu0 %3001  ;;  %v8690_v22 = vpop.permute.xlu1 %3627 }
 0x398   : > { %10328 = vst [vmem:[#allocation114_spill] sm:$0xff] %v8682_v0  ;;  %10329 = vst [vmem:[#allocation115_spill] sm:$0xff] %v8690_v22 }
 0x39b   : > { %3175 = vrot.lane.b32.xlu1 %v3118_v40, %s5861_s17  ;;  %v8694_v61 = vpop.permute.xlu0 %3533  ;;  %v8696_v3 = vpop.permute.xlu1 %3343 }
 0x39c   : > { %10330 = vst [vmem:[#allocation116_spill] sm:$0xff] %v8694_v61  ;;  %10331 = vst [vmem:[#allocation117_spill] sm:$0xff] %v8696_v3 }
 0x39f   : > { %3555 = vrot.lane.b32.xlu1 %v8646_v26, %s10033_s26  ;;  %v8698_v7 = vpop.permute.xlu0 %2997  ;;  %v8700_v46 = vpop.permute.xlu1 %3155 }
 0x3a0   : > { %10332 = vst [vmem:[#allocation118_spill] sm:$0xff] %v8698_v7  ;;  %10333 = vst [vmem:[#allocation119_spill] sm:$0xff] %v8700_v46 }
 0x3a2   : > { %v8680_v49 = vpop.f32.mrb[20].mxu1 }
 0x3a3   : > { %v8684_v54 = vpop.f32.mrb[21].mxu1  ;;  %3271 = vrot.lane.b32.xlu1 %v8663_v17, %s5862_s10  ;;  %v8702_v0 = vpop.permute.xlu0 %3437 }
 0x3a4   : > { %v8688_v6 = vpop.f32.mrb[22].mxu1  ;;  %10334 = vst [vmem:[#allocation120_spill] sm:$0xff] %v8702_v0  ;;  %v8704_v48 = vpop.permute.xlu1 %3443 }
 0x3a5   : > { %v8692_v40 = vpop.f32.mrb[23].mxu1  ;;  %10335 = vst [vmem:[#allocation121_spill] sm:$0xff] %v8704_v48 }
 0x3a7   : > { %v8706_v44 = vpop.permute.xlu0 %3249 }
 0x3a8   : > { %10336 = vst [vmem:[#allocation122_spill] sm:$0xff] %v8706_v44  ;;  %v8708_v17 = vpop.permute.xlu1 %3255 }
 0x3a9   : > { %10337 = vst [vmem:[#allocation123_spill] sm:$0xff] %v8708_v17 }
 0x3ab   : > { %v8710_v63 = vpop.permute.xlu0 %3633 }
 0x3ac   : > { %10338 = vst [vmem:[#allocation124_spill] sm:$0xff] %v8710_v63  ;;  %v8712_v22 = vpop.permute.xlu1 %3439 }
 0x3ad   : > { %10339 = vst [vmem:[#allocation125_spill] sm:$0xff] %v8712_v22 }
 0x3af   : > { %v8714_v8 = vpop.permute.xlu0 %3349 }
 0x3b0   : > { %10340 = vst [vmem:[#allocation126_spill] sm:$0xff] %v8714_v8  ;;  %v8716_v61 = vpop.permute.xlu1 %3251 }
 0x3b1   : > { %10341 = vst [vmem:[#allocation127_spill] sm:$0xff] %v8716_v61 }
 0x3b3   : > { %v8718_v3 = vpop.permute.xlu0 %3161 }
 0x3b4   : > { %10342 = vst [vmem:[#allocation128_spill] sm:$0xff] %v8718_v3  ;;  %v8720_v7 = vpop.permute.xlu1 %3631 }
 0x3b5   : > { %10343 = vst [vmem:[#allocation129_spill] sm:$0xff] %v8720_v7 }
 0x3b7   : > { %v8722_v46 = vpop.permute.xlu0 %3629 }
 0x3b8   : > { %10344 = vst [vmem:[#allocation130_spill] sm:$0xff] %v8722_v46  ;;  %v8724_v0 = vpop.permute.xlu1 %3347 }
 0x3b9   : > { %10345 = vst [vmem:[#allocation131_spill] sm:$0xff] %v8724_v0 }
 0x3bb   : > { %v8726_v48 = vpop.permute.xlu0 %3345 }
 0x3bc   : > { %10346 = vst [vmem:[#allocation132_spill] sm:$0xff] %v8726_v48  ;;  %v8730_v17 = vpop.permute.xlu1 %3159 }
 0x3bd   : > { %10347 = vst [vmem:[#allocation133_spill] sm:$0xff] %v8730_v17 }
 0x3bf   : > { %v8738_v61 = vpop.permute.xlu0 %3441 }
 0x3c0   : > { %10348 = vst [vmem:[#allocation134_spill] sm:$0xff] %v8738_v61  ;;  %v8740_v3 = vpop.permute.xlu1 %3547 }
 0x3c1   : > { %10349 = vst [vmem:[#allocation135_spill] sm:$0xff] %v8740_v3  ;;  %v5750_v3 = vld [vmem:[%s9918_s2] sm:$0xff]  }
 0x3c2   : > { %5231 = vmatpush3.bf16.msra.mxu1 %v5750_v3  ;;  %v5754_v3 = vld [vmem:[%s9918_s2 + $0x10] sm:$0xff]  }
 0x3c3   : > { %v8742_v7 = vpop.permute.xlu0 %3157 }
 0x3c4   : > { %10350 = vst [vmem:[#allocation136_spill] sm:$0xff] %v8742_v7  ;;  %v8744_v46 = vpop.permute.xlu1 %3543 }
 0x3c5   : > { %10351 = vst [vmem:[#allocation137_spill] sm:$0xff] %v8744_v46 }
 0x3c7   : > { %v8746_v0 = vpop.permute.xlu0 %3253 }
 0x3c8   : > { %10352 = vst [vmem:[#allocation138_spill] sm:$0xff] %v8746_v0  ;;  %v8748_v48 = vpop.permute.xlu1 %3007 }
 0x3c9   : > { %10353 = vst [vmem:[#allocation139_spill] sm:$0xff] %v8748_v48  ;;  %v5751_v48 = vld [vmem:[%s9918_s2 + $0x48] sm:$0xff]  }
 0x3ca   : > { %5232 = vmatprep.subr.bf16.mxu1 %v5751_v48  ;;  %v5756_v48 = vld [vmem:[%s9918_s2 + $0x18] sm:$0xff]  }
 0x3cb   : > { %v8750_v2 = vpop.permute.xlu0 %3545 }
 0x3cc   : > { %10354 = vst [vmem:[#allocation140_spill] sm:$0xff] %v8750_v2  ;;  %v8752_v17 = vpop.permute.xlu1 %3635  ;;  %v5752_v2 = vld [vmem:[%s9918_s2 + $0x8] sm:$0xff]  }
 0x3cd   : > { %10355 = vst [vmem:[#allocation141_spill] sm:$0xff] %v8752_v17  ;;  %5233 = vmatpush3.bf16.msra.mxu1 %v5752_v2  ;;  %v5753_v17 = vld [vmem:[%s9918_s2 + $0x50] sm:$0xff]  }
 0x3ce   : > { %5234 = vmatprep.subr.bf16.mxu1 %v5753_v17 }
 0x3cf   : > { %v8760_v7 = vpop.permute.xlu0 %3541 }
 0x3d0   : > { %10356 = vst [vmem:[#allocation142_spill] sm:$0xff] %v8760_v7  ;;  %v8765_v46 = vpop.permute.xlu1 %3351 }
 0x3d1   : > { %10357 = vst [vmem:[#allocation143_spill] sm:$0xff] %v8765_v46  ;;  %5235 = vmatpush3.bf16.msra.mxu1 %v5754_v3  ;;  %v5755_v46 = vld [vmem:[%s9918_s2 + $0x58] sm:$0xff]   ;;  %v5758_v3 = vld [vmem:[%s9918_s2 + $0x20] sm:$0xff]  }
 0x3d2   : > { %5236 = vmatprep.subr.bf16.mxu1 %v5755_v46  ;;  %v2834_v46 = vadd.f32 %v8063_v38, %v8684_v54 }
 0x3d3   : > { %v8773_v50 = vpop.permute.xlu0 %3005 }
 0x3d4   : > { %10358 = vst [vmem:[#allocation144_spill] sm:$0xff] %v8773_v50  ;;  %v8778_v7 = vpop.permute.xlu1 %3163  ;;  %v5757_v50 = vld [vmem:[%s9918_s2 + $0x60] sm:$0xff]  }
 0x3d5   : > { %10359 = vst [vmem:[#allocation145_spill] sm:$0xff] %v8778_v7  ;;  %5237 = vmatpush3.bf16.msra.mxu1 %v5756_v48 }
 0x3d6   : > { %5238 = vmatprep.subr.bf16.mxu1 %v5757_v50 }
 0x3d7   : > { %v8786_v2 = vpop.permute.xlu0 %3445 }
 0x3d8   : > { %10360 = vst [vmem:[#allocation146_spill] sm:$0xff] %v8786_v2  ;;  %v8791_v17 = vpop.permute.xlu1 %3451  ;;  %v5759_v2 = vld [vmem:[%s9918_s2 + $0x68] sm:$0xff]  }
 0x3d9   : > { %10361 = vst [vmem:[#allocation147_spill] sm:$0xff] %v8791_v17  ;;  %5239 = vmatpush3.bf16.msra.mxu1 %v5758_v3 }
 0x3da   : > { %v8728_v44 = vpop.f32.mrb[24].mxu1  ;;  %5240 = vmatprep.subr.bf16.mxu1 %v5759_v2 }
 0x3db   : > { %v8732_v63 = vpop.f32.mrb[25].mxu1  ;;  %v8804_v17 = vpop.permute.xlu0 %3257 }
 0x3dc   : > { %v8734_v22 = vpop.f32.mrb[26].mxu1  ;;  %10362 = vst [vmem:[#allocation148_spill] sm:$0xff] %v8804_v17  ;;  %v8814_v3 = vpop.permute.xlu1 %3263  ;;  %v8820_v17 = vmax.f32 %v2834_v46, 0.0 }
 0x3dd   : > { %v8736_v8 = vpop.f32.mrb[27].mxu1  ;;  %10363 = vst [vmem:[#allocation149_spill] sm:$0xff] %v8814_v3 }
 0x3de   : > { %10364 = vst [vmem:[#allocation150_spill] sm:$0xff] %v8820_v17 }
 0x3df   : > { %v8832_v3 = vpop.permute.xlu0 %3641 }
 0x3e0   : > { %10365 = vst [vmem:[#allocation151_spill] sm:$0xff] %v8832_v3  ;;  %v5763_v3 = vld [vmem:[%s9918_s2 + $0x78] sm:$0xff]  }
 0x3e3   : > { %v8875_v43 = vpop.permute.xlu0 %3637 }
 0x3e4   : > { %10374 = vst [vmem:[#allocation155_spill] sm:$0xff] %v8875_v43  ;;  %v2933_v43 = vrot.slane %v8820_v17, 7 }
 0x406   : > { %v5445_v7 = vpop.f32.mrb[28].mxu1 }
 0x407   : > { %v2874_v0 = vadd.f32 %v5445_v7, %v8063_v38  ;;  %v8797_v61 = vpop.f32.mrb[29].mxu1  ;;  %v5760_v7 = vld [vmem:[%s9918_s2 + $0x28] sm:$0xff]  }
 0x408   : > { %v5446_v48 = vpop.f32.mrb[30].mxu1  ;;  %5241 = vmatpush3.bf16.msra.mxu1 %v5760_v7  ;;  %v10368_v7 = vrot.slane %v8097_v51, 1 }
 0x409   : > { %v8806_v39 = vmax.f32 %v2874_v0, 0.0  ;;  %v2877_v9 = vadd.f32 %v5446_v48, %v8063_v38  ;;  %v8809_v50 = vpop.f32.mrb[31].mxu1  ;;  %v5761_v0 = vld [vmem:[%s9918_s2 + $0x70] sm:$0xff]  }
 0x40a   : > { %5242 = vmatprep.subr.bf16.mxu1 %v5761_v0  ;;  %v3093_v0 = vrot.slane %v8820_v17, 1 }
 0x40b   : > { %v8816_v54 = vmax.f32 %v2877_v9, 0.0  ;;  %2977 = vrot.lane.b32.xlu0 %v8806_v39, %s5860_s16  ;;  %v10036_v48 = vrot.slane %v8806_v39, 1  ;;  %v5762_v9 = vld [vmem:[%s9918_s2 + $0x30] sm:$0xff]  }
 0x40c   : > { %5243 = vmatpush3.bf16.msra.mxu1 %v5762_v9  ;;  %v3092_v9 = vrot.slane %v8646_v26, 1 }
 0x40d   : > { %2979 = vrot.lane.b32.xlu1 %v8816_v54, %s5860_s16  ;;  %v3104_v2 = vrot.slane %v8816_v54, 1  ;;  %v10042_v28 = vrot.slane %v8816_v54, 7  ;;  %5244 = vmatprep.subr.bf16.mxu1 %v5763_v3 }
 0x40f   : > { %v8838_v46 = vsel %vm10366_vm5, %v10036_v48, %v3104_v2  ;;  %v8844_v33 = vsel %vm10369_vm8, %v3104_v2, %v10368_v7  ;;  %v8853_v48 = vpop.permute.xlu1 %3447  ;;  %v5764_v2 = vld [vmem:[%s9918_s2 + $0x38] sm:$0xff]   ;;  %v10372_v7 = vrot.slane %v8097_v51, 7  ;;  %v10376_v51 = vrot.slane %v8618_v11, 1  ;;  %vm10420_vm5 = vmmov %vm10377_vm1 }
 0x410   : > { %10367 = vst [vmem:[#allocation152_spill] sm:$0xff] %v8838_v46  ;;  %10370 = vst [vmem:[#allocation153_spill] sm:$0xff] %v8844_v33  ;;  %3137 = vrot.lane.b32.xlu0 %v8838_v46, %s5861_s17  ;;  %5245 = vmatpush3.bf16.msra.mxu1 %v5764_v2 }
 0x411   : > { %10371 = vst [vmem:[#allocation154_spill] sm:$0xff] %v8853_v48  ;;  %3139 = vrot.lane.b32.xlu1 %v8844_v33, %s5861_s17  ;;  %v8867_v46 = vsel %vm10373_vm0, %v10042_v28, %v10372_v7  ;;  %v2837_v48 = vadd.f32 %v8063_v38, %v8692_v40  ;;  %v3116_v33 = vsel %vm10278_vm2, %v3092_v9, %v3093_v0  ;;  %v8888_v38 = vpop.permute.xlu0 %3353  ;;  %vm10423_vm8 = vmmov %vm10373_vm0 }
 0x412   : > { %v3117_v2 = vsel %vm10377_vm1, %v10376_v51, %v3092_v9  ;;  %10379 = vst [vmem:[#allocation158_spill] sm:$0xff] %v8888_v38  ;;  %v3043_v23 = vadd.f32 %v8367_v42, %v8867_v46  ;;  %vm10426_vm2 = vmmov %vm10373_vm0 }
 0x413   : > { %v8878_v3 = vpop.permute.xlu1 %3259  ;;  %v8884_v7 = vmax.f32 %v2837_v48, 0.0  ;;  %vm10428_vm1 = vmmov %vm10373_vm0 }
 0x414   : > { %3233 = vrot.lane.b32.xlu0 %v8867_v46, %s5862_s10  ;;  %10375 = vst [vmem:[#allocation156_spill] sm:$0xff] %v8878_v3 }
 0x415   : > { %3651 = vrot.lane.b32.xlu1 %v3116_v33, %s5866_s11  ;;  %10378 = vst [vmem:[#allocation157_spill] sm:$0xff] %v8884_v7  ;;  %v2934_v40 = vrot.slane %v8884_v7, 7  ;;  %v8903_v48 = vpop.permute.xlu0 %3449 }
 0x416   : > { %10383 = vst [vmem:[#allocation161_spill] sm:$0xff] %v8903_v48 }
 0x417   : > { %v8892_v28 = vpop.permute.xlu1 %3639  ;;  %v8901_v51 = vsel %vm10381_vm4, %v2933_v43, %v2934_v40  ;;  %vm10430_vm4 = vmmov %vm10420_vm5 }
 0x418   : > { %3649 = vrot.lane.b32.xlu0 %v3117_v2, %s5866_s11  ;;  %10380 = vst [vmem:[#allocation159_spill] sm:$0xff] %v8892_v28  ;;  %10382 = vst [vmem:[#allocation160_spill] sm:$0xff] %v8901_v51  ;;  %v10385_v28 = vrot.slane %v8646_v26, 7 }
 0x419   : > { %3367 = vrot.lane.b32.xlu1 %v3116_v33, %s5863_s20 }
 0x41a   : > { %v8913_v38 = vsel %vm10386_vm11, %v10385_v28, %v2933_v43  ;;  %vm10432_vm11 = vmmov %vm10430_vm4 }
 0x41b   : > { %v8907_v9 = vpop.permute.xlu1 %3355  ;;  %10387 = vst [vmem:[#allocation163_spill] sm:$0xff] %v8913_v38 }
 0x41c   : > { %3365 = vrot.lane.b32.xlu0 %v3117_v2, %s5863_s20  ;;  %10384 = vst [vmem:[#allocation162_spill] sm:$0xff] %v8907_v9  ;;  %v8925_v9 = vpop.permute.xlu0 %3165 }
 0x41d   : > { %3019 = vrot.lane.b32.xlu1 %v8646_v26, %s5860_s16  ;;  %10388 = vst [vmem:[#allocation164_spill] sm:$0xff] %v8925_v9 }
 0x41f   : > { %v8928_v26 = vpop.permute.xlu1 %3167 }
 0x420   : > { %3017 = vrot.lane.b32.xlu0 %v8618_v11, %s5860_s16  ;;  %v8921_v11 = vld [vmem:[%s9920_s4 + $0x1] ss:$0 sm:$0xff]  ;;  %10389 = vst [vmem:[#allocation165_spill] sm:$0xff] %v8928_v26  ;;  %v8937_v28 = vpop.permute.xlu0 %3261 }
 0x421   : > { %3463 = vrot.lane.b32.xlu1 %v8901_v51, %s5864_s19  ;;  %v2842_v48 = vadd.f32 %v8921_v11, %v8680_v49  ;;  %10392 = vst [vmem:[#allocation167_spill] sm:$0xff] %v8937_v28  ;;  %v2845_v9 = vadd.f32 %v8921_v11, %v8688_v6 }
 0x423   : > { %v8932_v43 = vmax.f32 %v2842_v48, 0.0  ;;  %v8957_v3 = vmax.f32 %v2845_v9, 0.0 }
 0x424   : > { %3461 = vrot.lane.b32.xlu0 %v8913_v38, %s5864_s19  ;;  %v8951_v26 = vpop.permute.xlu0 %3357 }
 0x425   : > { %3179 = vrot.lane.b32.xlu1 %v3116_v33, %s5861_s17  ;;  %10391 = vst [vmem:[#allocation166_spill] sm:$0xff] %v8932_v43  ;;  %v3094_v33 = vrot.slane %v8884_v7, 1  ;;  %v3095_v49 = vrot.slane %v8932_v43, 1  ;;  %10394 = vst [vmem:[#allocation168_spill] sm:$0xff] %v8951_v26  ;;  %v2936_v6 = vrot.slane %v8957_v3, 7  ;;  %v2935_v26 = vrot.slane %v8932_v43, 7 }
 0x426   : > { %10397 = vst [vmem:[#allocation170_spill] sm:$0xff] %v8957_v3 }
 0x427   : > { %v3114_v48 = vsel %vm10393_vm14, %v3094_v33, %v3095_v49  ;;  %vm10437_vm14 = vmmov %vm10373_vm0 }
 0x428   : > { %3177 = vrot.lane.b32.xlu0 %v3117_v2, %s5861_s17  ;;  %v8942_v2 = vpop.permute.xlu1 %3011 }
 0x429   : > { %3559 = vrot.lane.b32.xlu1 %v8884_v7, %s10390_s29 }
 0x42c   : > { %3557 = vrot.lane.b32.xlu0 %v8820_v17, %s10390_s29  ;;  %v8953_v28 = vpop.permute.xlu1 %3643 }
 0x42d   : > { %3275 = vrot.lane.b32.xlu1 %v8901_v51, %s5862_s10  ;;  %10395 = vst [vmem:[#allocation169_spill] sm:$0xff] %v8953_v28  ;;  %v3115_v51 = vsel %vm10396_vm7, %v3093_v0, %v3094_v33  ;;  %v8974_v0 = vsel %vm10399_vm13, %v2935_v26, %v2936_v6  ;;  %vm10445_vm7 = vmmov %vm10373_vm0 }
 0x42e   : > { %10400 = vst [vmem:[#allocation172_spill] sm:$0xff] %v8974_v0  ;;  %vm10481_vm13 = vmmov %vm10430_vm4 }
 0x430   : > { %3273 = vrot.lane.b32.xlu0 %v8913_v38, %s5862_s10  ;;  %v8963_v38 = vpop.permute.xlu0 %3009  ;;  %v8965_v4 = vpop.permute.xlu1 %3359 }
 0x431   : > { %3655 = vrot.lane.b32.xlu1 %v3114_v48, %s5866_s11  ;;  %10398 = vst [vmem:[#allocation171_spill] sm:$0xff] %v8965_v4  ;;  %v8984_v4 = vsel %vm10402_vm3, %v2934_v40, %v2935_v26  ;;  %vm10492_vm3 = vmmov %vm10430_vm4 }
 0x432   : > { %10403 = vst [vmem:[#allocation174_spill] sm:$0xff] %v8984_v4 }
 0x434   : > { %3653 = vrot.lane.b32.xlu0 %v3115_v51, %s5866_s11  ;;  %v8978_v9 = vpop.permute.xlu0 %3169  ;;  %v8980_v33 = vpop.permute.xlu1 %3455 }
 0x435   : > { %3371 = vrot.lane.b32.xlu1 %v3114_v48, %s5863_s20  ;;  %10401 = vst [vmem:[#allocation173_spill] sm:$0xff] %v8980_v33 }
 0x438   : > { %3369 = vrot.lane.b32.xlu0 %v3115_v51, %s5863_s20  ;;  %v8996_v55 = vpop.permute.xlu1 %3171 }
 0x439   : > { %3023 = vrot.lane.b32.xlu1 %v8884_v7, %s5860_s16  ;;  %v2850_v7 = vadd.f32 %v8921_v11, %v8732_v63 }
 0x43b   : > { %v8993_v28 = vmax.f32 %v2850_v7, 0.0  ;;  %v3096_v7 = vrot.slane %v8957_v3, 1 }
 0x43c   : > { %3021 = vrot.lane.b32.xlu0 %v8820_v17, %s5860_s16  ;;  %v8991_v17 = vpop.permute.xlu0 %3453  ;;  %v9008_v40 = vpop.permute.xlu1 %3551 }
 0x43d   : > { %3467 = vrot.lane.b32.xlu1 %v8974_v0, %s5864_s19  ;;  %10404 = vst [vmem:[#allocation175_spill] sm:$0xff] %v8991_v17  ;;  %10405 = vst [vmem:[#allocation176_spill] sm:$0xff] %v8993_v28  ;;  %v3097_v26 = vrot.slane %v8993_v28, 1  ;;  %v2937_v33 = vrot.slane %v8993_v28, 7 }
 0x43e   : > { %10407 = vst [vmem:[#allocation178_spill] sm:$0xff] %v9008_v40 }
 0x440   : > { %3465 = vrot.lane.b32.xlu0 %v8984_v4, %s5864_s19  ;;  %v9003_v63 = vpop.permute.xlu0 %3549  ;;  %v9024_v40 = vpop.permute.xlu1 %3267 }
 0x441   : > { %3183 = vrot.lane.b32.xlu1 %v3114_v48, %s5861_s17  ;;  %10406 = vst [vmem:[#allocation177_spill] sm:$0xff] %v9003_v63  ;;  %v3112_v48 = vsel %vm10408_vm10, %v3096_v7, %v3097_v26  ;;  %vm5870_vm10 = vmmov 0  }
 0x444   : > { %3181 = vrot.lane.b32.xlu0 %v3115_v51, %s5861_s17  ;;  %v2853_v51 = vadd.f32 %v8921_v11, %v8736_v8  ;;  %v9017_v17 = vpop.permute.xlu0 %3265 }
 0x445   : > { %3563 = vrot.lane.b32.xlu1 %v8957_v3, %s10390_s29 }
 0x446   : > { %v9021_v63 = vmax.f32 %v2853_v51, 0.0 }
 0x448   : > { %3561 = vrot.lane.b32.xlu0 %v8932_v43, %s10390_s29  ;;  %10410 = vst [vmem:[#allocation179_spill] sm:$0xff] %v9021_v63  ;;  %v2938_v8 = vrot.slane %v9021_v63, 7 }
 0x449   : > { %3279 = vrot.lane.b32.xlu1 %v8974_v0, %s5862_s10  ;;  %v3113_v0 = vsel %vm10409_vm6, %v3095_v49, %v3096_v7  ;;  %v9034_v49 = vpop.permute.xlu1 %3647 }
 0x44a   : > { %10412 = vst [vmem:[#allocation181_spill] sm:$0xff] %v9034_v49  ;;  %v9040_v7 = vsel %vm10413_vm9, %v2937_v33, %v2938_v8 }
 0x44b   : > { %10414 = vst [vmem:[#allocation182_spill] sm:$0xff] %v9040_v7 }
 0x44c   : > { %3277 = vrot.lane.b32.xlu0 %v8984_v4, %s5862_s10  ;;  %v9029_v4 = vpop.permute.xlu0 %3645 }
 0x44d   : > { %3659 = vrot.lane.b32.xlu1 %v3112_v48, %s5866_s11  ;;  %10411 = vst [vmem:[#allocation180_spill] sm:$0xff] %v9029_v4  ;;  %v9048_v4 = vsel %vm10415_vm12, %v2936_v6, %v2937_v33  ;;  %v3098_v33 = vrot.slane %v9021_v63, 1 }
 0x44e   : > { %10416 = vst [vmem:[#allocation183_spill] sm:$0xff] %v9048_v4 }
 0x450   : > { %3657 = vrot.lane.b32.xlu0 %v3113_v0, %s5866_s11  ;;  %v9044_v51 = vpop.permute.xlu0 %3361 }
 0x451   : > { %3375 = vrot.lane.b32.xlu1 %v3112_v48, %s5863_s20 }
 0x454   : > { %3373 = vrot.lane.b32.xlu0 %v3113_v0, %s5863_s20  ;;  %v9058_v49 = vpop.permute.xlu0 %3013 }
 0x455   : > { %3027 = vrot.lane.b32.xlu1 %v8957_v3, %s5860_s16  ;;  %v9052_v3 = vpop.permute.xlu1 %3363  ;;  %10417 = vst [vmem:[#allocation184_spill] sm:$0xff] %v9058_v49 }
 0x458   : > { %3025 = vrot.lane.b32.xlu0 %v8932_v43, %s5860_s16  ;;  %v2858_v43 = vadd.f32 %v8921_v11, %v8728_v44 }
 0x459   : > { %3471 = vrot.lane.b32.xlu1 %v9040_v7, %s5864_s19  ;;  %v9064_v6 = vpop.permute.xlu1 %3015 }
 0x45a   : > { %v9062_v13 = vmax.f32 %v2858_v43, 0.0  ;;  %10418 = vst [vmem:[#allocation185_spill] sm:$0xff] %v9064_v6 }
 0x45c   : > { %3469 = vrot.lane.b32.xlu0 %v9048_v4, %s5864_s19  ;;  %v10055_v44 = vrot.slane %v9062_v13, 1 }
 0x45d   : > { %3187 = vrot.lane.b32.xlu1 %v3112_v48, %s5861_s17  ;;  %v2861_v48 = vadd.f32 %v8921_v11, %v8734_v22  ;;  %v3460_v6 = vpop.permute.xlu1 %3459 }
 0x45e   : > { %v3110_v43 = vsel %vm10419_vm15, %v3098_v33, %v10055_v44 }
 0x45f   : > { %v9085_v49 = vmax.f32 %v2861_v48, 0.0 }
 0x460   : > { %3185 = vrot.lane.b32.xlu0 %v3113_v0, %s5861_s17  ;;  %v9072_v0 = vpop.permute.xlu0 %3457 }
 0x461   : > { %3567 = vrot.lane.b32.xlu1 %v9021_v63, %s10390_s29  ;;  %v9091_v22 = vpop.permute.xlu1 %3175  ;;  %v10059_v44 = vrot.slane %v9085_v49, 7 }
 0x462   : > { %10422 = vst [vmem:[#allocation187_spill] sm:$0xff] %v9091_v22  ;;  %v2869_v22 = vadd.f32 %v8921_v11, %v8809_v50 }
 0x464   : > { %3565 = vrot.lane.b32.xlu0 %v8993_v28, %s10390_s29  ;;  %v9088_v12 = vpop.permute.xlu0 %3173 }
 0x465   : > { %3283 = vrot.lane.b32.xlu1 %v9040_v7, %s5862_s10  ;;  %v3111_v7 = vsel %vm10420_vm5, %v3097_v26, %v3098_v33  ;;  %10421 = vst [vmem:[#allocation186_spill] sm:$0xff] %v9088_v12  ;;  %v3556_v48 = vpop.permute.xlu1 %3555 }
 0x468   : > { %3281 = vrot.lane.b32.xlu0 %v9048_v4, %s5862_s10  ;;  %v2939_v4 = vrot.slane %v9062_v13, 7  ;;  %v3554_v26 = vpop.permute.xlu0 %3553 }
 0x469   : > { %3663 = vrot.lane.b32.xlu1 %v3110_v43, %s5866_s11  ;;  %v9125_v50 = vpop.permute.xlu1 %3271 }
 0x46a   : > { %v9104_v33 = vsel %vm10423_vm8, %v2939_v4, %v10059_v44  ;;  %v9121_v44 = vmax.f32 %v2869_v22, 0.0 }
 0x46b   : > { %10424 = vst [vmem:[#allocation188_spill] sm:$0xff] %v9104_v33 }
 0x46c   : > { %3661 = vrot.lane.b32.xlu0 %v3111_v7, %s5866_s11  ;;  %v9118_v12 = vpop.permute.xlu0 %3269 }
 0x46d   : > { %3379 = vrot.lane.b32.xlu1 %v3110_v43, %s5863_s20 }
 0x470   : > { %3377 = vrot.lane.b32.xlu0 %v3111_v7, %s5863_s20 }
 0x471   : > { %3031 = vrot.lane.b32.xlu1 %v9021_v63, %s5860_s16  ;;  %v9112_v63 = vsel %vm10373_vm0, %v2938_v8, %v2939_v4  ;;  %v3057_v8 = vadd.f32 %v8963_v38, %v8480_v31 }
 0x474   : > { %3029 = vrot.lane.b32.xlu0 %v8993_v28, %s5860_s16  ;;  %v2866_v28 = vadd.f32 %v8921_v11, %v8797_v61  ;;  %v3058_v11 = vadd.f32 %v8942_v2, %v8472_v47  ;;  %v3217_v2 = vadd.f32 %v8978_v9, %v3057_v8  ;;  %v10425_v61 = vrot.slane %v8816_v54, 7 }
 0x475   : > { %3475 = vrot.lane.b32.xlu1 %v9104_v33, %s5864_s19  ;;  %v3100_v9 = vrot.slane %v9085_v49, 1  ;;  %v3044_v47 = vadd.f32 %v8364_v27, %v8124_v36 }
 0x476   : > { %v9127_v29 = vmax.f32 %v2866_v28, 0.0  ;;  %v3218_v42 = vadd.f32 %v8996_v55, %v3058_v11  ;;  %v2943_v28 = vrot.slane %v8806_v39, 7 }
 0x478   : > { %3473 = vrot.lane.b32.xlu0 %v9112_v63, %s5864_s19  ;;  %v9149_v31 = vsel %vm10426_vm2, %v2943_v28, %v10425_v61 }
 0x479   : > { %3191 = vrot.lane.b32.xlu1 %v3110_v43, %s5861_s17  ;;  %v3203_v43 = vadd.f32 %v8490_v45, %v3043_v23  ;;  %v10427_v23 = vrot.slane %v9121_v44, 7 }
 0x47b   : > { %v9157_v45 = vsel %vm10428_vm1, %v10427_v23, %v2943_v28  ;;  %v3299_v61 = vadd.f32 %v8500_v57, %v3203_v43  ;;  %v10429_v28 = vrot.slane %v9127_v29, 1 }
 0x47c   : > { %3189 = vrot.lane.b32.xlu0 %v3111_v7, %s5861_s17  ;;  %v3314_v7 = vadd.f32 %v9024_v40, %v3218_v42  ;;  %v3313_v40 = vadd.f32 %v9017_v17, %v3217_v2  ;;  %v10431_v2 = vrot.slane %v9062_v13, 1 }
 0x47d   : > { %v2978_v4 = vpop.permute.xlu0 %2977  ;;  %3571 = vrot.lane.b32.xlu1 %v9085_v49, %s10390_s29 }
 0x47e   : > { %v3410_v11 = vadd.f32 %v9052_v3, %v3314_v7  ;;  %v3041_v8 = vadd.f32 %v2978_v4, %v9157_v45  ;;  %v3409_v17 = vadd.f32 %v9044_v51, %v3313_v40  ;;  %v3204_v4 = vadd.f32 %v8428_v58, %v3044_v47 }
 0x47f   : > { %v2980_v22 = vpop.permute.xlu1 %2979  ;;  %v9184_v7 = vsel %vm10432_vm11, %v10431_v2, %v3100_v9  ;;  %v3395_v51 = vadd.f32 %v8389_v32, %v3299_v61  ;;  %v3046_v32 = vadd.f32 %v8356_v52, %v8095_v15 }
 0x480   : > { %3569 = vrot.lane.b32.xlu0 %v9062_v13, %s10390_s29  ;;  %v3042_v55 = vadd.f32 %v2980_v22, %v9149_v31  ;;  %v9173_v22 = vsel %vm10430_vm4, %v3100_v9, %v10429_v28  ;;  %v3506_v3 = vadd.f32 %v3460_v6, %v3410_v11  ;;  %v3505_v23 = vadd.f32 %v9072_v0, %v3409_v17 }
 0x481   : > { %3287 = vrot.lane.b32.xlu1 %v9104_v33, %s5862_s10  ;;  %v3300_v47 = vadd.f32 %v8385_v62, %v3204_v4 }
 0x482   : > { %v3138_v38 = vpop.permute.xlu0 %3137  ;;  %v3601_v58 = vadd.f32 %v3554_v26, %v3505_v23  ;;  %v3491_v26 = vadd.f32 %v8541_v35, %v3395_v51  ;;  %v10442_v23 = vld [vmem:[#allocation101_spill] sm:$0xff] }
 0x483   : > { %v3140_v42 = vpop.permute.xlu1 %3139  ;;  %v3201_v57 = vadd.f32 %v3138_v38, %v3041_v8  ;;  %v3396_v61 = vadd.f32 %v8526_v18, %v3300_v47  ;;  %v10446_v47 = vld [vmem:[#allocation98_spill] sm:$0xff] }
 0x484   : > { %v3202_v33 = vadd.f32 %v3140_v42, %v3042_v55  ;;  %3285 = vrot.lane.b32.xlu0 %v9112_v63, %s5862_s10  ;;  %v3602_v55 = vadd.f32 %v3556_v48, %v3506_v3 }
 0x485   : > { %3667 = vrot.lane.b32.xlu1 %v9173_v22, %s5866_s11  ;;  %v3492_v18 = vadd.f32 %v8564_v53, %v3396_v61  ;;  %v10435_v53 = vld [vmem:[#allocation8_spill] sm:$0xff] }
 0x486   : > { %v3298_v27 = vadd.f32 %v8394_v41, %v3202_v33  ;;  %v3234_v43 = vpop.permute.xlu0 %3233 }
 0x487   : > { %v3297_v6 = vadd.f32 %v3234_v43, %v3201_v57  ;;  %v3652_v38 = vpop.permute.xlu1 %3651  ;;  %v10439_v57 = vld [vmem:[#allocation7_spill] sm:$0xff] }
 0x488   : > { %v3394_v40 = vadd.f32 %v8405_v24, %v3298_v27  ;;  %3665 = vrot.lane.b32.xlu0 %v9184_v7, %s5866_s11  ;;  %v3698_v33 = vadd.f32 %v3652_v38, %v3602_v55  ;;  %v10440_v27 = vld [vmem:[#allocation58_spill] sm:$0xff]  ;;  %v10441_v43 = vld [vmem:[#allocation83_spill] sm:$0xff] }
 0x489   : > { %v3393_v41 = vadd.f32 %v8413_v10, %v3297_v6  ;;  %3383 = vrot.lane.b32.xlu1 %v9173_v22, %s5863_s20  ;;  %v3045_v10 = vadd.f32 %v8360_v21, %v8145_v60  ;;  %v2941_v21 = vrot.slane %v9127_v29, 7  ;;  %v3048_v2 = vadd.f32 %v10441_v43, %v10440_v27  ;;  %v10443_v6 = vld [vmem:[#allocation81_spill] sm:$0xff] }
 0x48a   : > { %v3490_v0 = vadd.f32 %v8374_v59, %v3394_v40  ;;  %v3650_v48 = vpop.permute.xlu0 %3649  ;;  %v3206_v59 = vadd.f32 %v8535_v34, %v3046_v32  ;;  %v9211_v52 = vmul.f32 %v3698_v33, %v7452_v25  ;;  %v3588_v38 = vadd.f32 %v10443_v6, %v3492_v18  ;;  %v10448_v32 = vld [vmem:[#allocation86_spill] sm:$0xff]  ;;  %v10453_v18 = vld [vmem:[#allocation107_spill] sm:$0xff]  ;;  %v10462_v27 = vld [vmem:[#allocation89_spill] sm:$0xff] }
 0x48b   : > { %v3489_v24 = vadd.f32 %v8439_v14, %v3393_v41  ;;  %v3697_v9 = vadd.f32 %v3650_v48, %v3601_v58  ;;  %v9199_v11 = vpop.permute.xlu1 %3367  ;;  %v3205_v35 = vadd.f32 %v8399_v16, %v3045_v10  ;;  %v10434_v16 = vld [vmem:[#allocation88_spill] sm:$0xff]  ;;  %v10444_v58 = vrot.slane %v9085_v49, 7  ;;  %v10450_v10 = vld [vmem:[#allocation97_spill] sm:$0xff] }
 0x48c   : > { %v3586_v62 = vadd.f32 %v8347_v56, %v3490_v0  ;;  %3381 = vrot.lane.b32.xlu0 %v9184_v7, %s5863_s20  ;;  %v10447_v48 = vld [vmem:[#allocation56_spill] sm:$0xff]  ;;  %v3684_v61 = vadd.f32 %v10450_v10, %v3588_v38  ;;  %v10465_v38 = vld [vmem:[#allocation115_spill] sm:$0xff]  ;;  %v3102_v10 = vrot.slane %v9121_v44, 1 }
 0x48d   : > { %v3585_v15 = vadd.f32 %v8351_v30, %v3489_v24  ;;  %v9214_v14 = vmul.f32 %v3697_v9, %v7447_v37  ;;  %3035 = vrot.lane.b32.xlu1 %v9085_v49, %s5860_s16  ;;  %v3302_v30 = vadd.f32 %v8593_v19, %v3206_v59  ;;  %v10433_v37 = vld [vmem:[#allocation85_spill] sm:$0xff]  ;;  %v3301_v28 = vadd.f32 %v10434_v16, %v3205_v35  ;;  %v10449_v9 = vld [vmem:[#allocation104_spill] sm:$0xff] }
 0x48e   : > { %v3682_v60 = vadd.f32 %v8517_v5, %v3586_v62  ;;  %v9221_v56 = vpop.permute.xlu0 %3365  ;;  %v3587_v8 = vadd.f32 %v10433_v37, %v3491_v26  ;;  %v10436_v5 = vrot.slane %v9121_v44, 7  ;;  %v9257_v41 = vsel %vm10445_vm7, %v10444_v58, %v2941_v21  ;;  %v10451_v62 = vld [vmem:[#allocation87_spill] sm:$0xff]  ;;  %v10457_v16 = vld [vmem:[#allocation9_spill] sm:$0xff] }
 0x48f   : > { %v3681_v25 = vadd.f32 %v8377_v20, %v3585_v15  ;;  %v9226_v34 = vpop.permute.xlu1 %3019  ;;  %v3753_v42 = vpack.c.bf16 %v9211_v52, %v9214_v14  ;;  %v10438_v20 = vld [vmem:[#allocation99_spill] sm:$0xff]  ;;  %v3397_v55 = vadd.f32 %v10442_v23, %v3301_v28  ;;  %v3047_v24 = vadd.f32 %v10448_v32, %v10447_v48  ;;  %v10452_v15 = vld [vmem:[#allocation102_spill] sm:$0xff]  ;;  %v10463_v23 = vld [vmem:[#allocation57_spill] sm:$0xff] }
 0x490   : > { %v3714_v17 = vmul.f32 %v3682_v60, %v10435_v53  ;;  %3033 = vrot.lane.b32.xlu0 %v9062_v13, %s5860_s16  ;;  %v9239_v19 = vsel %vm10437_vm14, %v2941_v21, %v10436_v5  ;;  %v3398_v3 = vadd.f32 %v10438_v20, %v3302_v30  ;;  %v3683_v0 = vadd.f32 %v10446_v47, %v3587_v8  ;;  %v10454_v30 = vld [vmem:[#allocation45_spill] sm:$0xff]  ;;  %v10458_v53 = vld [vmem:[#allocation110_spill] sm:$0xff]  ;;  %v10467_v48 = vld [vmem:[#allocation59_spill] sm:$0xff] }
 0x491   : > { %v3713_v4 = vmul.f32 %v3681_v25, %v10439_v57  ;;  %3479 = vrot.lane.b32.xlu1 %v9239_v19, %s5864_s19  ;;  %v3493_v26 = vadd.f32 %v10449_v9, %v3397_v55  ;;  %v3208_v35 = vadd.f32 %v10452_v15, %v3048_v2  ;;  %v3207_v60 = vadd.f32 %v10453_v18, %v3047_v24  ;;  %v10455_v25 = vld [vmem:[#allocation44_spill] sm:$0xff]  ;;  %v10459_v5 = vld [vmem:[#allocation82_spill] sm:$0xff] }
 0x492   : > { %v9248_v51 = vpop.permute.xlu0 %3017  ;;  %v3494_v59 = vadd.f32 %v10451_v62, %v3398_v3  ;;  %v10456_v37 = vpack.c.bf16 %v10454_v30, %v10455_v25  ;;  %v3715_v28 = vmul.f32 %v3683_v0, %v10457_v16  ;;  %v10460_v20 = vld [vmem:[#allocation10_spill] sm:$0xff]  ;;  %v10464_v55 = vld [vmem:[#allocation80_spill] sm:$0xff]  ;;  %v10475_v16 = vld [vmem:[#allocation53_spill] sm:$0xff] }
 0x493   : > { %v9251_v40 = vpop.permute.xlu1 %3463  ;;  %v3745_v33 = vpack.c.bf16 %v3714_v17, %v3713_v4  ;;  %v3303_v17 = vadd.f32 %v10458_v53, %v3207_v60  ;;  %v3716_v3 = vmul.f32 %v3684_v61, %v10460_v20  ;;  %v10461_v57 = vld [vmem:[#allocation78_spill] sm:$0xff]  ;;  %v3304_v43 = vadd.f32 %v10462_v27, %v3208_v35  ;;  %v10468_v32 = vld [vmem:[#allocation84_spill] sm:$0xff]  ;;  %v10472_v35 = vld [vmem:[#allocation125_spill] sm:$0xff] }
 0x494   : > { %3477 = vrot.lane.b32.xlu0 %v9257_v41, %s5864_s19  ;;  %v3590_v4 = vadd.f32 %v10461_v57, %v3494_v59  ;;  %v3050_v6 = vadd.f32 %v10464_v55, %v10463_v23  ;;  %v3049_v24 = vadd.f32 %v10468_v32, %v10467_v48  ;;  %v10469_v9 = vld [vmem:[#allocation94_spill] sm:$0xff]  ;;  %v10471_v59 = vld [vmem:[#allocation119_spill] sm:$0xff]  ;;  %v10473_v60 = vld [vmem:[#allocation120_spill] sm:$0xff] }
 0x495   : > { %3195 = vrot.lane.b32.xlu1 %v9173_v22, %s5861_s17  ;;  %3942 = vmatmul.mubr.bf16.vlgmr.msra.gmra.mrb[32].mxu1 %v3745_v33  ;;  %v3589_v22 = vadd.f32 %v10459_v5, %v3493_v26  ;;  %v10466_v33 = vld [vmem:[#allocation117_spill] sm:$0xff]  ;;  %v3746_v0 = vpack.c.bf16 %v3716_v3, %v3715_v28  ;;  %v3399_v26 = vadd.f32 %v10469_v9, %v3303_v17  ;;  %v10470_v61 = vld [vmem:[#allocation90_spill] sm:$0xff]  ;;  %v10477_v53 = vld [vmem:[#allocation96_spill] sm:$0xff] }
 0x496   : > { %v9271_v21 = vpop.permute.xlu0 %3461  ;;  %3949 = vmatprep.mubr.bf16.mxu1 %v10456_v37  ;;  %v3686_v58 = vadd.f32 %v10465_v38, %v3590_v4  ;;  %v3210_v15 = vadd.f32 %v10471_v59, %v3050_v6  ;;  %v10474_v37 = vld [vmem:[#allocation55_spill] sm:$0xff]  ;;  %v3209_v17 = vadd.f32 %v10477_v53, %v3049_v24  ;;  %v10478_v5 = vld [vmem:[#allocation12_spill] sm:$0xff]  ;;  %v10480_v4 = vrot.slane %v8806_v39, 1  ;;  %v10487_v48 = vld [vmem:[#allocation113_spill] sm:$0xff] }
 0x497   : > { %v9276_v8 = vpop.permute.xlu1 %3179  ;;  %v3685_v62 = vadd.f32 %v10470_v61, %v3589_v22  ;;  %v3495_v30 = vadd.f32 %v10473_v60, %v3399_v26  ;;  %v10476_v28 = vpack.c.bf16 %v10474_v37, %v10475_v16  ;;  %v10479_v20 = vld [vmem:[#allocation127_spill] sm:$0xff]  ;;  %v10488_v24 = vld [vmem:[#allocation116_spill] sm:$0xff] }
 0x498   : > { %3193 = vrot.lane.b32.xlu0 %v9184_v7, %s5861_s17  ;;  %v3400_v7 = vadd.f32 %v10466_v33, %v3304_v43  ;;  %v3718_v22 = vmul.f32 %v3686_v58, %v10478_v5  ;;  %v3306_v3 = vadd.f32 %v10479_v20, %v3210_v15  ;;  %v3106_v27 = vsel %vm10481_vm13, %v3102_v10, %v10480_v4  ;;  %v10482_v43 = vld [vmem:[#allocation122_spill] sm:$0xff]  ;;  %v10483_v55 = vld [vmem:[#allocation111_spill] sm:$0xff]  ;;  %v10489_v61 = vld [vmem:[#allocation132_spill] sm:$0xff] }
 0x499   : > { %3575 = vrot.lane.b32.xlu1 %v9121_v44, %s10390_s29  ;;  %v3305_v23 = vadd.f32 %v10482_v43, %v3209_v17  ;;  %v10484_v38 = vld [vmem:[#allocation131_spill] sm:$0xff]  ;;  %v3591_v9 = vadd.f32 %v10488_v24, %v3495_v30  ;;  %v10490_v15 = vld [vmem:[#allocation129_spill] sm:$0xff]  ;;  %v10496_v30 = vld [vmem:[#allocation130_spill] sm:$0xff] }
 0x49a   : > { %v9288_v2 = vpop.permute.xlu0 %3177  ;;  %v3496_v18 = vadd.f32 %v10472_v35, %v3400_v7  ;;  %v3402_v33 = vadd.f32 %v10484_v38, %v3306_v3  ;;  %v10485_v58 = vld [vmem:[#allocation11_spill] sm:$0xff]  ;;  %v10495_v17 = vld [vmem:[#allocation133_spill] sm:$0xff]  ;;  %v10497_v3 = vld [vmem:[#allocation134_spill] sm:$0xff] }
 0x49b   : > { %v9294_v47 = vpop.permute.xlu1 %3559  ;;  %v3717_v7 = vmul.f32 %v3685_v62, %v10485_v58  ;;  %v3401_v59 = vadd.f32 %v10489_v61, %v3305_v23  ;;  %v10493_v62 = vld [vmem:[#allocation66_spill] sm:$0xff]  ;;  %v3687_v20 = vadd.f32 %v10496_v30, %v3591_v9  ;;  %v10498_v43 = vld [vmem:[#allocation121_spill] sm:$0xff]  ;;  %v10505_v24 = vld [vmem:[#allocation123_spill] sm:$0xff] }
 0x49c   : > { %3573 = vrot.lane.b32.xlu0 %v9127_v29, %s10390_s29  ;;  %v3592_v6 = vadd.f32 %v10483_v55, %v3496_v18  ;;  %v10491_v18 = vrot.slane %v9127_v29, 1  ;;  %v3498_v23 = vadd.f32 %v10498_v43, %v3402_v33  ;;  %v10499_v55 = vld [vmem:[#allocation136_spill] sm:$0xff]  ;;  %v10503_v58 = vld [vmem:[#allocation14_spill] sm:$0xff]  ;;  %v10506_v33 = vld [vmem:[#allocation13_spill] sm:$0xff] }
 0x49d   : > { %3291 = vrot.lane.b32.xlu1 %v9239_v19, %s5862_s10  ;;  %3950 = vmatmul.mubr.bf16.gmra.mrb[36].mxu1 %v3746_v0  ;;  %v10486_v0 = vld [vmem:[#allocation68_spill] sm:$0xff]  ;;  %v3747_v16 = vpack.c.bf16 %v3718_v22, %v3717_v7  ;;  %v3497_v4 = vadd.f32 %v10497_v3, %v3401_v59  ;;  %v10500_v22 = vld [vmem:[#allocation54_spill] sm:$0xff]  ;;  %v3719_v61 = vmul.f32 %v3687_v20, %v10506_v33  ;;  %v10512_v3 = vld [vmem:[#allocation141_spill] sm:$0xff] }
 0x49e   : > { %v9308_v25 = vpop.permute.xlu0 %3557  ;;  %3957 = vmatprep.mubr.bf16.mxu1 %v10476_v28  ;;  %v3052_v32 = vadd.f32 %v10487_v48, %v10486_v0  ;;  %v3688_v35 = vadd.f32 %v10490_v15, %v3592_v6  ;;  %v3107_v37 = vsel %vm10492_vm3, %v10491_v18, %v3102_v10  ;;  %v10494_v28 = vld [vmem:[#allocation118_spill] sm:$0xff]  ;;  %v10501_v6 = vld [vmem:[#allocation52_spill] sm:$0xff]  ;;  %v10508_v18 = vld [vmem:[#allocation105_spill] sm:$0xff] }
 0x49f   : > { %v9316_v57 = vpop.permute.xlu1 %3275  ;;  %v3051_v53 = vadd.f32 %v10494_v28, %v10493_v62  ;;  %v10502_v38 = vpack.c.bf16 %v10500_v22, %v10501_v6  ;;  %v10504_v48 = vld [vmem:[#allocation138_spill] sm:$0xff]  ;;  %v10507_v59 = vld [vmem:[#allocation112_spill] sm:$0xff]  ;;  %v10509_v62 = vld [vmem:[#allocation143_spill] sm:$0xff] }
 0x4a0   : > { %3289 = vrot.lane.b32.xlu0 %v9257_v41, %s5862_s10  ;;  %v3212_v5 = vadd.f32 %v10495_v17, %v3052_v32  ;;  %v3720_v7 = vmul.f32 %v3688_v35, %v10503_v58  ;;  %v3593_v15 = vadd.f32 %v10507_v59, %v3497_v4  ;;  %v10511_v17 = vld [vmem:[#allocation108_spill] sm:$0xff]  ;;  %v10513_v20 = vld [vmem:[#allocation69_spill] sm:$0xff]  ;;  %v10515_v22 = vld [vmem:[#allocation126_spill] sm:$0xff] }
 0x4a1   : > { %3671 = vrot.lane.b32.xlu1 %v3106_v27, %s5866_s11  ;;  %v3211_v1 = vadd.f32 %v10499_v55, %v3051_v53  ;;  %v10510_v53 = vld [vmem:[#allocation67_spill] sm:$0xff]  ;;  %v10516_v6 = vld [vmem:[#allocation154_spill] sm:$0xff]  ;;  %v10517_v58 = vld [vmem:[#allocation124_spill] sm:$0xff] }
 0x4a2   : > { %v9332_v26 = vpop.permute.xlu0 %3273  ;;  %v3308_v9 = vadd.f32 %v10505_v24, %v3212_v5  ;;  %v3054_v30 = vadd.f32 %v10511_v17, %v10510_v53  ;;  %v3748_v55 = vpack.c.bf16 %v3720_v7, %v3719_v61  ;;  %v10518_v24 = vld [vmem:[#allocation145_spill] sm:$0xff]  ;;  %v10519_v33 = vld [vmem:[#allocation128_spill] sm:$0xff]  ;;  %v10520_v61 = vld [vmem:[#allocation146_spill] sm:$0xff] }
 0x4a3   : > { %v9336_v60 = vpop.permute.xlu1 %3655  ;;  %v3307_v32 = vadd.f32 %v10504_v48, %v3211_v1  ;;  %v10514_v1 = vld [vmem:[#allocation114_spill] sm:$0xff]  ;;  %v3689_v48 = vadd.f32 %v10517_v58, %v3593_v15  ;;  %v10525_v17 = vld [vmem:[#allocation156_spill] sm:$0xff] }
 0x4a4   : > { %3669 = vrot.lane.b32.xlu0 %v3107_v37, %s5866_s11  ;;  %v3404_v28 = vadd.f32 %v10509_v62, %v3308_v9  ;;  %v3053_v4 = vadd.f32 %v10514_v1, %v10513_v20  ;;  %v3214_v9 = vadd.f32 %v10518_v24, %v3054_v30  ;;  %v10526_v30 = vld [vmem:[#allocation148_spill] sm:$0xff]  ;;  %v10527_v1 = vld [vmem:[#allocation137_spill] sm:$0xff]  ;;  %v10530_v58 = vld [vmem:[#allocation142_spill] sm:$0xff] }
 0x4a5   : > { %3387 = vrot.lane.b32.xlu1 %v3106_v27, %s5863_s20  ;;  %3958 = vmatmul.mubr.bf16.gmra.mrb[40].mxu1 %v3747_v16  ;;  %v3594_v16 = vadd.f32 %v10508_v18, %v3498_v23  ;;  %v3403_v23 = vadd.f32 %v10515_v22, %v3307_v32  ;;  %v10521_v32 = vld [vmem:[#allocation65_spill] sm:$0xff] }
 0x4a6   : > { %v9351_v10 = vpop.permute.xlu0 %3653  ;;  %3965 = vmatprep.mubr.bf16.mxu1 %v10502_v38  ;;  %v3500_v38 = vadd.f32 %v10516_v6, %v3404_v28  ;;  %v3213_v7 = vadd.f32 %v10519_v33, %v3053_v4  ;;  %v10524_v28 = vld [vmem:[#allocation16_spill] sm:$0xff]  ;;  %v3310_v15 = vadd.f32 %v10525_v17, %v3214_v9  ;;  %v10531_v33 = vld [vmem:[#allocation158_spill] sm:$0xff] }
 0x4a7   : > { %v9357_v0 = vpop.permute.xlu1 %3371  ;;  %v3690_v5 = vadd.f32 %v10512_v3, %v3594_v16  ;;  %v3499_v59 = vadd.f32 %v10520_v61, %v3403_v23  ;;  %v10522_v16 = vld [vmem:[#allocation63_spill] sm:$0xff] }
 0x4a8   : > { %3385 = vrot.lane.b32.xlu0 %v3107_v37, %s5863_s20  ;;  %v10523_v62 = vpack.c.bf16 %v10521_v32, %v10522_v16  ;;  %v3309_v20 = vadd.f32 %v10526_v30, %v3213_v7  ;;  %v3596_v22 = vadd.f32 %v10527_v1, %v3500_v38  ;;  %v10529_v23 = vld [vmem:[#allocation15_spill] sm:$0xff] }
 0x4a9   : > { %3039 = vrot.lane.b32.xlu1 %v9121_v44, %s5860_s16  ;;  %v3722_v53 = vmul.f32 %v3690_v5, %v10524_v28  ;;  %v3721_v6 = vmul.f32 %v3689_v48, %v10529_v23  ;;  %v3595_v24 = vadd.f32 %v10530_v58, %v3499_v59  ;;  %v10532_v61 = vld [vmem:[#allocation159_spill] sm:$0xff]  ;;  %v10534_v28 = vld [vmem:[#allocation161_spill] sm:$0xff]  ;;  %v10540_v23 = vld [vmem:[#allocation64_spill] sm:$0xff] }
 0x4aa   : > { %v9368_v35 = vpop.permute.xlu0 %3369  ;;  %v3405_v5 = vadd.f32 %v10531_v33, %v3309_v20  ;;  %v3692_v9 = vadd.f32 %v10532_v61, %v3596_v22  ;;  %v10533_v38 = vld [vmem:[#allocation155_spill] sm:$0xff]  ;;  %v10538_v59 = vld [vmem:[#allocation109_spill] sm:$0xff]  ;;  %v10539_v22 = vld [vmem:[#allocation18_spill] sm:$0xff] }
 0x4ab   : > { %v9373_v43 = vpop.permute.xlu1 %3023  ;;  %v3749_v7 = vpack.c.bf16 %v3722_v53, %v3721_v6  ;;  %v10537_v48 = vld [vmem:[#allocation147_spill] sm:$0xff]  ;;  %v3062_v20 = vadd.f32 %v9226_v34, %v10538_v59  ;;  %v10541_v6 = vld [vmem:[#allocation62_spill] sm:$0xff]  ;;  %v10545_v61 = vld [vmem:[#allocation77_spill] sm:$0xff] }
 0x4ac   : > { %3037 = vrot.lane.b32.xlu0 %v9127_v29, %s5860_s16  ;;  %v3501_v17 = vadd.f32 %v10534_v28, %v3405_v5  ;;  %v3724_v53 = vmul.f32 %v3692_v9, %v10539_v22  ;;  %v10542_v58 = vpack.c.bf16 %v10540_v23, %v10541_v6  ;;  %v10544_v33 = vld [vmem:[#allocation103_spill] sm:$0xff]  ;;  %v10548_v9 = vld [vmem:[#allocation140_spill] sm:$0xff]  ;;  %v10551_v6 = vld [vmem:[#allocation169_spill] sm:$0xff] }
 0x4ad   : > { %3483 = vrot.lane.b32.xlu1 %v9149_v31, %s5864_s19  ;;  %3966 = vmatmul.mubr.bf16.gmra.mrb[44].mxu1 %v3748_v55  ;;  %v10528_v55 = vld [vmem:[#allocation162_spill] sm:$0xff]  ;;  %v3222_v5 = vadd.f32 %v9276_v8, %v3062_v20 }
 0x4ae   : > { %v9387_v18 = vpop.permute.xlu0 %3021  ;;  %3973 = vmatprep.mubr.bf16.mxu1 %v10523_v62  ;;  %v3406_v4 = vadd.f32 %v10528_v55, %v3310_v15  ;;  %v3691_v62 = vadd.f32 %v10533_v38, %v3595_v24  ;;  %v10535_v15 = vld [vmem:[#allocation79_spill] sm:$0xff]  ;;  %v10546_v38 = vld [vmem:[#allocation144_spill] sm:$0xff] }
 0x4af   : > { %v3468_v3 = vpop.permute.xlu1 %3467  ;;  %v3055_v28 = vadd.f32 %v10546_v38, %v10545_v61  ;;  %v3318_v22 = vadd.f32 %v9316_v57, %v3222_v5  ;;  %v10554_v57 = vld [vmem:[#allocation167_spill] sm:$0xff] }
 0x4b0   : > { %3481 = vrot.lane.b32.xlu0 %v9157_v45, %s5864_s19  ;;  %v3502_v1 = vadd.f32 %v10537_v48, %v3406_v4  ;;  %v3061_v4 = vadd.f32 %v9248_v51, %v10544_v33  ;;  %v10549_v48 = vld [vmem:[#allocation135_spill] sm:$0xff]  ;;  %v10550_v51 = vld [vmem:[#allocation164_spill] sm:$0xff] }
 0x4b1   : > { %3199 = vrot.lane.b32.xlu1 %v3106_v27, %s5861_s17  ;;  %v10536_v27 = vld [vmem:[#allocation139_spill] sm:$0xff]  ;;  %v3215_v8 = vadd.f32 %v10550_v51, %v3055_v28  ;;  %v3414_v33 = vadd.f32 %v9357_v0, %v3318_v22 }
 0x4b2   : > { %v3466_v32 = vpop.permute.xlu0 %3465  ;;  %v3056_v30 = vadd.f32 %v10536_v27, %v10535_v15  ;;  %v3597_v27 = vadd.f32 %v10548_v9, %v3501_v17  ;;  %v3598_v59 = vadd.f32 %v10549_v48, %v3502_v1  ;;  %v10564_v51 = vld [vmem:[#allocation19_spill] sm:$0xff] }
 0x4b3   : > { %v9404_v16 = vpop.permute.xlu1 %3183  ;;  %v3311_v5 = vadd.f32 %v10554_v57, %v3215_v8  ;;  %v3510_v38 = vadd.f32 %v3468_v3, %v3414_v33  ;;  %v10563_v3 = vld [vmem:[#allocation152_spill] sm:$0xff] }
 0x4b4   : > { %3197 = vrot.lane.b32.xlu0 %v3107_v37, %s5861_s17  ;;  %v10543_v37 = vld [vmem:[#allocation165_spill] sm:$0xff]  ;;  %s261_s17 = scalar_lea.vmem %s9921_s5, %s5093_s28  ;;  %s5800_s28 = sshll.u32 %s5871_s18, 4  ;;  %s5801_s28 = int_to_ptr.vmem [resolvable:$false] %s5800_s28 }
 0x4b5   : > { %3579 = vrot.lane.b32.xlu1 %v8816_v54, %s10390_s29  ;;  %3974 = vmatmul.mubr.bf16.gmra.mrb[48].mxu1 %v3749_v7  ;;  %v3216_v24 = vadd.f32 %v10543_v37, %v3056_v30  ;;  %v10547_v7 = vld [vmem:[#allocation17_spill] sm:$0xff]  ;;  %v3221_v30 = vadd.f32 %v9288_v2, %v3061_v4  ;;  %v10553_v2 = vld [vmem:[#allocation151_spill] sm:$0xff] }
 0x4b6   : > { %v9417_v55 = vpop.permute.xlu0 %3181  ;;  %3981 = vmatprep.mubr.bf16.mxu1 %v10542_v58  ;;  %v3723_v15 = vmul.f32 %v3691_v62, %v10547_v7  ;;  %v3694_v62 = vadd.f32 %v10551_v6, %v3598_v59  ;;  %v10552_v58 = vld [vmem:[#allocation149_spill] sm:$0xff]  ;;  %v3693_v4 = vadd.f32 %v10553_v2, %v3597_v27  ;;  %v10558_v7 = vld [vmem:[#allocation76_spill] sm:$0xff] }
 0x4b7   : > { %v3564_v34 = vpop.permute.xlu1 %3563  ;;  %v3312_v17 = vadd.f32 %v10552_v58, %v3216_v24  ;;  %v3317_v37 = vadd.f32 %v9332_v26, %v3221_v30  ;;  %v10556_v24 = vld [vmem:[#allocation153_spill] sm:$0xff]  ;;  %v10557_v26 = vld [vmem:[#allocation168_spill] sm:$0xff]  ;;  %v10566_v58 = vld [vmem:[#allocation178_spill] sm:$0xff] }
 0x4b8   : > { %3577 = vrot.lane.b32.xlu0 %v8806_v39, %s10390_s29  ;;  %v3750_v23 = vpack.c.bf16 %v3724_v53, %v3723_v15  ;;  %v3407_v0 = vadd.f32 %v10557_v26, %v3311_v5  ;;  %v10559_v15 = vld [vmem:[#allocation74_spill] sm:$0xff]  ;;  %v10561_v27 = vld [vmem:[#allocation20_spill] sm:$0xff]  ;;  %v3606_v22 = vadd.f32 %v3564_v34, %v3510_v38  ;;  %v3725_v8 = vmul.f32 %v3693_v4, %v10564_v51  ;;  %v10567_v2 = vld [vmem:[#allocation177_spill] sm:$0xff] }
 0x4b9   : > { %3295 = vrot.lane.b32.xlu1 %v9149_v31, %s5862_s10  ;;  %v10555_v31 = vld [vmem:[#allocation171_spill] sm:$0xff]  ;;  %v3413_v53 = vadd.f32 %v9368_v35, %v3317_v37  ;;  %v10560_v9 = vpack.c.bf16 %v10558_v7, %v10559_v15  ;;  %v3726_v48 = vmul.f32 %v3694_v62, %v10561_v27  ;;  %v10569_v4 = vld [vmem:[#allocation180_spill] sm:$0xff]  ;;  %v10571_v26 = vld [vmem:[#allocation30_spill] sm:$0xff] }
 0x4ba   : > { %v3562_v20 = vpop.permute.xlu0 %3561  ;;  %v3408_v61 = vadd.f32 %v10555_v31, %v3312_v17  ;;  %v10570_v38 = vld [vmem:[#allocation31_spill] sm:$0xff]  ;;  %v10573_v15 = vld [vmem:[#allocation73_spill] sm:$0xff]  ;;  %v10579_v51 = vld [vmem:[#allocation186_spill] sm:$0xff] }
 0x4bb   : > { %v9442_v1 = vpop.permute.xlu1 %3279  ;;  %v3509_v30 = vadd.f32 %v3466_v32, %v3413_v53  ;;  %v10568_v32 = vld [vmem:[#allocation181_spill] sm:$0xff]  ;;  %v10572_v7 = vld [vmem:[#allocation75_spill] sm:$0xff] }
 0x4bc   : > { %3293 = vrot.lane.b32.xlu0 %v9157_v45, %s5862_s10  ;;  %v10562_v45 = vld [vmem:[#allocation173_spill] sm:$0xff] }
 0x4bd   : > { %3675 = vrot.lane.b32.xlu1 %v10556_v24, %s5866_s11  ;;  %3982 = vmatmul.mubr.bf16.gmra.mrb[52].mxu1 %v3750_v23  ;;  %v3504_v59 = vadd.f32 %v10562_v45, %v3408_v61  ;;  %v10565_v23 = vld [vmem:[#allocation175_spill] sm:$0xff]  ;;  %v3605_v37 = vadd.f32 %v3562_v20, %v3509_v30  ;;  %v3751_v61 = vpack.c.bf16 %v3726_v48, %v3725_v8  ;;  %v10575_v27 = vld [vmem:[#allocation93_spill] sm:$0xff]  ;;  %v10576_v48 = vld [vmem:[#allocation184_spill] sm:$0xff] }
 0x4be   : > { %v9453_v28 = vpop.permute.xlu0 %3277  ;;  %3989 = vmatprep.mubr.bf16.mxu1 %v10560_v9  ;;  %v3503_v6 = vadd.f32 %v10565_v23, %v3407_v0  ;;  %v10574_v9 = vpack.c.bf16 %v10572_v7, %v10573_v15  ;;  %v3059_v45 = vadd.f32 %v10576_v48, %v10575_v27  ;;  %v10580_v23 = vld [vmem:[#allocation95_spill] sm:$0xff] }
 0x4bf   : > { %v3660_v35 = vpop.permute.xlu1 %3659  ;;  %v3600_v17 = vadd.f32 %v10566_v58, %v3504_v59  ;;  %v10577_v59 = vld [vmem:[#allocation23_spill] sm:$0xff] }
 0x4c0   : > { %3673 = vrot.lane.b32.xlu0 %v10563_v3, %s5866_s11  ;;  %v3702_v33 = vadd.f32 %v3660_v35, %v3606_v22  ;;  %v3599_v57 = vadd.f32 %v10567_v2, %v3503_v6  ;;  %v3219_v8 = vadd.f32 %v10579_v51, %v3059_v45  ;;  %v10581_v6 = vld [vmem:[#allocation185_spill] sm:$0xff]  ;;  %v10583_v2 = vld [vmem:[#allocation187_spill] sm:$0xff] }
 0x4c1   : > { %3391 = vrot.lane.b32.xlu1 %v10556_v24, %s5863_s20  ;;  %v3696_v34 = vadd.f32 %v10568_v32, %v3600_v17  ;;  %v3060_v58 = vadd.f32 %v10581_v6, %v10580_v23  ;;  %v10582_v17 = vld [vmem:[#allocation48_spill] sm:$0xff]  ;;  %v10587_v7 = vld [vmem:[#allocation91_spill] sm:$0xff] }
 0x4c2   : > { %v3658_v62 = vpop.permute.xlu0 %3657  ;;  %v3695_v53 = vadd.f32 %v10569_v4, %v3599_v57  ;;  %v9475_v20 = vmul.f32 %v3702_v33, %v10570_v38 }
 0x4c3   : > { %v3701_v5 = vadd.f32 %v3658_v62, %v3605_v37  ;;  %v9469_v31 = vpop.permute.xlu1 %3375  ;;  %v3728_v30 = vmul.f32 %v3696_v34, %v10577_v59  ;;  %v5765_v37 = vld [vmem:[%s9919_s3 + $0x40] sm:$0xff]   ;;  %v3315_v62 = vadd.f32 %v9118_v12, %v3219_v8  ;;  %v3220_v57 = vadd.f32 %v10583_v2, %v3060_v58  ;;  %v5767_v12 = vld [vmem:[%s9919_s3 + $0x50] sm:$0xff]  }
 0x4c4   : > { %3389 = vrot.lane.b32.xlu0 %v10563_v3, %s5863_s20  ;;  %5447 = vmatprep.subr.bf16.mxu0 %v5765_v37  ;;  %v10594_v58 = vld [vmem:[#allocation28_spill] sm:$0xff] }
 0x4c5   : > { %v9478_v0 = vmul.f32 %v3701_v5, %v10571_v26  ;;  %3487 = vrot.lane.b32.xlu1 %v8124_v36, %s5864_s19  ;;  %3990 = vmatmul.mubr.bf16.gmra.mrb[56].mxu1 %v3751_v61  ;;  %v10578_v36 = vld [vmem:[#allocation22_spill] sm:$0xff]  ;;  %v3316_v61 = vadd.f32 %v9125_v50, %v3220_v57  ;;  %v3411_v4 = vadd.f32 %v9221_v56, %v3315_v62  ;;  %v10586_v26 = vld [vmem:[#allocation92_spill] sm:$0xff]  ;;  %v10589_v56 = vld [vmem:[#allocation49_spill] sm:$0xff] }
 0x4c6   : > { %v9482_v24 = vpop.permute.xlu0 %3373  ;;  %3997 = vmatprep.mubr.bf16.mxu1 %v10574_v9  ;;  %v3727_v3 = vmul.f32 %v3695_v53, %v10578_v36  ;;  %5563 = vmatprep.subr.bf16.mxu1 %v5765_v37  ;;  %v10584_v5 = vld [vmem:[#allocation46_spill] sm:$0xff]  ;;  %v10588_v15 = vpack.c.bf16 %v10586_v26, %v10587_v7  ;;  %v10590_v36 = vld [vmem:[#allocation100_spill] sm:$0xff] }
 0x4c7   : > { %v9490_v22 = vpop.permute.xlu1 %3027  ;;  %v3755_v35 = vpack.c.bf16 %v9475_v20, %v9478_v0  ;;  %5448 = vmatpush3.bf16.msra.mxu0 %v5765_v37  ;;  %v10585_v53 = vld [vmem:[#allocation50_spill] sm:$0xff]  ;;  %v3412_v9 = vadd.f32 %v9199_v11, %v3316_v61  ;;  %v3507_v50 = vadd.f32 %v9271_v21, %v3411_v4  ;;  %5571 = vmatpush3.bf16.msra.mxu1 %v5765_v37  ;;  %v10595_v37 = vld [vmem:[#allocation160_spill] sm:$0xff]  ;;  %v10603_v0 = vld [vmem:[#allocation179_spill] sm:$0xff] }
 0x4c8   : > { %3485 = vrot.lane.b32.xlu0 %v8867_v46, %s5864_s19  ;;  %v5766_v46 = vld [vmem:[%s9919_s3 + $0x48] sm:$0xff]   ;;  %v3752_v34 = vpack.c.bf16 %v3728_v30, %v3727_v3  ;;  %v10602_v20 = vld [vmem:[#allocation176_spill] sm:$0xff]  ;;  %s5089_s19 = sshll.u32 %s5928_s25, 4 }
 0x4c9   : > { %3583 = vrot.lane.b32.xlu1 %v10582_v17, %s10390_s29  ;;  %5449 = vmatprep.subr.bf16.mxu0 %v5766_v46  ;;  %v3508_v48 = vadd.f32 %v9251_v40, %v3412_v9  ;;  %v3603_v45 = vadd.f32 %v9308_v25, %v3507_v50  ;;  %v10591_v3 = vld [vmem:[#allocation106_spill] sm:$0xff]  ;;  %v10592_v25 = vld [vmem:[#allocation27_spill] sm:$0xff]  ;;  %s9874_s26 = scalar_lea.hbm %s9922_s6, %s5089_s19 }
 0x4ca   : > { %v9505_v33 = vpop.permute.xlu0 %3025  ;;  %5564 = vmatprep.subr.bf16.mxu1 %v5766_v46  ;;  %v3770_v51 = vpack.c.bf16 %v10591_v3, %v10590_v36  ;;  %v10596_v57 = vld [vmem:[#allocation150_spill] sm:$0xff]  ;;  %v10604_v3 = vld [vmem:[#allocation172_spill] sm:$0xff] }
 0x4cb   : > { %v3472_v32 = vpop.permute.xlu1 %3471  ;;  %5450 = vmatpush3.bf16.msra.mxu0 %v5766_v46  ;;  %v3604_v30 = vadd.f32 %v9294_v47, %v3508_v48  ;;  %v3699_v11 = vadd.f32 %v9351_v10, %v3603_v45  ;;  %5572 = vmatpush3.bf16.msra.mxu1 %v5766_v46  ;;  %v10593_v47 = vld [vmem:[#allocation163_spill] sm:$0xff]  ;;  %v3064_v46 = vadd.f32 %v9373_v43, %v10595_v37  ;;  %v10598_v9 = vld [vmem:[#allocation166_spill] sm:$0xff] }
 0x4cc   : > { %3581 = vrot.lane.b32.xlu0 %v10584_v5, %s10390_s29  ;;  %5451 = vmatprep.subr.bf16.mxu0 %v5767_v12  ;;  %v3063_v10 = vadd.f32 %v9387_v18, %v10593_v47  ;;  %v10599_v50 = vld [vmem:[#allocation170_spill] sm:$0xff]  ;;  %v5768_v48 = vld [vmem:[%s9919_s3 + $0x58] sm:$0xff]   ;;  %s5802_s29 = scalar_lea.vmem %s5801_s28, 32 }
 0x4cd   : > { %3679 = vrot.lane.b32.xlu1 %v10585_v53, %s5866_s11  ;;  %3998 = vmatmul.mubr.bf16.gmra.mrb[60].mxu1 %v3752_v34  ;;  %v3700_v8 = vadd.f32 %v9336_v60, %v3604_v30  ;;  %v3731_v23 = vmul.f32 %v3699_v11, %v10592_v25  ;;  %v3224_v52 = vadd.f32 %v9404_v16, %v3064_v46  ;;  %v10597_v34 = vld [vmem:[#allocation157_spill] sm:$0xff]  ;;  %v10601_v45 = vld [vmem:[#allocation6_spill] sm:$0xff] }
 0x4ce   : > { %v3470_v38 = vpop.permute.xlu0 %3469  ;;  %4005 = vmatprep.mubr.bf16.mxu1 %v10588_v15  ;;  %5565 = vmatprep.subr.bf16.mxu1 %v5767_v12  ;;  %v3223_v60 = vadd.f32 %v9417_v55, %v3063_v10  ;;  %v3771_v5 = vpack.c.bf16 %v10597_v34, %v10596_v57  ;;  %v10605_v25 = vld [vmem:[#allocation174_spill] sm:$0xff] }
 0x4cf   : > { %v9526_v27 = vpop.permute.xlu1 %3187  ;;  %5452 = vmatpush3.bf16.msra.mxu0 %v5767_v12  ;;  %5573 = vmatpush3.bf16.msra.mxu1 %v5767_v12  ;;  %v3732_v17 = vmul.f32 %v3700_v8, %v10594_v58  ;;  %v3320_v18 = vadd.f32 %v9442_v1, %v3224_v52  ;;  %v5770_v58 = vld [vmem:[%s9919_s3 + $0x68] sm:$0xff]  }
 0x4d0   : > { %3677 = vrot.lane.b32.xlu0 %v10589_v56, %s5866_s11  ;;  %v3319_v14 = vadd.f32 %v9453_v28, %v3223_v60  ;;  %v3772_v56 = vpack.c.bf16 %v10599_v50, %v10598_v9  ;;  %5453 = vmatprep.subr.bf16.mxu0 %v5768_v48  ;;  %s4884_s11 = sshll.u32 %s251_s13, 4  ;;  %s9876_s11 = int_to_ptr.vmem [resolvable:$true] %s4884_s11 }
 0x4d1   : > { %v3754_v2 = vpack.c.bf16 %v3732_v17, %v3731_v23  ;;  %v3416_v43 = vadd.f32 %v9469_v31, %v3320_v18  ;;  %v10600_v31 = vld [vmem:[#allocation5_spill] sm:$0xff]  ;;  %5566 = vmatprep.subr.bf16.mxu1 %v5768_v48  ;;  %v3065_v23 = vadd.f32 %v9505_v33, %v10605_v25  ;;  %s5796_s25 = scalar_lea.vmem %s9876_s11, 16  ;;  %p5803_p0 = scmp.lt.s32.totalorder %s9876_s11, %s5801_s28 }
 0x4d2   : > { %v9532_v59 = vpop.permute.xlu0 %3185  ;;  %v3415_v61 = vadd.f32 %v9482_v24, %v3319_v14  ;;  %p5797_p11 = scmp.ne.s32.totalorder %s9876_s11, %s5796_s25  ;;  %p5804_p1 = scmp.lt.s32.totalorder %s5802_s29, %s5796_s25 }
 0x4d3   : > { %v3568_v21 = vpop.permute.xlu1 %3567  ;;  %v3512_v12 = vadd.f32 %v3472_v32, %v3416_v43  ;;  %5454 = vmatpush3.bf16.msra.mxu0 %v5768_v48  ;;  %5574 = vmatpush3.bf16.msra.mxu1 %v5768_v48 }
 0x4d4   : > { %v3511_v55 = vadd.f32 %v3470_v38, %v3415_v61  ;;  %p5798_p12 = pnand %p5797_p11, %p5945_p5  ;;  %p5805_p2 = por %p5804_p1, %p5803_p0 }
 0x4d5   : > { %4006 = vmatmul.mubr.bf16.gmra.mrb[64].mxu1 %v3753_v42  ;;  %v3608_v28 = vadd.f32 %v3568_v21, %v3512_v12 }
 0x4d6   : > { %v3566_v40 = vpop.permute.xlu0 %3565  ;;  %4013 = vmatprep.mubr.bf16.mxu1 %v3770_v51  ;;  %v3066_v51 = vadd.f32 %v9490_v22, %v10604_v3  ;;  %v3225_v22 = vadd.f32 %v9532_v59, %v3065_v23  ;;  %p5799_p13 = pneg %p5798_p12 }
 0x4d7   : > { %v3284_v6 = vpop.permute.xlu1 %3283  ;;  %v3607_v16 = vadd.f32 %v3566_v40, %v3511_v55  ;;  %v5769_v40 = vld [vmem:[%s9919_s3 + $0x60] sm:$0xff]   ;;  %v10607_v55 = vld [vmem:[#allocation34_spill] sm:$0xff] }
 0x4d8   : > { %v3226_v47 = vadd.f32 %v9526_v27, %v3066_v51  ;;  %5455 = vmatprep.subr.bf16.mxu0 %v5769_v40  ;;  %5567 = vmatprep.subr.bf16.mxu1 %v5769_v40  ;;  %p5806_p3 = pnand %p5805_p2, %p5799_p13 }
 0x4d9   : > { %5456 = vmatpush3.bf16.msra.mxu0 %v5769_v40  ;;  %5575 = vmatpush3.bf16.msra.mxu1 %v5769_v40 }
 0x4da   : > { %v3282_v62 = vpop.permute.xlu0 %3281  ;;  %v3322_v17 = vadd.f32 %v3284_v6, %v3226_v47  ;;  %5457 = vmatprep.subr.bf16.mxu0 %v5770_v58  ;;  %5568 = vmatprep.subr.bf16.mxu1 %v5770_v58 }
 0x4db   : > { %v3664_v42 = vpop.permute.xlu1 %3663  ;;  %v3321_v46 = vadd.f32 %v3282_v62, %v3225_v22 }
 0x4dc   : > { %v3704_v1 = vadd.f32 %v3664_v42, %v3608_v28  ;;  %v5771_v42 = vld [vmem:[%s9919_s3 + $0x70] sm:$0xff]   ;;  %v3774_v28 = vpack.c.bf16 %v9085_v49, %v9062_v13 }
 0x4dd   : > { %4014 = vmatmul.mubr.bf16.gmra.mrb[68].mxu1 %v3754_v2  ;;  %5458 = vmatpush3.bf16.msra.mxu0 %v5770_v58 }
 0x4de   : > { %v3662_v4 = vpop.permute.xlu0 %3661  ;;  %4021 = vmatprep.mubr.bf16.mxu1 %v3771_v5  ;;  %v3736_v30 = vmul.f32 %v3704_v1, %v10601_v45  ;;  %5576 = vmatpush3.bf16.msra.mxu1 %v5770_v58  ;;  %v5772_v5 = vld [vmem:[%s9919_s3 + $0x78] sm:$0xff]   ;;  %v10608_v1 = vld [vmem:[#allocation182_spill] sm:$0xff]  ;;  %v10610_v58 = vld [vmem:[#allocation37_spill] sm:$0xff] }
 0x4df   : > { %v3380_v53 = vpop.permute.xlu1 %3379  ;;  %v3703_v7 = vadd.f32 %v3662_v4, %v3607_v16  ;;  %5459 = vmatprep.subr.bf16.mxu0 %v5771_v42  ;;  %5569 = vmatprep.subr.bf16.mxu1 %v5771_v42  ;;  %v10606_v4 = vld [vmem:[#allocation35_spill] sm:$0xff] }
 0x4e0   : > { %v3418_v60 = vadd.f32 %v3380_v53, %v3322_v17  ;;  %v10611_v17 = vld [vmem:[#allocation21_spill] sm:$0xff] }
 0x4e1   : > { %v3735_v38 = vmul.f32 %v3703_v7, %v10600_v31  ;;  %5460 = vmatpush3.bf16.msra.mxu0 %v5771_v42 }
 0x4e2   : > { %v3378_v26 = vpop.permute.xlu0 %3377  ;;  %5577 = vmatpush3.bf16.msra.mxu1 %v5771_v42  ;;  %5461 = vmatprep.subr.bf16.mxu0 %v5772_v5 }
 0x4e3   : > { %v9556_v15 = vpop.permute.xlu1 %3031  ;;  %v3756_v36 = vpack.c.bf16 %v3736_v30, %v3735_v38  ;;  %v3417_v52 = vadd.f32 %v3378_v26, %v3321_v46  ;;  %5570 = vmatprep.subr.bf16.mxu1 %v5772_v5 }
 0x4e4   : > { %v3068_v31 = vadd.f32 %v9556_v15, %v10608_v1 }
 0x4e5   : > { %4022 = vmatmul.mubr.bf16.gmra.mrb[72].mxu1 %v3755_v35  ;;  %v3773_v35 = vpack.c.bf16 %v10603_v0, %v10602_v20  ;;  %5462 = vmatpush3.bf16.msra.mxu0 %v5772_v5 }
 0x4e6   : > { %v9563_v24 = vpop.permute.xlu0 %3029  ;;  %4029 = vmatprep.mubr.bf16.mxu1 %v3772_v56  ;;  %5578 = vmatpush3.bf16.msra.mxu1 %v5772_v5 }
 0x4e7   : > { %v3476_v32 = vpop.permute.xlu1 %3475 }
 0x4e8   : > { %v3514_v27 = vadd.f32 %v3476_v32, %v3418_v60  ;;  %v10609_v32 = vld [vmem:[#allocation183_spill] sm:$0xff] }
 0x4e9   : > { %v3067_v48 = vadd.f32 %v9563_v24, %v10609_v32  ;;  %v9604_v24 = vld [vmem:[%s9919_s3 + $0x80] sm:$0xff]  }
 0x4ea   : > { %v3474_v11 = vpop.permute.xlu0 %3473  ;;  %5495 = vmatprep.subr.bf16.mxu0 %v9604_v24 }
 0x4eb   : > { %v9570_v21 = vpop.permute.xlu1 %3191  ;;  %v3513_v2 = vadd.f32 %v3474_v11, %v3417_v52  ;;  %v3775_v52 = vpack.c.bf16 %v9121_v44, %v9127_v29 }
 0x4ec   : > { %v3228_v45 = vadd.f32 %v9570_v21, %v3068_v31 }
 0x4ed   : > { %4030 = vmatmul.mubr.bf16.gmra.mrb[76].mxu1 %v3756_v36 }
 0x4ee   : > { %v3190_v8 = vpop.permute.xlu0 %3189  ;;  %4037 = vmatprep.mubr.bf16.mxu1 %v3773_v35 }
 0x4ef   : > { %v3572_v10 = vpop.permute.xlu1 %3571  ;;  %v3227_v11 = vadd.f32 %v3190_v8, %v3067_v48 }
 0x4f0   : > { %v3610_v59 = vadd.f32 %v3572_v10, %v3514_v27 }
 0x4f2   : > { %v3570_v37 = vpop.permute.xlu0 %3569 }
 0x4f3   : > { %v3288_v33 = vpop.permute.xlu1 %3287  ;;  %v3609_v57 = vadd.f32 %v3570_v37, %v3513_v2 }
 0x4f4   : > { %v3324_v36 = vadd.f32 %v3288_v33, %v3228_v45 }
 0x4f6   : > { %v3286_v14 = vpop.permute.xlu0 %3285 }
 0x4f7   : > { %v3668_v6 = vpop.permute.xlu1 %3667  ;;  %v3323_v13 = vadd.f32 %v3286_v14, %v3227_v11 }
 0x4f8   : > { %v3706_v34 = vadd.f32 %v3668_v6, %v3610_v59  ;;  %v10612_v59 = vld [vmem:[#allocation188_spill] sm:$0xff] }
 0x4fa   : > { %v3666_v62 = vpop.permute.xlu0 %3665  ;;  %v3738_v43 = vmul.f32 %v3706_v34, %v10606_v4 }
 0x4fb   : > { %v3705_v18 = vadd.f32 %v3666_v62, %v3609_v57  ;;  %v3384_v61 = vpop.permute.xlu1 %3383 }
 0x4fc   : > { %v3420_v49 = vadd.f32 %v3384_v61, %v3324_v36 }
 0x4fd   : > { %v3737_v53 = vmul.f32 %v3705_v18, %v10607_v55 }
 0x4fe   : > { %v3382_v12 = vpop.permute.xlu0 %3381 }
 0x4ff   : > { %v3036_v16 = vpop.permute.xlu1 %3035  ;;  %v3757_v26 = vpack.c.bf16 %v3738_v43, %v3737_v53  ;;  %v3419_v35 = vadd.f32 %v3382_v12, %v3323_v13  ;;  %v3776_v13 = vpack.c.bf16 %v8816_v54, %v8806_v39  ;;  %v10616_v54 = vld [vmem:[#allocation40_spill] sm:$0xff] }
 0x500   : > { %v3070_v6 = vadd.f32 %v3036_v16, %v10612_v59 }
 0x501   : > { %4038 = vmatmul.mubr.bf16.gmra.mrb[80].mxu1 %v3757_v26 }
 0x502   : > { %v3034_v7 = vpop.permute.xlu0 %3033  ;;  %4045 = vmatprep.mubr.bf16.mxu1 %v3774_v28 }
 0x503   : > { %v3480_v9 = vpop.permute.xlu1 %3479  ;;  %v3069_v34 = vadd.f32 %v3034_v7, %v9112_v63  ;;  %v10613_v7 = vld [vmem:[#allocation25_spill] sm:$0xff] }
 0x504   : > { %v3516_v3 = vadd.f32 %v3480_v9, %v3420_v49 }
 0x506   : > { %v3478_v50 = vpop.permute.xlu0 %3477 }
 0x507   : > { %v3196_v56 = vpop.permute.xlu1 %3195  ;;  %v3515_v40 = vadd.f32 %v3478_v50, %v3419_v35 }
 0x508   : > { %v3230_v62 = vadd.f32 %v3196_v56, %v3070_v6 }
 0x50a   : > { %v3194_v38 = vpop.permute.xlu0 %3193 }
 0x50b   : > { %v3576_v30 = vpop.permute.xlu1 %3575  ;;  %v3229_v18 = vadd.f32 %v3194_v38, %v3069_v34  ;;  %v10614_v38 = vld [vmem:[#allocation24_spill] sm:$0xff] }
 0x50c   : > { %v3612_v25 = vadd.f32 %v3576_v30, %v3516_v3 }
 0x50e   : > { %v3574_v20 = vpop.permute.xlu0 %3573 }
 0x50f   : > { %v3292_v0 = vpop.permute.xlu1 %3291  ;;  %v3611_v15 = vadd.f32 %v3574_v20, %v3515_v40 }
 0x510   : > { %v3326_v61 = vadd.f32 %v3292_v0, %v3230_v62 }
 0x512   : > { %v3290_v51 = vpop.permute.xlu0 %3289 }
 0x513   : > { %v3672_v23 = vpop.permute.xlu1 %3671  ;;  %v3325_v43 = vadd.f32 %v3290_v51, %v3229_v18 }
 0x514   : > { %v3708_v47 = vadd.f32 %v3672_v23, %v3612_v25 }
 0x516   : > { %v3670_v10 = vpop.permute.xlu0 %3669  ;;  %v3740_v22 = vmul.f32 %v3708_v47, %v10610_v58 }
 0x517   : > { %v3707_v21 = vadd.f32 %v3670_v10, %v3611_v15  ;;  %v3388_v8 = vpop.permute.xlu1 %3387 }
 0x518   : > { %v3422_v55 = vadd.f32 %v3388_v8, %v3326_v61 }
 0x519   : > { %v3739_v37 = vmul.f32 %v3707_v21, %v10611_v17 }
 0x51a   : > { %v3386_v46 = vpop.permute.xlu0 %3385 }
 0x51b   : > { %v3040_v60 = vpop.permute.xlu1 %3039  ;;  %v3758_v33 = vpack.c.bf16 %v3740_v22, %v3739_v37  ;;  %v3421_v29 = vadd.f32 %v3386_v46, %v3325_v43  ;;  %v10615_v22 = vld [vmem:[#allocation41_spill] sm:$0xff] }
 0x51c   : > { %v3072_v63 = vadd.f32 %v3040_v60, %v9239_v19  ;;  %v9624_v60 = vld [vmem:[%s9920_s4 + $0x2] ss:$0 sm:$0xff] }
 0x51d   : > { %4046 = vmatmul.mubr.bf16.gmra.mrb[84].mxu1 %v3758_v33 }
 0x51e   : > { %v3038_v27 = vpop.permute.xlu0 %3037  ;;  %4053 = vmatprep.mubr.bf16.mxu1 %v3775_v52 }
 0x51f   : > { %v3484_v14 = vpop.permute.xlu1 %3483  ;;  %v3071_v30 = vadd.f32 %v3038_v27, %v9257_v41 }
 0x520   : > { %v3518_v44 = vadd.f32 %v3484_v14, %v3422_v55 }
 0x522   : > { %v3482_v42 = vpop.permute.xlu0 %3481 }
 0x523   : > { %v3200_v2 = vpop.permute.xlu1 %3199  ;;  %v3517_v26 = vadd.f32 %v3482_v42, %v3421_v29 }
 0x524   : > { %v3232_v11 = vadd.f32 %v3200_v2, %v3072_v63 }
 0x526   : > { %v3198_v57 = vpop.permute.xlu0 %3197 }
 0x527   : > { %v3580_v5 = vpop.permute.xlu1 %3579  ;;  %v3231_v49 = vadd.f32 %v3198_v57, %v3071_v30 }
 0x528   : > { %v3614_v28 = vadd.f32 %v3580_v5, %v3518_v44 }
 0x52a   : > { %v3578_v4 = vpop.permute.xlu0 %3577 }
 0x52b   : > { %v3296_v53 = vpop.permute.xlu1 %3295  ;;  %v3613_v50 = vadd.f32 %v3578_v4, %v3517_v26 }
 0x52c   : > { %v3328_v0 = vadd.f32 %v3296_v53, %v3232_v11 }
 0x52e   : > { %v3294_v12 = vpop.permute.xlu0 %3293 }
 0x52f   : > { %v3676_v9 = vpop.permute.xlu1 %3675  ;;  %v3327_v3 = vadd.f32 %v3294_v12, %v3231_v49 }
 0x530   : > { %v3710_v1 = vadd.f32 %v3676_v9, %v3614_v28 }
 0x532   : > { %v3674_v16 = vpop.permute.xlu0 %3673  ;;  %v3742_v56 = vmul.f32 %v3710_v1, %v10613_v7  ;;  %v5774_v1 = vld [vmem:[%s9919_s3 + $0x88] sm:$0xff]   ;;  %v5775_v7 = vld [vmem:[%s9919_s3 + $0x90] sm:$0xff]  }
 0x533   : > { %v3709_v31 = vadd.f32 %v3674_v16, %v3613_v50  ;;  %v3392_v32 = vpop.permute.xlu1 %3391 }
 0x534   : > { %v3424_v19 = vadd.f32 %v3392_v32, %v3328_v0 }
 0x535   : > { %v3741_v48 = vmul.f32 %v3709_v31, %v10614_v38 }
 0x536   : > { %v3390_v45 = vpop.permute.xlu0 %3389 }
 0x537   : > { %v3488_v36 = vpop.permute.xlu1 %3487  ;;  %v3759_v20 = vpack.c.bf16 %v3742_v56, %v3741_v48  ;;  %v3423_v40 = vadd.f32 %v3390_v45, %v3327_v3 }
 0x538   : > { %v3520_v25 = vadd.f32 %v3488_v36, %v3424_v19 }
 0x539   : > { %4054 = vmatmul.mubr.bf16.gmra.mrb[88].mxu1 %v3759_v20 }
 0x53a   : > { %v3486_v35 = vpop.permute.xlu0 %3485  ;;  %4061 = vmatprep.mubr.bf16.mxu1 %v3776_v13 }
 0x53b   : > { %v3584_v51 = vpop.permute.xlu1 %3583  ;;  %v3519_v15 = vadd.f32 %v3486_v35, %v3423_v40  ;;  %v5777_v35 = vld [vmem:[%s9919_s3 + $0xa0] sm:$0xff]  }
 0x53c   : > { %v3616_v47 = vadd.f32 %v3584_v51, %v3520_v25 }
 0x53e   : > { %v3582_v23 = vpop.permute.xlu0 %3581 }
 0x53f   : > { %v3680_v41 = vpop.permute.xlu1 %3679  ;;  %v3615_v10 = vadd.f32 %v3582_v23, %v3519_v15 }
 0x540   : > { %v3712_v21 = vadd.f32 %v3680_v41, %v3616_v47  ;;  %v5778_v47 = vld [vmem:[%s9919_s3 + $0xa8] sm:$0xff]  }
 0x542   : > { %v3678_v8 = vpop.permute.xlu0 %3677  ;;  %v3744_v39 = vmul.f32 %v3712_v21, %v10615_v22 }
 0x543   : > { %v3711_v58 = vadd.f32 %v3678_v8, %v3615_v10 }
 0x545   : > { %v3743_v17 = vmul.f32 %v3711_v58, %v10616_v54  ;;  %v5779_v58 = vld [vmem:[%s9919_s3 + $0xb0] sm:$0xff]  }
 0x547   : > { %v3760_v37 = vpack.c.bf16 %v3744_v39, %v3743_v17 }
 0x549   : > { %4062 = vmatmul.mubr.bf16.gmra.mrb[92].mxu1 %v3760_v37 }
 0x568   : > { %v5246_v46 = vpop.f32.mrb[32].mxu1 }
 0x569   : > { %v5247_v33 = vpop.f32.mrb[33].mxu1 }
 0x56a   : > { %v5248_v52 = vadd.f32 %v5247_v33, %v5246_v46  ;;  %v5249_v27 = vpop.f32.mrb[34].mxu1 }
 0x56b   : > { %v5250_v14 = vpop.f32.mrb[35].mxu1 }
 0x56c   : > { %v3944_v42 = vadd.f32 %v5248_v52, %v9624_v60  ;;  %v5251_v2 = vadd.f32 %v5250_v14, %v5249_v27  ;;  %v5780_v52 = vld [vmem:[%s9919_s3 + $0xb8] sm:$0xff]  }
 0x56e   : > { %v3947_v59 = vadd.f32 %v5251_v2, %v9624_v60  ;;  %v4070_v6 = vmax.f32 %v3944_v42, 0.0 }
 0x570   : > { %v4071_v57 = vmax.f32 %v3947_v59, 0.0  ;;  %v5252_v34 = vpop.f32.mrb[36].mxu1 }
 0x571   : > { %v5253_v62 = vpop.f32.mrb[37].mxu1 }
 0x572   : > { %v5254_v5 = vadd.f32 %v5253_v62, %v5252_v34  ;;  %v5255_v18 = vpop.f32.mrb[38].mxu1  ;;  %v4102_v61 = vpack.c.bf16 %v4071_v57, %v4070_v6 }
 0x573   : > { %v5256_v4 = vpop.f32.mrb[39].mxu1 }
 0x574   : > { %v3952_v43 = vadd.f32 %v5254_v5, %v9624_v60  ;;  %v5257_v55 = vadd.f32 %v5256_v4, %v5255_v18  ;;  %5463 = vmatprep.mubr.bf16.mxu0 %v4102_v61 }
 0x576   : > { %v3955_v53 = vadd.f32 %v5257_v55, %v9624_v60  ;;  %v4072_v29 = vmax.f32 %v3952_v43, 0.0 }
 0x578   : > { %v4073_v44 = vmax.f32 %v3955_v53, 0.0  ;;  %v5258_v12 = vpop.f32.mrb[40].mxu1 }
 0x579   : > { %v5259_v26 = vpop.f32.mrb[41].mxu1 }
 0x57a   : > { %v4103_v28 = vpack.c.bf16 %v4073_v44, %v4072_v29  ;;  %v5260_v9 = vadd.f32 %v5259_v26, %v5258_v12  ;;  %v5261_v50 = vpop.f32.mrb[42].mxu1 }
 0x57b   : > { %v5262_v16 = vpop.f32.mrb[43].mxu1 }
 0x57c   : > { %v3960_v31 = vadd.f32 %v5260_v9, %v9624_v60  ;;  %v5263_v32 = vadd.f32 %v5262_v16, %v5261_v50  ;;  %5464 = vmatmul.mubr.bf16.vlgmr.msra.gmra.mrb[64].mxu0 %v4103_v28 }
 0x57d   : > { %5496 = vmatpush3.bf16.msra.mxu0 %v9604_v24  ;;  %v5776_v24 = vld [vmem:[%s9919_s3 + $0x98] sm:$0xff]  }
 0x57e   : > { %v3963_v63 = vadd.f32 %v5263_v32, %v9624_v60  ;;  %5497 = vmatprep.subr.bf16.mxu0 %v5774_v1  ;;  %v4074_v56 = vmax.f32 %v3960_v31, 0.0 }
 0x580   : > { %v4075_v38 = vmax.f32 %v3963_v63, 0.0  ;;  %v5264_v48 = vpop.f32.mrb[44].mxu1 }
 0x581   : > { %v5265_v45 = vpop.f32.mrb[45].mxu1  ;;  %5498 = vmatpush3.bf16.msra.mxu0 %v5774_v1 }
 0x582   : > { %v5266_v30 = vadd.f32 %v5265_v45, %v5264_v48  ;;  %v5267_v11 = vpop.f32.mrb[46].mxu1  ;;  %v4104_v36 = vpack.c.bf16 %v4075_v38, %v4074_v56  ;;  %5499 = vmatprep.subr.bf16.mxu0 %v5775_v7 }
 0x583   : > { %v5268_v20 = vpop.f32.mrb[47].mxu1 }
 0x584   : > { %v3968_v13 = vadd.f32 %v5266_v30, %v9624_v60  ;;  %v5269_v49 = vadd.f32 %v5268_v20, %v5267_v11  ;;  %5467 = vmatprep.mubr.bf16.mxu0 %v4104_v36 }
 0x585   : > { %5500 = vmatpush3.bf16.msra.mxu0 %v5775_v7 }
 0x586   : > { %v3971_v0 = vadd.f32 %v5269_v49, %v9624_v60  ;;  %5501 = vmatprep.subr.bf16.mxu0 %v5776_v24  ;;  %v4076_v3 = vmax.f32 %v3968_v13, 0.0 }
 0x588   : > { %v4077_v19 = vmax.f32 %v3971_v0, 0.0  ;;  %v5270_v51 = vpop.f32.mrb[48].mxu1 }
 0x589   : > { %v5271_v40 = vpop.f32.mrb[49].mxu1  ;;  %5502 = vmatpush3.bf16.msra.mxu0 %v5776_v24  ;;  %v10617_v24 = vld [vmem:[#allocation26_spill] sm:$0xff] }
 0x58a   : > { %v5272_v25 = vadd.f32 %v5271_v40, %v5270_v51  ;;  %v5273_v23 = vpop.f32.mrb[50].mxu1  ;;  %v4105_v15 = vpack.c.bf16 %v4077_v19, %v4076_v3  ;;  %5503 = vmatprep.subr.bf16.mxu0 %v5777_v35 }
 0x58b   : > { %v5274_v41 = vpop.f32.mrb[51].mxu1 }
 0x58c   : > { %v3976_v10 = vadd.f32 %v5272_v25, %v9624_v60  ;;  %v5275_v21 = vadd.f32 %v5274_v41, %v5273_v23  ;;  %5468 = vmatmul.mubr.bf16.gmra.mrb[68].mxu0 %v4105_v15  ;;  %v10618_v15 = vld [vmem:[#allocation29_spill] sm:$0xff] }
 0x58d   : > { %5504 = vmatpush3.bf16.msra.mxu0 %v5777_v35 }
 0x58e   : > { %v3979_v8 = vadd.f32 %v5275_v21, %v9624_v60  ;;  %5505 = vmatprep.subr.bf16.mxu0 %v5778_v47  ;;  %v4078_v22 = vmax.f32 %v3976_v10, 0.0 }
 0x590   : > { %v4079_v39 = vmax.f32 %v3979_v8, 0.0  ;;  %v5276_v54 = vpop.f32.mrb[52].mxu1 }
 0x591   : > { %v5277_v17 = vpop.f32.mrb[53].mxu1  ;;  %5506 = vmatpush3.bf16.msra.mxu0 %v5778_v47  ;;  %v10619_v47 = vld [vmem:[#allocation32_spill] sm:$0xff] }
 0x592   : > { %v5278_v37 = vadd.f32 %v5277_v17, %v5276_v54  ;;  %v5279_v46 = vpop.f32.mrb[54].mxu1  ;;  %v4106_v33 = vpack.c.bf16 %v4079_v39, %v4078_v22  ;;  %5507 = vmatprep.subr.bf16.mxu0 %v5779_v58 }
 0x593   : > { %v5280_v27 = vpop.f32.mrb[55].mxu1 }
 0x594   : > { %v3984_v14 = vadd.f32 %v5278_v37, %v9624_v60  ;;  %v5281_v42 = vadd.f32 %v5280_v27, %v5279_v46  ;;  %5471 = vmatprep.mubr.bf16.mxu0 %v4106_v33  ;;  %v10620_v33 = vld [vmem:[#allocation33_spill] sm:$0xff] }
 0x595   : > { %5508 = vmatpush3.bf16.msra.mxu0 %v5779_v58 }
 0x596   : > { %v3987_v2 = vadd.f32 %v5281_v42, %v9624_v60  ;;  %5509 = vmatprep.subr.bf16.mxu0 %v5780_v52  ;;  %v4080_v59 = vmax.f32 %v3984_v14, 0.0 }
 0x598   : > { %v4081_v6 = vmax.f32 %v3987_v2, 0.0  ;;  %v5282_v57 = vpop.f32.mrb[56].mxu1 }
 0x599   : > { %v5283_v34 = vpop.f32.mrb[57].mxu1  ;;  %5510 = vmatpush3.bf16.msra.mxu0 %v5780_v52  ;;  %v10621_v52 = vld [vmem:[#allocation36_spill] sm:$0xff] }
 0x59a   : > { %v5284_v62 = vadd.f32 %v5283_v34, %v5282_v57  ;;  %v5285_v5 = vpop.f32.mrb[58].mxu1  ;;  %v4107_v18 = vpack.c.bf16 %v4081_v6, %v4080_v59 }
 0x59b   : > { %v5286_v61 = vpop.f32.mrb[59].mxu1 }
 0x59c   : > { %v3992_v4 = vadd.f32 %v5284_v62, %v9624_v60  ;;  %v5287_v43 = vadd.f32 %v5286_v61, %v5285_v5  ;;  %5472 = vmatmul.mubr.bf16.gmra.mrb[72].mxu0 %v4107_v18  ;;  %v10622_v61 = vld [vmem:[#allocation38_spill] sm:$0xff] }
 0x59e   : > { %v3995_v55 = vadd.f32 %v5287_v43, %v9624_v60  ;;  %v4082_v53 = vmax.f32 %v3992_v4, 0.0  ;;  %v10623_v4 = vld [vmem:[#allocation39_spill] sm:$0xff] }
 0x5a0   : > { %v4083_v29 = vmax.f32 %v3995_v55, 0.0  ;;  %v5288_v44 = vpop.f32.mrb[60].mxu1 }
 0x5a1   : > { %v5289_v12 = vpop.f32.mrb[61].mxu1 }
 0x5a2   : > { %v5290_v26 = vadd.f32 %v5289_v12, %v5288_v44  ;;  %v5291_v28 = vpop.f32.mrb[62].mxu1  ;;  %v4108_v9 = vpack.c.bf16 %v4083_v29, %v4082_v53  ;;  %v10624_v44 = vld [vmem:[#allocation42_spill] sm:$0xff]  ;;  %v10625_v12 = vld [vmem:[#allocation43_spill] sm:$0xff] }
 0x5a3   : > { %v5292_v50 = vpop.f32.mrb[63].mxu1 }
 0x5a4   : > { %v4000_v1 = vadd.f32 %v5290_v26, %v9624_v60  ;;  %v5293_v16 = vadd.f32 %v5292_v50, %v5291_v28  ;;  %5475 = vmatprep.mubr.bf16.mxu0 %v4108_v9  ;;  %v10626_v28 = vld [vmem:[#allocation47_spill] sm:$0xff] }
 0x5a5   : > { %v10627_v50 = vld [vmem:[#allocation51_spill] sm:$0xff] }
 0x5a6   : > { %v4003_v31 = vadd.f32 %v5293_v16, %v9624_v60  ;;  %v4084_v32 = vmax.f32 %v4000_v1, 0.0 }
 0x5a8   : > { %v4085_v63 = vmax.f32 %v4003_v31, 0.0  ;;  %v5294_v7 = vpop.f32.mrb[64].mxu1 }
 0x5a9   : > { %v5295_v56 = vpop.f32.mrb[65].mxu1 }
 0x5aa   : > { %v5296_v38 = vadd.f32 %v5295_v56, %v5294_v7  ;;  %v5297_v48 = vpop.f32.mrb[66].mxu1  ;;  %v4109_v45 = vpack.c.bf16 %v4085_v63, %v4084_v32 }
 0x5ab   : > { %v5298_v30 = vpop.f32.mrb[67].mxu1 }
 0x5ac   : > { %v4008_v11 = vadd.f32 %v5296_v38, %v9624_v60  ;;  %v5299_v36 = vadd.f32 %v5298_v30, %v5297_v48  ;;  %5476 = vmatmul.mubr.bf16.gmra.mrb[76].mxu0 %v4109_v45  ;;  %v10628_v48 = vld [vmem:[#allocation60_spill] sm:$0xff]  ;;  %v10629_v45 = vld [vmem:[#allocation61_spill] sm:$0xff] }
 0x5ad   : > { %5511 = vmatprep.mubr.bf16.mxu0 %v10617_v24  ;;  %v10632_v24 = vld [vmem:[#allocation72_spill] sm:$0xff] }
 0x5ae   : > { %v4011_v20 = vadd.f32 %v5299_v36, %v9624_v60  ;;  %v4086_v13 = vmax.f32 %v4008_v11, 0.0  ;;  %v10630_v11 = vld [vmem:[#allocation70_spill] sm:$0xff]  ;;  %v10631_v36 = vld [vmem:[#allocation71_spill] sm:$0xff] }
 0x5b0   : > { %v4087_v49 = vmax.f32 %v4011_v20, 0.0  ;;  %v5300_v0 = vpop.f32.mrb[68].mxu1 }
 0x5b1   : > { %v5301_v35 = vpop.f32.mrb[69].mxu1 }
 0x5b2   : > { %v5302_v3 = vadd.f32 %v5301_v35, %v5300_v0  ;;  %v5303_v19 = vpop.f32.mrb[70].mxu1  ;;  %v4110_v51 = vpack.c.bf16 %v4087_v49, %v4086_v13 }
 0x5b3   : > { %v5304_v40 = vpop.f32.mrb[71].mxu1 }
 0x5b4   : > { %v4016_v25 = vadd.f32 %v5302_v3, %v9624_v60  ;;  %v5305_v23 = vadd.f32 %v5304_v40, %v5303_v19  ;;  %5479 = vmatprep.mubr.bf16.mxu1 %v4110_v51  ;;  %5512 = vmatmul.mubr.bf16.vlgmr.msra.gmra.mrb[64].mxu0 %v10618_v15 }
 0x5b5   : > { %5515 = vmatprep.mubr.bf16.mxu0 %v10619_v47 }
 0x5b6   : > { %v4019_v41 = vadd.f32 %v5305_v23, %v9624_v60  ;;  %v4088_v10 = vmax.f32 %v4016_v25, 0.0 }
 0x5b8   : > { %v4089_v21 = vmax.f32 %v4019_v41, 0.0  ;;  %v5306_v8 = vpop.f32.mrb[72].mxu1 }
 0x5b9   : > { %v5307_v58 = vpop.f32.mrb[73].mxu1 }
 0x5ba   : > { %v4111_v22 = vpack.c.bf16 %v4089_v21, %v4088_v10  ;;  %v5308_v39 = vadd.f32 %v5307_v58, %v5306_v8  ;;  %v5309_v54 = vpop.f32.mrb[74].mxu1 }
 0x5bb   : > { %v5310_v17 = vpop.f32.mrb[75].mxu1 }
 0x5bc   : > { %v4024_v37 = vadd.f32 %v5308_v39, %v9624_v60  ;;  %v5311_v46 = vadd.f32 %v5310_v17, %v5309_v54  ;;  %5480 = vmatmul.mubr.bf16.vlgmr.msra.gmra.mrb[96].mxu1 %v4111_v22  ;;  %5516 = vmatmul.mubr.bf16.gmra.mrb[68].mxu0 %v10620_v33 }
 0x5bd   : > { %5519 = vmatprep.mubr.bf16.mxu0 %v10621_v52 }
 0x5be   : > { %v4027_v27 = vadd.f32 %v5311_v46, %v9624_v60  ;;  %v4090_v14 = vmax.f32 %v4024_v37, 0.0 }
 0x5c0   : > { %v4091_v42 = vmax.f32 %v4027_v27, 0.0  ;;  %v5312_v2 = vpop.f32.mrb[76].mxu1 }
 0x5c1   : > { %v5313_v59 = vpop.f32.mrb[77].mxu1 }
 0x5c2   : > { %v5314_v6 = vadd.f32 %v5313_v59, %v5312_v2  ;;  %v5315_v57 = vpop.f32.mrb[78].mxu1  ;;  %v4112_v34 = vpack.c.bf16 %v4091_v42, %v4090_v14 }
 0x5c3   : > { %v5316_v62 = vpop.f32.mrb[79].mxu1 }
 0x5c4   : > { %v4032_v5 = vadd.f32 %v5314_v6, %v9624_v60  ;;  %v5317_v18 = vadd.f32 %v5316_v62, %v5315_v57  ;;  %5483 = vmatprep.mubr.bf16.mxu1 %v4112_v34  ;;  %5520 = vmatmul.mubr.bf16.gmra.mrb[72].mxu0 %v10622_v61  ;;  %v5869_v34 = vmov 0.0   ;;  %v5781_v62 = vld [vmem:[%s9919_s3 + $0xc0] sm:$0xff]   ;;  %v5783_v61 = vld [vmem:[%s9919_s3 + $0xd0] sm:$0xff]  }
 0x5c5   : > { %5523 = vmatprep.mubr.bf16.mxu0 %v10623_v4  ;;  %5543 = vmatprep.subr.bf16.mxu1 %v5869_v34 }
 0x5c6   : > { %v4035_v43 = vadd.f32 %v5317_v18, %v9624_v60  ;;  %v4092_v55 = vmax.f32 %v4032_v5, 0.0  ;;  %5544 = vmatpush3.bf16.msra.mxu1 %v5781_v62  ;;  %v5782_v5 = vld [vmem:[%s9919_s3 + $0xc8] sm:$0xff]   ;;  %v9712_v18 = vld [vmem:[%s9920_s4 + $0x4] ss:$0 sm:$0xff] }
 0x5c7   : > { %5545 = vmatprep.subr.bf16.mxu1 %v5869_v34 }
 0x5c8   : > { %v4093_v53 = vmax.f32 %v4035_v43, 0.0 }
 0x5ca   : > { %v4113_v29 = vpack.c.bf16 %v4093_v53, %v4092_v55  ;;  %5546 = vmatpush3.bf16.msra.mxu1 %v5782_v5 }
 0x5cb   : > { %5547 = vmatprep.subr.bf16.mxu1 %v5869_v34 }
 0x5cc   : > { %5484 = vmatmul.mubr.bf16.gmra.mrb[100].mxu1 %v4113_v29  ;;  %5524 = vmatmul.mubr.bf16.gmra.mrb[76].mxu0 %v10624_v44 }
 0x5cd   : > { %5527 = vmatprep.mubr.bf16.mxu0 %v10625_v12 }
 0x5ce   : > { %5548 = vmatpush3.bf16.msra.mxu1 %v5783_v61 }
 0x5cf   : > { %5549 = vmatprep.subr.bf16.mxu1 %v5869_v34 }
 0x5d4   : > { %v5318_v26 = vpop.f32.mrb[80].mxu1  ;;  %5528 = vmatmul.mubr.bf16.gmra.mrb[80].mxu0 %v10626_v28 }
 0x5d5   : > { %v5319_v9 = vpop.f32.mrb[81].mxu1  ;;  %5531 = vmatprep.mubr.bf16.mxu0 %v10627_v50 }
 0x5d6   : > { %v5320_v1 = vadd.f32 %v5319_v9, %v5318_v26  ;;  %v5321_v16 = vpop.f32.mrb[82].mxu1  ;;  %v5784_v26 = vld [vmem:[%s9919_s3 + $0xd8] sm:$0xff]  }
 0x5d7   : > { %v5322_v31 = vpop.f32.mrb[83].mxu1  ;;  %5550 = vmatpush3.bf16.msra.mxu1 %v5784_v26 }
 0x5d8   : > { %v4040_v32 = vadd.f32 %v5320_v1, %v9624_v60  ;;  %v5323_v63 = vadd.f32 %v5322_v31, %v5321_v16  ;;  %5551 = vmatprep.subr.bf16.mxu1 %v5869_v34 }
 0x5da   : > { %v4043_v7 = vadd.f32 %v5323_v63, %v9624_v60  ;;  %v4094_v56 = vmax.f32 %v4040_v32, 0.0  ;;  %v5785_v32 = vld [vmem:[%s9919_s3 + $0xe0] sm:$0xff]  }
 0x5db   : > { %5552 = vmatpush3.bf16.msra.mxu1 %v5785_v32 }
 0x5dc   : > { %v4095_v38 = vmax.f32 %v4043_v7, 0.0  ;;  %5532 = vmatmul.mubr.bf16.gmra.mrb[84].mxu0 %v10628_v48  ;;  %5553 = vmatprep.subr.bf16.mxu1 %v5869_v34 }
 0x5dd   : > { %5535 = vmatprep.mubr.bf16.mxu0 %v10629_v45 }
 0x5de   : > { %v4114_v30 = vpack.c.bf16 %v4095_v38, %v4094_v56 }
 0x5e0   : > { %5487 = vmatprep.mubr.bf16.mxu1 %v4114_v30 }
 0x5e4   : > { %5536 = vmatmul.mubr.bf16.gmra.mrb[88].mxu0 %v10630_v11 }
 0x5e5   : > { %5539 = vmatprep.mubr.bf16.mxu0 %v10631_v36 }
 0x5ec   : > { %5540 = vmatmul.mubr.bf16.gmra.mrb[92].mxu0 %v10632_v24 }
 0x5f0   : > { %v5324_v20 = vpop.f32.mrb[84].mxu1 }
 0x5f1   : > { %v5325_v13 = vpop.f32.mrb[85].mxu1 }
 0x5f2   : > { %v5326_v49 = vadd.f32 %v5325_v13, %v5324_v20  ;;  %v5327_v0 = vpop.f32.mrb[86].mxu1 }
 0x5f3   : > { %v5328_v35 = vpop.f32.mrb[87].mxu1 }
 0x5f4   : > { %v4048_v3 = vadd.f32 %v5326_v49, %v9624_v60  ;;  %v5329_v19 = vadd.f32 %v5328_v35, %v5327_v0  ;;  %v5786_v0 = vld [vmem:[%s9919_s3 + $0xe8] sm:$0xff]  }
 0x5f5   : > { %5554 = vmatpush3.bf16.msra.mxu1 %v5786_v0 }
 0x5f6   : > { %v4051_v51 = vadd.f32 %v5329_v19, %v9624_v60  ;;  %v4096_v40 = vmax.f32 %v4048_v3, 0.0  ;;  %5555 = vmatprep.subr.bf16.mxu1 %v5869_v34 }
 0x5f8   : > { %v4097_v25 = vmax.f32 %v4051_v51, 0.0 }
 0x5fa   : > { %v4115_v23 = vpack.c.bf16 %v4097_v25, %v4096_v40 }
 0x5fc   : > { %5488 = vmatmul.mubr.bf16.gmra.mrb[104].mxu1 %v4115_v23 }
 0x60c   : > { %v5330_v15 = vpop.f32.mrb[88].mxu1 }
 0x60d   : > { %v5331_v47 = vpop.f32.mrb[89].mxu1 }
 0x60e   : > { %v5332_v41 = vadd.f32 %v5331_v47, %v5330_v15  ;;  %v5333_v10 = vpop.f32.mrb[90].mxu1 }
 0x60f   : > { %v5334_v21 = vpop.f32.mrb[91].mxu1 }
 0x610   : > { %v4056_v8 = vadd.f32 %v5332_v41, %v9624_v60  ;;  %v5335_v58 = vadd.f32 %v5334_v21, %v5333_v10  ;;  %v5787_v10 = vld [vmem:[%s9919_s3 + $0xf0] sm:$0xff]  }
 0x611   : > { %5556 = vmatpush3.bf16.msra.mxu1 %v5787_v10 }
 0x612   : > { %v4059_v22 = vadd.f32 %v5335_v58, %v9624_v60  ;;  %v4098_v39 = vmax.f32 %v4056_v8, 0.0  ;;  %5557 = vmatprep.subr.bf16.mxu1 %v5869_v34 }
 0x614   : > { %v4099_v54 = vmax.f32 %v4059_v22, 0.0 }
 0x616   : > { %v4116_v17 = vpack.c.bf16 %v4099_v54, %v4098_v39 }
 0x618   : > { %5491 = vmatprep.mubr.bf16.mxu1 %v4116_v17  ;;  %v5788_v17 = vld [vmem:[%s9919_s3 + $0xf8] sm:$0xff]  }
 0x619   : > { %5558 = vmatpush3.bf16.msra.mxu1 %v5788_v17 }
 0x61c   : > { %v5336_v37 = vpop.f32.mrb[92].mxu1 }
 0x61d   : > { %v5337_v46 = vpop.f32.mrb[93].mxu1 }
 0x61e   : > { %v5338_v33 = vadd.f32 %v5337_v46, %v5336_v37  ;;  %v5339_v52 = vpop.f32.mrb[94].mxu1 }
 0x61f   : > { %v5340_v27 = vpop.f32.mrb[95].mxu1 }
 0x620   : > { %v4064_v14 = vadd.f32 %v5338_v33, %v9624_v60  ;;  %v5341_v42 = vadd.f32 %v5340_v27, %v5339_v52 }
 0x622   : > { %v4067_v2 = vadd.f32 %v5341_v42, %v9624_v60  ;;  %v4100_v59 = vmax.f32 %v4064_v14, 0.0  ;;  %v9707_v60 = vld [vmem:[%s9920_s4 + $0x3] ss:$0 sm:$0xff] }
 0x623   : > { %v9719_v43 = vadd.f32 %v9712_v18, %v9707_v60 }
 0x624   : > { %v4101_v6 = vmax.f32 %v4067_v2, 0.0 }
 0x626   : > { %v4117_v57 = vpack.c.bf16 %v4101_v6, %v4100_v59 }
 0x628   : > { %5492 = vmatmul.mubr.bf16.gmra.mrb[108].mxu1 %v4117_v57 }
 0x629   : > { %5559 = vmatprep.mubr.msk.bf16.mxu1 %vm5870_vm10, %v5869_v34 }
 0x687   : > { %v5513_v4 = vpop.f32.mrb[64].mxu0 }
 0x688   : > { %v5579_v55 = vadd.f32 %v5513_v4, %v9707_v60  ;;  %v4453_v53 = vpop.f32.mrb[65].mxu0 }
 0x689   : > { %v5581_v29 = vadd.f32 %v9707_v60, %v4453_v53  ;;  %v5514_v44 = vpop.f32.mrb[66].mxu0 }
 0x68a   : > { %v4456_v12 = vpop.f32.mrb[67].mxu0  ;;  %v5580_v28 = vadd.f32 %v5579_v55, %v9712_v18  ;;  %v5584_v16 = vadd.f32 %v9719_v43, %v5514_v44 }
 0x68b   : > { %v5582_v9 = vadd.f32 %v5581_v29, %v9712_v18  ;;  %v5586_v50 = vadd.f32 %v9719_v43, %v4456_v12 }
 0x68c   : > { %v4614_v63 = vmax.f32 %v5580_v28, 0.0  ;;  %v4615_v30 = vmax.f32 %v5584_v16, 0.0 }
 0x68d   : > { %v4612_v1 = vmax.f32 %v5582_v9, 0.0  ;;  %v4613_v31 = vmax.f32 %v5586_v50, 0.0 }
 0x68f   : > { %v4716_v7 = vadd.f32 %v4613_v31, %v4612_v1  ;;  %4644 = vxpose.xlu0.b32.start [1/16] (narrow) %v4612_v1, 32  ;;  %v5481_v56 = vpop.f32.mrb[96].mxu1  ;;  %v5517_v38 = vpop.f32.mrb[68].mxu0 }
 0x690   : > { %v4286_v48 = vpop.f32.mrb[97].mxu1  ;;  %v4469_v45 = vpop.f32.mrb[69].mxu0  ;;  %v9743_v35 = vadd.f32 %v9719_v43, %v5517_v38  ;;  %v4295_v29 = vadd.f32 %v5481_v56, %v9707_v60 }
 0x691   : > { %v4717_v11 = vadd.f32 %v4716_v7, %v4614_v63  ;;  %v5590_v36 = vadd.f32 %v9719_v43, %v4469_v45  ;;  %v9737_v24 = vpop.f32.mrb[98].mxu1  ;;  %v5518_v20 = vpop.f32.mrb[70].mxu0  ;;  %v4287_v44 = vadd.f32 %v9707_v60, %v4286_v48 }
 0x692   : > { %v4289_v13 = vpop.f32.mrb[99].mxu1  ;;  %v4472_v49 = vpop.f32.mrb[71].mxu0  ;;  %v9748_v25 = vadd.f32 %v9719_v43, %v5518_v20  ;;  %v4618_v15 = vmax.f32 %v9743_v35, 0.0  ;;  %v4298_v16 = vadd.f32 %v9737_v24, %v9707_v60  ;;  %v5612_v56 = vadd.f32 %v9712_v18, %v4295_v29 }
 0x693   : > { %v4616_v3 = vmax.f32 %v5590_v36, 0.0  ;;  %v4718_v19 = vadd.f32 %v4717_v11, %v4615_v30  ;;  %v5594_v51 = vadd.f32 %v9719_v43, %v4472_v49  ;;  %4645 = vxpose.xlu0.b32.cont [2/16] (narrow) %v4613_v31, 32  ;;  %v4290_v31 = vadd.f32 %v9707_v60, %v4289_v13 }
 0x694   : > { %v4619_v8 = vmax.f32 %v9748_v25, 0.0  ;;  %v5618_v24 = vadd.f32 %v9712_v18, %v4298_v16 }
 0x695   : > { %v4719_v40 = vadd.f32 %v4718_v19, %v4616_v3  ;;  %v4617_v23 = vmax.f32 %v5594_v51, 0.0  ;;  %v5621_v0 = vadd.f32 %v9712_v18, %v4290_v31 }
 0x697   : > { %v4720_v47 = vadd.f32 %v4719_v40, %v4617_v23  ;;  %4646 = vxpose.xlu0.b32.cont [3/16] (narrow) %v4614_v63, 32  ;;  %v5521_v41 = vpop.f32.mrb[72].mxu0 }
 0x698   : > { %v4485_v21 = vpop.f32.mrb[73].mxu0  ;;  %v9764_v37 = vadd.f32 %v9719_v43, %v5521_v41 }
 0x699   : > { %v4721_v58 = vadd.f32 %v4720_v47, %v4618_v15  ;;  %v9758_v22 = vadd.f32 %v9719_v43, %v4485_v21  ;;  %v5522_v39 = vpop.f32.mrb[74].mxu0 }
 0x69a   : > { %v4488_v54 = vpop.f32.mrb[75].mxu0  ;;  %v9776_v14 = vadd.f32 %v9719_v43, %v5522_v39  ;;  %v4622_v2 = vmax.f32 %v9764_v37, 0.0 }
 0x69b   : > { %v4620_v46 = vmax.f32 %v9758_v22, 0.0  ;;  %v4722_v33 = vadd.f32 %v4721_v58, %v4619_v8  ;;  %v9770_v52 = vadd.f32 %v9719_v43, %v4488_v54  ;;  %4647 = vxpose.xlu0.b32.cont [4/16] (narrow) %v4615_v30, 32  ;;  %v5615_v30 = vadd.f32 %v9712_v18, %v4287_v44 }
 0x69c   : > { %v4623_v34 = vmax.f32 %v9776_v14, 0.0 }
 0x69d   : > { %v4723_v27 = vadd.f32 %v4722_v33, %v4620_v46  ;;  %v4621_v42 = vmax.f32 %v9770_v52, 0.0 }
 0x69f   : > { %v4724_v59 = vadd.f32 %v4723_v27, %v4621_v42  ;;  %4648 = vxpose.xlu0.b32.cont [5/16] (narrow) %v4616_v3, 32  ;;  %v5485_v6 = vpop.f32.mrb[100].mxu1  ;;  %v5525_v57 = vpop.f32.mrb[76].mxu0 }
 0x6a0   : > { %v4302_v62 = vpop.f32.mrb[101].mxu1  ;;  %v4501_v5 = vpop.f32.mrb[77].mxu0  ;;  %v9791_v28 = vadd.f32 %v9719_v43, %v5525_v57  ;;  %v4311_v35 = vadd.f32 %v5485_v6, %v9707_v60 }
 0x6a1   : > { %v4725_v61 = vadd.f32 %v4724_v59, %v4622_v2  ;;  %v9786_v4 = vadd.f32 %v9719_v43, %v4501_v5  ;;  %v5486_v55 = vpop.f32.mrb[102].mxu1  ;;  %v5526_v53 = vpop.f32.mrb[78].mxu0  ;;  %v4303_v51 = vadd.f32 %v9707_v60, %v4302_v62 }
 0x6a2   : > { %v4305_v12 = vpop.f32.mrb[103].mxu1  ;;  %v4504_v26 = vpop.f32.mrb[79].mxu0  ;;  %v9805_v63 = vadd.f32 %v9719_v43, %v5526_v53  ;;  %v4626_v38 = vmax.f32 %v9791_v28, 0.0  ;;  %v4314_v47 = vadd.f32 %v5486_v55, %v9707_v60  ;;  %v5624_v58 = vadd.f32 %v9712_v18, %v4311_v35 }
 0x6a3   : > { %v4624_v9 = vmax.f32 %v9786_v4, 0.0  ;;  %v4726_v50 = vadd.f32 %v4725_v61, %v4623_v34  ;;  %v9797_v1 = vadd.f32 %v9719_v43, %v4504_v26  ;;  %4649 = vxpose.xlu0.b32.cont [6/16] (narrow) %v4617_v23, 32  ;;  %v4306_v41 = vadd.f32 %v9707_v60, %v4305_v12 }
 0x6a4   : > { %v4627_v43 = vmax.f32 %v9805_v63, 0.0  ;;  %v5627_v33 = vadd.f32 %v9712_v18, %v4303_v51 }
 0x6a5   : > { %v4727_v32 = vadd.f32 %v4726_v50, %v4624_v9  ;;  %v4625_v7 = vmax.f32 %v9797_v1, 0.0  ;;  %v5633_v5 = vadd.f32 %v9712_v18, %v4306_v41 }
 0x6a7   : > { %v4728_v48 = vadd.f32 %v4727_v32, %v4625_v7  ;;  %4650 = vxpose.xlu0.b32.cont [7/16] (narrow) %v4618_v15, 32  ;;  %v5529_v45 = vpop.f32.mrb[80].mxu0 }
 0x6a8   : > { %v5613_v11 = vadd.f32 %v5612_v56, %v5529_v45  ;;  %v4517_v36 = vpop.f32.mrb[81].mxu0 }
 0x6a9   : > { %v4729_v20 = vadd.f32 %v4728_v48, %v4626_v38  ;;  %v5616_v13 = vadd.f32 %v5615_v30, %v4517_v36  ;;  %v5530_v49 = vpop.f32.mrb[82].mxu0 }
 0x6aa   : > { %v5619_v3 = vadd.f32 %v5618_v24, %v5530_v49  ;;  %v4520_v19 = vpop.f32.mrb[83].mxu0  ;;  %v4630_v39 = vmax.f32 %v5613_v11, 0.0 }
 0x6ab   : > { %v4628_v40 = vmax.f32 %v5616_v13, 0.0  ;;  %v4730_v23 = vadd.f32 %v4729_v20, %v4627_v43  ;;  %v5622_v15 = vadd.f32 %v5621_v0, %v4520_v19  ;;  %4651 = vxpose.xlu0.b32.cont [8/16] (narrow) %v4619_v8, 32  ;;  %v5630_v8 = vadd.f32 %v9712_v18, %v4314_v47 }
 0x6ac   : > { %v4631_v59 = vmax.f32 %v5619_v3, 0.0 }
 0x6ad   : > { %v4731_v10 = vadd.f32 %v4730_v23, %v4628_v40  ;;  %v4629_v21 = vmax.f32 %v5622_v15, 0.0  ;;  %4676 = vxpose.xlu1.b32.start [1/16] (narrow) %v4628_v40, 32 }
 0x6af   : > { %v4732_v54 = vadd.f32 %v4731_v10, %v4629_v21  ;;  %4652 = vxpose.xlu0.b32.cont [9/16] (narrow) %v4620_v46, 32  ;;  %v5533_v17 = vpop.f32.mrb[84].mxu0 }
 0x6b0   : > { %v5625_v27 = vadd.f32 %v5624_v58, %v5533_v17  ;;  %v4533_v25 = vpop.f32.mrb[85].mxu0 }
 0x6b1   : > { %v4733_v6 = vadd.f32 %v4732_v54, %v4630_v39  ;;  %v5628_v57 = vadd.f32 %v5627_v33, %v4533_v25  ;;  %v5534_v62 = vpop.f32.mrb[86].mxu0  ;;  %4677 = vxpose.xlu1.b32.cont [2/16] (narrow) %v4629_v21, 32 }
 0x6b2   : > { %v5631_v61 = vadd.f32 %v5630_v8, %v5534_v62  ;;  %v4536_v55 = vpop.f32.mrb[87].mxu0  ;;  %v4634_v12 = vmax.f32 %v5625_v27, 0.0 }
 0x6b3   : > { %v4632_v53 = vmax.f32 %v5628_v57, 0.0  ;;  %v4734_v29 = vadd.f32 %v4733_v6, %v4631_v59  ;;  %v5634_v22 = vadd.f32 %v5633_v5, %v4536_v55  ;;  %4653 = vxpose.xlu0.b32.cont [10/16] (narrow) %v4621_v42, 32 }
 0x6b4   : > { %v4635_v31 = vmax.f32 %v5631_v61, 0.0 }
 0x6b5   : > { %v4735_v46 = vadd.f32 %v4734_v29, %v4632_v53  ;;  %v4633_v44 = vmax.f32 %v5634_v22, 0.0  ;;  %4678 = vxpose.xlu1.b32.cont [3/16] (narrow) %v4630_v39, 32 }
 0x6b7   : > { %v4736_v26 = vadd.f32 %v4735_v46, %v4633_v44  ;;  %4654 = vxpose.xlu0.b32.cont [11/16] (narrow) %v4622_v2, 32  ;;  %v5537_v50 = vpop.f32.mrb[88].mxu0 }
 0x6b8   : > { %v4549_v16 = vpop.f32.mrb[89].mxu0 }
 0x6b9   : > { %v4737_v32 = vadd.f32 %v4736_v26, %v4634_v12  ;;  %v5538_v56 = vpop.f32.mrb[90].mxu0  ;;  %4679 = vxpose.xlu1.b32.cont [4/16] (narrow) %v4631_v59, 32 }
 0x6ba   : > { %v4552_v48 = vpop.f32.mrb[91].mxu0 }
 0x6bb   : > { %v4738_v45 = vadd.f32 %v4737_v32, %v4635_v31  ;;  %4655 = vxpose.xlu0.b32.cont [12/16] (narrow) %v4623_v34, 32 }
 0x6bd   : > { %4680 = vxpose.xlu1.b32.cont [5/16] (narrow) %v4632_v53, 32 }
 0x6bf   : > { %4656 = vxpose.xlu0.b32.cont [13/16] (narrow) %v4624_v9, 32  ;;  %v5541_v52 = vpop.f32.mrb[92].mxu0 }
 0x6c0   : > { %v4565_v42 = vpop.f32.mrb[93].mxu0 }
 0x6c1   : > { %v5542_v30 = vpop.f32.mrb[94].mxu0  ;;  %4681 = vxpose.xlu1.b32.cont [6/16] (narrow) %v4633_v44, 32 }
 0x6c2   : > { %v4568_v37 = vpop.f32.mrb[95].mxu0 }
 0x6c3   : > { %4657 = vxpose.xlu0.b32.cont [14/16] (narrow) %v4625_v7, 32 }
 0x6c5   : > { %4682 = vxpose.xlu1.b32.cont [7/16] (narrow) %v4634_v12, 32 }
 0x6c7   : > { %4658 = vxpose.xlu0.b32.cont [15/16] (narrow) %v4626_v38, 32 }
 0x6c9   : > { %4683 = vxpose.xlu1.b32.cont [8/16] (narrow) %v4635_v31, 32 }
 0x6cb   : > { %4659 = vxpose.xlu0.b32.end [16/16] (narrow) %v4627_v43, 32 }
 0x6cf   : > { %v5489_v14 = vpop.f32.mrb[104].mxu1 }
 0x6d0   : > { %v4327_v2 = vadd.f32 %v5489_v14, %v9707_v60  ;;  %v4318_v34 = vpop.f32.mrb[105].mxu1  ;;  %v4773_v14 = vld [vmem:[%s9920_s4 + $0x5] sm:$0x1] }
 0x6d1   : > { %v4319_v4 = vadd.f32 %v9707_v60, %v4318_v34  ;;  %v5490_v9 = vpop.f32.mrb[106].mxu1 }
 0x6d2   : > { %v5636_v11 = vadd.f32 %v9712_v18, %v4327_v2  ;;  %v4330_v1 = vadd.f32 %v5490_v9, %v9707_v60  ;;  %v4321_v7 = vpop.f32.mrb[107].mxu1 }
 0x6d3   : > { %v5639_v36 = vadd.f32 %v9712_v18, %v4319_v4  ;;  %v4322_v28 = vadd.f32 %v9707_v60, %v4321_v7 }
 0x6d4   : > { %v5642_v38 = vadd.f32 %v9712_v18, %v4330_v1  ;;  %v5637_v63 = vadd.f32 %v5636_v11, %v5537_v50 }
 0x6d5   : > { %v5645_v24 = vadd.f32 %v9712_v18, %v4322_v28  ;;  %v5640_v43 = vadd.f32 %v5639_v36, %v4549_v16 }
 0x6d6   : > { %v5643_v20 = vadd.f32 %v5642_v38, %v5538_v56  ;;  %v4638_v19 = vmax.f32 %v5637_v63, 0.0 }
 0x6d7   : > { %v4636_v13 = vmax.f32 %v5640_v43, 0.0  ;;  %v5646_v49 = vadd.f32 %v5645_v24, %v4552_v48 }
 0x6d8   : > { %v4639_v40 = vmax.f32 %v5643_v20, 0.0 }
 0x6d9   : > { %4684 = vxpose.xlu1.b32.cont [9/16] (narrow) %v4636_v13, 32  ;;  %v4739_v0 = vadd.f32 %v4738_v45, %v4636_v13  ;;  %v4637_v35 = vmax.f32 %v5646_v49, 0.0 }
 0x6db   : > { %v4740_v3 = vadd.f32 %v4739_v0, %v4637_v35 }
 0x6dd   : > { %4685 = vxpose.xlu1.b32.cont [10/16] (narrow) %v4637_v35, 32  ;;  %v4741_v51 = vadd.f32 %v4740_v3, %v4638_v19 }
 0x6df   : > { %v4742_v23 = vadd.f32 %v4741_v51, %v4639_v40 }
 0x6e1   : > { %4686 = vxpose.xlu1.b32.cont [11/16] (narrow) %v4638_v19, 32 }
 0x6e5   : > { %4687 = vxpose.xlu1.b32.cont [12/16] (narrow) %v4639_v40, 32 }
 0x6fb   : > { %v5493_v15 = vpop.f32.mrb[108].mxu1 }
 0x6fc   : > { %v4343_v47 = vadd.f32 %v5493_v15, %v9707_v60  ;;  %v4334_v41 = vpop.f32.mrb[109].mxu1 }
 0x6fd   : > { %v4335_v10 = vadd.f32 %v9707_v60, %v4334_v41  ;;  %v5494_v21 = vpop.f32.mrb[110].mxu1 }
 0x6fe   : > { %v5648_v58 = vadd.f32 %v9712_v18, %v4343_v47  ;;  %v4346_v39 = vadd.f32 %v5494_v21, %v9707_v60  ;;  %v4337_v54 = vpop.f32.mrb[111].mxu1 }
 0x6ff   : > { %v5651_v17 = vadd.f32 %v9712_v18, %v4335_v10  ;;  %v4338_v33 = vadd.f32 %v9707_v60, %v4337_v54 }
 0x700   : > { %v5654_v27 = vadd.f32 %v9712_v18, %v4346_v39  ;;  %v5649_v25 = vadd.f32 %v5648_v58, %v5541_v52 }
 0x701   : > { %v5657_v8 = vadd.f32 %v9712_v18, %v4338_v33  ;;  %v5652_v59 = vadd.f32 %v5651_v17, %v4565_v42 }
 0x702   : > { %v5655_v6 = vadd.f32 %v5654_v27, %v5542_v30  ;;  %v4642_v53 = vmax.f32 %v5649_v25, 0.0 }
 0x703   : > { %v4640_v57 = vmax.f32 %v5652_v59, 0.0  ;;  %v5658_v62 = vadd.f32 %v5657_v8, %v4568_v37 }
 0x704   : > { %v4643_v22 = vmax.f32 %v5655_v6, 0.0 }
 0x705   : > { %4688 = vxpose.xlu1.b32.cont [13/16] (narrow) %v4640_v57, 32  ;;  %v4743_v5 = vadd.f32 %v4742_v23, %v4640_v57  ;;  %v4641_v61 = vmax.f32 %v5658_v62, 0.0 }
 0x707   : > { %v4744_v55 = vadd.f32 %v4743_v5, %v4641_v61 }
 0x709   : > { %4689 = vxpose.xlu1.b32.cont [14/16] (narrow) %v4641_v61, 32  ;;  %v4745_v29 = vadd.f32 %v4744_v55, %v4642_v53 }
 0x70b   : > { %v4746_v60 = vadd.f32 %v4745_v29, %v4643_v22 }
 0x70d   : > { %4690 = vxpose.xlu1.b32.cont [15/16] (narrow) %v4642_v53, 32  ;;  %v4747_v46 = vrot.slane %v4746_v60, 4 }
 0x70f   : > { %v4748_v18 = vadd.f32 %v4747_v46, %v4746_v60  ;;  %v4660_v44 = vpop.trf.xlu0 }
 0x710   : > { %4708 = vst [vmem:[%s261_s17] sm:$0xff] %v4660_v44 }
 0x711   : > { %4691 = vxpose.xlu1.b32.end [16/16] (narrow) %v4643_v22, 32  ;;  %v4749_v12 = vrot.slane %v4748_v18, 2 }
 0x713   : > { %v4750_v26 = vadd.f32 %v4749_v12, %v4748_v18  ;;  %v4661_v50 = vpop.trf.xlu0 }
 0x714   : > { %4710 = vst [vmem:[%s261_s17 + $0x10] sm:$0xff] %v4661_v50 }
 0x715   : > { %v4751_v16 = vrot.slane %v4750_v26, 1 }
 0x717   : > { %v4752_v31 = vadd.f32 %v4751_v16, %v4750_v26  ;;  %v4662_v32 = vpop.trf.xlu0 }
 0x718   : > { %4712 = vst [vmem:[%s261_s17 + $0x20] sm:$0xff] %v4662_v32 }
 0x719   : > { %v4754_v56 = vmul.f32 0.00390625, %v4752_v31 }
 0x71b   : > { %v4755_v48 = vpack.c.bf16 %v4754_v56, %v4754_v56  ;;  %v4663_v30 = vpop.trf.xlu0 }
 0x71c   : > { %4714 = vst [vmem:[%s261_s17 + $0x30] sm:$0xff] %v4663_v30 }
 0x71d   : > { %5560 = vmatmul.mubr.bf16.vlgmr.msra.gmra.mrb[112].mxu1 %v4755_v48 }
 0x755   : > { %v4692_v45 = vpop.trf.xlu1 }
 0x756   : > { %4709 = vst [vmem:[%s261_s17 + $0x8] sm:$0xff] %v4692_v45 }
 0x759   : > { %v4693_v52 = vpop.trf.xlu1 }
 0x75a   : > { %4711 = vst [vmem:[%s261_s17 + $0x18] sm:$0xff] %v4693_v52 }
 0x75d   : > { %v4694_v42 = vpop.trf.xlu1 }
 0x75e   : > { %4713 = vst [vmem:[%s261_s17 + $0x28] sm:$0xff] %v4694_v42 }
 0x761   : > { %v4695_v37 = vpop.trf.xlu1 }
 0x762   : > { %4715 = vst [vmem:[%s261_s17 + $0x38] sm:$0xff] %v4695_v37 }
 0x7f0   : > { %v4856_v2 = vpop.f32.mrb[112].mxu1 }
 0x7f1   : > { %v4857_v34 = vadd.f32 %v4856_v2, %v4773_v14  ;;  %v5561_v4 = vpop.f32.mrb[113].mxu1 }
 0x7f2   : > { %v4859_v9 = vpop.f32.mrb[114].mxu1 }
 0x7f3   : > { %4862 = vst [vmem:[%s251_s13] sm:$0x1] %v4857_v34  ;;  %v5562_v11 = vpop.f32.mrb[115].mxu1 }
 0x7f4   : > { %5809 = shalt.err (!%p5806_p3)
}
 0x7f5   : > { %s5810_s16 = scalar_lea.hbm %s9874_s26, 16  ;;  %s5814_s10 = scalar_lea.hbm %s9922_s6, 32 }
 0x7f6   : > { %p5811_p4 = scmp.ne.s32.totalorder %s9874_s26, %s5810_s16  ;;  %p5815_p9 = scmp.lt.u32.totalorder %s9874_s26, %s9922_s6 }
 0x7f7   : > { %p5816_p10 = scmp.lt.u32.totalorder %s5814_s10, %s5810_s16  ;;  %p5818_p12 = scmp.lt.u32.totalorder %s5810_s16, %s9874_s26 }
 0x7f8   : > { %p5812_p7 = pnand %p5811_p4, %p5945_p5 }
 0x7f9   : > { %p5817_p11 = por %p5816_p10, %p5815_p9 }
 0x7fa   : > { %p5813_p8 = pneg %p5812_p7 }
 0x7fb   : > { %p5819_p13 = por %p5818_p12, %p5817_p11 }
 0x7fd   : > { %p5820_p0 = pnand %p5819_p13, %p5813_p8 }
 0x7ff   : > { %5823 = shalt.err (!%p5820_p0)
}
 0x800   : > { %5675 = dma.vmem_to_hbm [thread:$0]  (%p5945_p5), %s9876_s11, 16, %s9874_s26, %s4869_s15  }
 0x801 PF: > { %p5681_p1 = scmp.ge.s32.totalorder %s5858_s24, 2  ;;  %s4904_s13 = sand.u32 1, %s5846_s21  }
 0x802   : > { %s4905_s12 = scalar_lea.sflag [#allocation3], %s4904_s13 }
 0x803   : > { %p5678_p2 = pnand %p5681_p1, %p5949_p6 }
 0x805   : > { %5841 = dma.done.wait (!%p5678_p2), %s4905_s12, 16  }
 0x806   : > { %5843 = vsyncadd (!%p5678_p2), %s4905_s12, 4294967280  ;;  %p17_p3 = scmp.ge.s32.totalorder %s5932_s27, 4   ;;  %s10633_s21 = smov %s5850_s22 }
 0x807   : > { %s10634_s22 = smov %s5854_s23  ;;  %s10635_s23 = smov %s5943_s30 }
 0x808   : > { %s10636_s24 = smov %s5932_s27  ;;  %19 = sbr.rel (!%p17_p3) target bundleno = 3 (0x3), region = 90 }
 0x80f   :  { %4909 = vsyncpa [#allocation3], 1 }
 0x810   :  { %4911 = vsyncpa [#allocation3 + $0x1], 1 }

</bundles_post_ra>
